<compile_context>
chip_gen: v7x
topology: tpu7x:2x2x1
jax: 0.10.0
libtpu: 0.0.40
codegen_flags: <defaults>
</compile_context>

<pallas_src>
import numpy as np
import jax
import jax.numpy as jnp
from jax import lax
from jax.experimental import pallas as pl
from jax.experimental.pallas import tpu as pltpu

EPS = 1e-12
GAUSS_K = np.array([0.05, 0.25, 0.4, 0.25, 0.05], dtype=np.float32)


def _replicate_conv_matrix(n):
    """M such that (M @ x) applies the 5-tap Gaussian along an axis of length n
    with replicate ('edge') padding: out[i] = sum_d k[d] * x[clamp(i+d-2)]."""
    m = np.zeros((n, n), dtype=np.float32)
    r = len(GAUSS_K) // 2
    for i in range(n):
        for d, kv in enumerate(GAUSS_K):
            src = min(max(i + d - r, 0), n - 1)
            m[i, src] += kv
    return m


def _pick_frames_per_block(b, h, w, budget_bytes=4 * 1024 * 1024):
    """Largest divisor of b whose double-buffered (x,y) f32 frame block fits budget."""
    per_frame = h * w * 4 * 2 * 2  # x + y, double-buffered, f32
    tb = max(1, min(b, budget_bytes // max(per_frame, 1)))
    while b % tb:
        tb -= 1
    return tb


def _make_kernel(tb, h, w, hf):
    tw2 = 2 * w

    def kernel(x_ref, y_ref, csh_ref, lh_ref, rsk_ref, out_ref):
        # ---- difference once (linearity of DFT and Laplacian) --------------
        d = x_ref[...] - y_ref[...]                       # (tb*h, w) f32
        char_sum = jnp.sum(jnp.sqrt(d * d + EPS))         # CharbonnierLoss sum

        db = d.astype(jnp.bfloat16)
        # Batched right-side matmul for ALL frames: [d@Cw | d@Sw | d@Lw]
        r = jnp.dot(db, rsk_ref[...], preferred_element_type=jnp.float32)
        rb = r.astype(jnp.bfloat16)                       # (tb*h, 3w)

        csh = csh_ref[...]                                # (2*hf, h) bf16
        lh = lh_ref[...]                                  # (h, h)    bf16

        fft_sum = jnp.float32(0.0)
        edge_sum = jnp.float32(0.0)
        for f in range(tb):                               # static, unrolled
            r_f = rb[f * h:(f + 1) * h, :]                # (h, 3w)

            # -- FFT-L1: Q = [w*Ch; w*Sh] @ [d@Cw | d@Sw] -> weighted re/im --
            q = jnp.dot(csh, r_f[:, :tw2],
                        preferred_element_type=jnp.float32)   # (2*hf, 2w)
            re = q[:hf, :w] - q[hf:, w:]                  # w_u * dRe
            im = q[:hf, w:] + q[hf:, :w]                  # w_u * |dIm| (sign-free)
            fft_sum = fft_sum + jnp.sum(jnp.abs(re)) + jnp.sum(jnp.abs(im))

            # -- Edge: lap(d) = d - Lh @ (d @ Lw) ----------------------------
            sm = jnp.dot(lh, r_f[:, tw2:],
                         preferred_element_type=jnp.float32)  # (h, w)
            ed = d[f * h:(f + 1) * h, :] - sm
            edge_sum = edge_sum + jnp.sum(jnp.sqrt(ed * ed + EPS))

        out_ref[0, 0] = char_sum
        out_ref[0, 1] = fft_sum
        out_ref[0, 2] = edge_sum

    return kernel


def _build_pallas_call(tb, nblk, h, w, hf, single_buffer_consts):
    kernel = _make_kernel(tb, h, w, hf)

    def const_spec(shape):
        kwargs = {}
        if single_buffer_consts:
            # constant index_map -> double-buffering buys nothing; halve VMEM
            kwargs["pipeline_mode"] = pl.Buffered(1)
        return pl.BlockSpec(shape, lambda i: (0, 0), **kwargs)

    grid_spec = pltpu.PrefetchScalarGridSpec(
        num_scalar_prefetch=0,
        grid=(nblk,),
        in_specs=[
            pl.BlockSpec((tb * h, w), lambda i: (i, 0)),     # x block (TB frames)
            pl.BlockSpec((tb * h, w), lambda i: (i, 0)),     # y block
            const_spec((2 * hf, h)),                         # [w*Ch; w*Sh]
            const_spec((h, h)),                              # Lh
            const_spec((w, 3 * w)),                          # [Cw | Sw | Lw]
        ],
        # per-block partial sums -> batch axis can be split across TensorCores
        out_specs=pl.BlockSpec((1, 3), lambda i: (i, 0), memory_space=pltpu.SMEM),
    )
    return pl.pallas_call(
        kernel,
        out_shape=jax.ShapeDtypeStruct((nblk, 3), jnp.float32),
        grid_spec=grid_spec,
        compiler_params=pltpu.CompilerParams(
            dimension_semantics=("parallel",),
            vmem_limit_bytes=64 * 1024 * 1024,
        ),
    )


def _run_kernel(x, y, csh, lh, rsk, *, tb, nblk, h, w, hf):
    try:
        out = _build_pallas_call(tb, nblk, h, w, hf, True)(x, y, csh, lh, rsk)
        return jax.block_until_ready(out)
    except Exception:
        # fall back if this JAX build rejects single-buffered pipeline_mode
        out = _build_pallas_call(tb, nblk, h, w, hf, False)(x, y, csh, lh, rsk)
        return jax.block_until_ready(out)


def cvqe_loss(img1, img2):
    n, t, c, h, w = img1.shape
    assert c == 1, "EdgeLoss' (1,1,5,5) conv kernel requires c == 1"
    b = n * t * c
    hf = h // 2 + 1

    # frames stacked along sublanes: (b*h, w)
    x = img1.reshape(b * h, w).astype(jnp.float32)
    y = img2.reshape(b * h, w).astype(jnp.float32)

    # ---- constant operators (built in f32, shipped as bf16 MXU operands) ----
    mh = _replicate_conv_matrix(h)                  # row filter (replicate pad)
    mw = _replicate_conv_matrix(w)                  # col filter
    eh = np.zeros(h, np.float32); eh[::2] = 1.0
    ew = np.zeros(w, np.float32); ew[::2] = 1.0
    # conv_gauss(X) = Mh X Mw^T ; lap(X) = X - Lh X Lw with the mask folded in:
    lh_np = 4.0 * mh @ np.diag(eh) @ mh             # (h, h)
    lw_np = mw.T @ np.diag(ew) @ mw.T               # (w, w)

    # Hermitian-reduced, row-weighted DFT operators (real input symmetry)
    ang_h = 2.0 * np.pi * np.outer(np.arange(hf), np.arange(h)) / h
    wgt = np.full((hf, 1), 2.0, np.float32)
    wgt[0, 0] = 1.0
    if h % 2 == 0:
        wgt[-1, 0] = 1.0
    csh_np = np.concatenate([wgt * np.cos(ang_h), wgt * np.sin(ang_h)], axis=0)
    ang_w = 2.0 * np.pi * np.outer(np.arange(w), np.arange(w)) / w
    rsk_np = np.concatenate([np.cos(ang_w), np.sin(ang_w), lw_np], axis=1)

    csh = jnp.asarray(csh_np, jnp.float32).astype(jnp.bfloat16)   # (2*hf, h)
    lh = jnp.asarray(lh_np, jnp.float32).astype(jnp.bfloat16)     # (h, h)
    rsk = jnp.asarray(rsk_np, jnp.float32).astype(jnp.bfloat16)   # (w, 3w)

    tb = _pick_frames_per_block(b, h, w)
    nblk = b // tb

    parts = _run_kernel(x, y, csh, lh, rsk, tb=tb, nblk=nblk, h=h, w=w, hf=hf)
    sums = jnp.sum(parts, axis=0)                  # (3,) partial -> global sums
    n_el = jnp.float32(b * h * w)
    char = sums[0] / n_el
    fft = sums[1] / (2.0 * n_el)                   # L1 mean over stacked (..., 2)
    edge = sums[2] / n_el
    return char + 0.01 * fft + 0.05 * edge


# ---------------- pure-JAX reference (mirrors the PyTorch module) -------------
def cvqe_loss_ref(img1, img2):
    x = img1.astype(jnp.float32)
    y = img2.astype(jnp.float32)
    char = jnp.mean(jnp.sqrt((x - y) ** 2 + EPS))

    fx = jnp.fft.fft2(x, axes=(-2, -1))
    fy = jnp.fft.fft2(y, axes=(-2, -1))
    sx = jnp.stack([fx.real, fx.imag], -1)
    sy = jnp.stack([fy.real, fy.imag], -1)
    fft = jnp.mean(jnp.abs(sx - sy))

    n, t, c, h, w = x.shape
    kern = jnp.asarray(np.outer(GAUSS_K, GAUSS_K))[None, None]

    def conv_gauss(img):  # (B, 1, H, W)
        p = jnp.pad(img, ((0, 0), (0, 0), (2, 2), (2, 2)), mode='edge')
        return lax.conv_general_dilated(p, kern, (1, 1), 'VALID',
                                        dimension_numbers=('NCHW', 'OIHW', 'NCHW'))

    def lap(img):
        f = conv_gauss(img)
        nf = jnp.zeros_like(f).at[:, :, ::2, ::2].set(f[:, :, ::2, ::2] * 4.0)
        return img - conv_gauss(nf)

    xb = x.reshape(n * t, c, h, w)
    yb = y.reshape(n * t, c, h, w)
    edge = jnp.mean(jnp.sqrt((lap(xb) - lap(yb)) ** 2 + EPS))
    return char + 0.01 * fft + 0.05 * edge


if __name__ == "__main__":
    key = jax.random.PRNGKey(0)
    k1, k2 = jax.random.split(key)
    shape = (2, 3, 1, 16, 16)  # (n, t, c, h, w); c must be 1 for EdgeLoss
    img1 = jax.random.normal(k1, shape, dtype=jnp.float32)
    img2 = jax.random.normal(k2, shape, dtype=jnp.float32)

    loss = jax.block_until_ready(cvqe_loss(img1, img2))
    ref = jax.block_until_ready(cvqe_loss_ref(img1, img2))
    np.testing.assert_allclose(float(loss), float(ref), rtol=3e-3, atol=1e-4)
    print("KERNEL_OK")
</pallas_src>

<mosaic_0001>
module attributes {stable_mosaic.version = 11 : i64} {
  func.func @kernel(%arg0: i32, %arg1: memref<96x16xf32, #tpu.memory_space<vmem>>, %arg2: memref<96x16xf32, #tpu.memory_space<vmem>>, %arg3: memref<18x16xbf16, #tpu.memory_space<vmem>>, %arg4: memref<16x16xbf16, #tpu.memory_space<vmem>>, %arg5: memref<16x48xbf16, #tpu.memory_space<vmem>>, %arg6: memref<1x3xf32, #tpu.memory_space<smem>>) attributes {dimension_semantics = [#tpu.dimension_semantics<parallel>], iteration_bounds = array<i64: 1>, scalar_prefetch = 0 : i64, scratch_operands = 0 : i64, tpu.core_type = #tpu.core_type<tc>, window_params = [{transform_indices = @transform_0, window_bounds = array<i64: 96, 16>}, {transform_indices = @transform_1, window_bounds = array<i64: 96, 16>}, {pipeline_mode = #tpu.pipeline_mode<synchronous>, transform_indices = @transform_2, window_bounds = array<i64: 18, 16>}, {pipeline_mode = #tpu.pipeline_mode<synchronous>, transform_indices = @transform_3, window_bounds = array<i64: 16, 16>}, {pipeline_mode = #tpu.pipeline_mode<synchronous>, transform_indices = @transform_4, window_bounds = array<i64: 16, 48>}, {transform_indices = @transform_5, window_bounds = array<i64: 1, 3>}]} {
    %c0 = arith.constant 0 : index
    %c0_0 = arith.constant 0 : index
    %0 = vector.load %arg1[%c0, %c0_0] : memref<96x16xf32, #tpu.memory_space<vmem>>, vector<96x16xf32>
    %c0_1 = arith.constant 0 : index
    %c0_2 = arith.constant 0 : index
    %1 = vector.load %arg2[%c0_1, %c0_2] : memref<96x16xf32, #tpu.memory_space<vmem>>, vector<96x16xf32>
    %2 = arith.subf %0, %1 : vector<96x16xf32>
    %3 = arith.mulf %2, %2 : vector<96x16xf32>
    %cst = arith.constant 9.99999996E-13 : f32
    %4 = vector.broadcast %cst : f32 to vector<96x16xf32>
    %5 = arith.addf %3, %4 : vector<96x16xf32>
    %6 = math.sqrt %5 : vector<96x16xf32>
    %7 = vector.shape_cast %6 : vector<96x16xf32> to vector<1x96x16xf32>
    %cst_3 = arith.constant dense<0.000000e+00> : vector<1xf32>
    %8 = vector.multi_reduction <add>, %7, %cst_3 [1, 2] : vector<1x96x16xf32> to vector<1xf32>
    %9 = vector.shape_cast %8 : vector<1xf32> to vector<1x1x1xf32>
    %10 = vector.extract %9[0, 0, 0] : f32 from vector<1x1x1xf32>
    %11 = arith.truncf %2 : vector<96x16xf32> to vector<96x16xbf16>
    %c0_4 = arith.constant 0 : index
    %c0_5 = arith.constant 0 : index
    %12 = vector.load %arg5[%c0_4, %c0_5] : memref<16x48xbf16, #tpu.memory_space<vmem>>, vector<16x48xbf16>
    %cst_6 = arith.constant dense<0.000000e+00> : vector<96x48xf32>
    %13 = tpu.matmul %11, %12, %cst_6 {dimension_numbers = #tpu.dot_dimension_numbers<[1], [0], [0], [1], [0, 0, 1, 1], [], []>} : vector<96x16xbf16>, vector<16x48xbf16>, vector<96x48xf32> -> vector<96x48xf32>
    %14 = arith.truncf %13 : vector<96x48xf32> to vector<96x48xbf16>
    %c0_7 = arith.constant 0 : index
    %c0_8 = arith.constant 0 : index
    %15 = vector.load %arg3[%c0_7, %c0_8] : memref<18x16xbf16, #tpu.memory_space<vmem>>, vector<18x16xbf16>
    %c0_9 = arith.constant 0 : index
    %c0_10 = arith.constant 0 : index
    %16 = vector.load %arg4[%c0_9, %c0_10] : memref<16x16xbf16, #tpu.memory_space<vmem>>, vector<16x16xbf16>
    %17 = vector.extract_strided_slice %14 {offsets = [0, 0], sizes = [16, 48], strides = [1, 1]} : vector<96x48xbf16> to vector<16x48xbf16>
    %18 = vector.extract_strided_slice %17 {offsets = [0, 0], sizes = [16, 32], strides = [1, 1]} : vector<16x48xbf16> to vector<16x32xbf16>
    %cst_11 = arith.constant dense<0.000000e+00> : vector<18x32xf32>
    %19 = tpu.matmul %15, %18, %cst_11 {dimension_numbers = #tpu.dot_dimension_numbers<[1], [0], [0], [1], [0, 0, 1, 1], [], []>} : vector<18x16xbf16>, vector<16x32xbf16>, vector<18x32xf32> -> vector<18x32xf32>
    %20 = vector.extract_strided_slice %19 {offsets = [0, 0], sizes = [9, 16], strides = [1, 1]} : vector<18x32xf32> to vector<9x16xf32>
    %21 = vector.extract_strided_slice %19 {offsets = [9, 16], sizes = [9, 16], strides = [1, 1]} : vector<18x32xf32> to vector<9x16xf32>
    %22 = arith.subf %20, %21 : vector<9x16xf32>
    %23 = vector.extract_strided_slice %19 {offsets = [0, 16], sizes = [9, 16], strides = [1, 1]} : vector<18x32xf32> to vector<9x16xf32>
    %24 = vector.extract_strided_slice %19 {offsets = [9, 0], sizes = [9, 16], strides = [1, 1]} : vector<18x32xf32> to vector<9x16xf32>
    %25 = arith.addf %23, %24 : vector<9x16xf32>
    %26 = math.absf %22 : vector<9x16xf32>
    %27 = vector.shape_cast %26 : vector<9x16xf32> to vector<1x9x16xf32>
    %cst_12 = arith.constant dense<0.000000e+00> : vector<1xf32>
    %28 = vector.multi_reduction <add>, %27, %cst_12 [1, 2] : vector<1x9x16xf32> to vector<1xf32>
    %29 = vector.shape_cast %28 : vector<1xf32> to vector<1x1x1xf32>
    %30 = vector.extract %29[0, 0, 0] : f32 from vector<1x1x1xf32>
    %cst_13 = arith.constant 0.000000e+00 : f32
    %31 = arith.addf %cst_13, %30 : f32
    %32 = math.absf %25 : vector<9x16xf32>
    %33 = vector.shape_cast %32 : vector<9x16xf32> to vector<1x9x16xf32>
    %cst_14 = arith.constant dense<0.000000e+00> : vector<1xf32>
    %34 = vector.multi_reduction <add>, %33, %cst_14 [1, 2] : vector<1x9x16xf32> to vector<1xf32>
    %35 = vector.shape_cast %34 : vector<1xf32> to vector<1x1x1xf32>
    %36 = vector.extract %35[0, 0, 0] : f32 from vector<1x1x1xf32>
    %37 = arith.addf %31, %36 : f32
    %38 = vector.extract_strided_slice %17 {offsets = [0, 32], sizes = [16, 16], strides = [1, 1]} : vector<16x48xbf16> to vector<16x16xbf16>
    %cst_15 = arith.constant dense<0.000000e+00> : vector<16x16xf32>
    %39 = tpu.matmul %16, %38, %cst_15 {dimension_numbers = #tpu.dot_dimension_numbers<[1], [0], [0], [1], [0, 0, 1, 1], [], []>} : vector<16x16xbf16>, vector<16x16xbf16>, vector<16x16xf32> -> vector<16x16xf32>
    %40 = vector.extract_strided_slice %2 {offsets = [0, 0], sizes = [16, 16], strides = [1, 1]} : vector<96x16xf32> to vector<16x16xf32>
    %41 = arith.subf %40, %39 : vector<16x16xf32>
    %42 = arith.mulf %41, %41 : vector<16x16xf32>
    %cst_16 = arith.constant 9.99999996E-13 : f32
    %43 = vector.broadcast %cst_16 : f32 to vector<16x16xf32>
    %44 = arith.addf %42, %43 : vector<16x16xf32>
    %45 = math.sqrt %44 : vector<16x16xf32>
    %46 = vector.shape_cast %45 : vector<16x16xf32> to vector<1x16x16xf32>
    %cst_17 = arith.constant dense<0.000000e+00> : vector<1xf32>
    %47 = vector.multi_reduction <add>, %46, %cst_17 [1, 2] : vector<1x16x16xf32> to vector<1xf32>
    %48 = vector.shape_cast %47 : vector<1xf32> to vector<1x1x1xf32>
    %49 = vector.extract %48[0, 0, 0] : f32 from vector<1x1x1xf32>
    %cst_18 = arith.constant 0.000000e+00 : f32
    %50 = arith.addf %cst_18, %49 : f32
    %51 = vector.extract_strided_slice %14 {offsets = [16, 0], sizes = [16, 48], strides = [1, 1]} : vector<96x48xbf16> to vector<16x48xbf16>
    %52 = vector.extract_strided_slice %51 {offsets = [0, 0], sizes = [16, 32], strides = [1, 1]} : vector<16x48xbf16> to vector<16x32xbf16>
    %cst_19 = arith.constant dense<0.000000e+00> : vector<18x32xf32>
    %53 = tpu.matmul %15, %52, %cst_19 {dimension_numbers = #tpu.dot_dimension_numbers<[1], [0], [0], [1], [0, 0, 1, 1], [], []>} : vector<18x16xbf16>, vector<16x32xbf16>, vector<18x32xf32> -> vector<18x32xf32>
    %54 = vector.extract_strided_slice %53 {offsets = [0, 0], sizes = [9, 16], strides = [1, 1]} : vector<18x32xf32> to vector<9x16xf32>
    %55 = vector.extract_strided_slice %53 {offsets = [9, 16], sizes = [9, 16], strides = [1, 1]} : vector<18x32xf32> to vector<9x16xf32>
    %56 = arith.subf %54, %55 : vector<9x16xf32>
    %57 = vector.extract_strided_slice %53 {offsets = [0, 16], sizes = [9, 16], strides = [1, 1]} : vector<18x32xf32> to vector<9x16xf32>
    %58 = vector.extract_strided_slice %53 {offsets = [9, 0], sizes = [9, 16], strides = [1, 1]} : vector<18x32xf32> to vector<9x16xf32>
    %59 = arith.addf %57, %58 : vector<9x16xf32>
    %60 = math.absf %56 : vector<9x16xf32>
    %61 = vector.shape_cast %60 : vector<9x16xf32> to vector<1x9x16xf32>
    %cst_20 = arith.constant dense<0.000000e+00> : vector<1xf32>
    %62 = vector.multi_reduction <add>, %61, %cst_20 [1, 2] : vector<1x9x16xf32> to vector<1xf32>
    %63 = vector.shape_cast %62 : vector<1xf32> to vector<1x1x1xf32>
    %64 = vector.extract %63[0, 0, 0] : f32 from vector<1x1x1xf32>
    %65 = arith.addf %37, %64 : f32
    %66 = math.absf %59 : vector<9x16xf32>
    %67 = vector.shape_cast %66 : vector<9x16xf32> to vector<1x9x16xf32>
    %cst_21 = arith.constant dense<0.000000e+00> : vector<1xf32>
    %68 = vector.multi_reduction <add>, %67, %cst_21 [1, 2] : vector<1x9x16xf32> to vector<1xf32>
    %69 = vector.shape_cast %68 : vector<1xf32> to vector<1x1x1xf32>
    %70 = vector.extract %69[0, 0, 0] : f32 from vector<1x1x1xf32>
    %71 = arith.addf %65, %70 : f32
    %72 = vector.extract_strided_slice %51 {offsets = [0, 32], sizes = [16, 16], strides = [1, 1]} : vector<16x48xbf16> to vector<16x16xbf16>
    %cst_22 = arith.constant dense<0.000000e+00> : vector<16x16xf32>
    %73 = tpu.matmul %16, %72, %cst_22 {dimension_numbers = #tpu.dot_dimension_numbers<[1], [0], [0], [1], [0, 0, 1, 1], [], []>} : vector<16x16xbf16>, vector<16x16xbf16>, vector<16x16xf32> -> vector<16x16xf32>
    %74 = vector.extract_strided_slice %2 {offsets = [16, 0], sizes = [16, 16], strides = [1, 1]} : vector<96x16xf32> to vector<16x16xf32>
    %75 = arith.subf %74, %73 : vector<16x16xf32>
    %76 = arith.mulf %75, %75 : vector<16x16xf32>
    %cst_23 = arith.constant 9.99999996E-13 : f32
    %77 = vector.broadcast %cst_23 : f32 to vector<16x16xf32>
    %78 = arith.addf %76, %77 : vector<16x16xf32>
    %79 = math.sqrt %78 : vector<16x16xf32>
    %80 = vector.shape_cast %79 : vector<16x16xf32> to vector<1x16x16xf32>
    %cst_24 = arith.constant dense<0.000000e+00> : vector<1xf32>
    %81 = vector.multi_reduction <add>, %80, %cst_24 [1, 2] : vector<1x16x16xf32> to vector<1xf32>
    %82 = vector.shape_cast %81 : vector<1xf32> to vector<1x1x1xf32>
    %83 = vector.extract %82[0, 0, 0] : f32 from vector<1x1x1xf32>
    %84 = arith.addf %50, %83 : f32
    %85 = vector.extract_strided_slice %14 {offsets = [32, 0], sizes = [16, 48], strides = [1, 1]} : vector<96x48xbf16> to vector<16x48xbf16>
    %86 = vector.extract_strided_slice %85 {offsets = [0, 0], sizes = [16, 32], strides = [1, 1]} : vector<16x48xbf16> to vector<16x32xbf16>
    %cst_25 = arith.constant dense<0.000000e+00> : vector<18x32xf32>
    %87 = tpu.matmul %15, %86, %cst_25 {dimension_numbers = #tpu.dot_dimension_numbers<[1], [0], [0], [1], [0, 0, 1, 1], [], []>} : vector<18x16xbf16>, vector<16x32xbf16>, vector<18x32xf32> -> vector<18x32xf32>
    %88 = vector.extract_strided_slice %87 {offsets = [0, 0], sizes = [9, 16], strides = [1, 1]} : vector<18x32xf32> to vector<9x16xf32>
    %89 = vector.extract_strided_slice %87 {offsets = [9, 16], sizes = [9, 16], strides = [1, 1]} : vector<18x32xf32> to vector<9x16xf32>
    %90 = arith.subf %88, %89 : vector<9x16xf32>
    %91 = vector.extract_strided_slice %87 {offsets = [0, 16], sizes = [9, 16], strides = [1, 1]} : vector<18x32xf32> to vector<9x16xf32>
    %92 = vector.extract_strided_slice %87 {offsets = [9, 0], sizes = [9, 16], strides = [1, 1]} : vector<18x32xf32> to vector<9x16xf32>
    %93 = arith.addf %91, %92 : vector<9x16xf32>
    %94 = math.absf %90 : vector<9x16xf32>
    %95 = vector.shape_cast %94 : vector<9x16xf32> to vector<1x9x16xf32>
    %cst_26 = arith.constant dense<0.000000e+00> : vector<1xf32>
    %96 = vector.multi_reduction <add>, %95, %cst_26 [1, 2] : vector<1x9x16xf32> to vector<1xf32>
    %97 = vector.shape_cast %96 : vector<1xf32> to vector<1x1x1xf32>
    %98 = vector.extract %97[0, 0, 0] : f32 from vector<1x1x1xf32>
    %99 = arith.addf %71, %98 : f32
    %100 = math.absf %93 : vector<9x16xf32>
    %101 = vector.shape_cast %100 : vector<9x16xf32> to vector<1x9x16xf32>
    %cst_27 = arith.constant dense<0.000000e+00> : vector<1xf32>
    %102 = vector.multi_reduction <add>, %101, %cst_27 [1, 2] : vector<1x9x16xf32> to vector<1xf32>
    %103 = vector.shape_cast %102 : vector<1xf32> to vector<1x1x1xf32>
    %104 = vector.extract %103[0, 0, 0] : f32 from vector<1x1x1xf32>
    %105 = arith.addf %99, %104 : f32
    %106 = vector.extract_strided_slice %85 {offsets = [0, 32], sizes = [16, 16], strides = [1, 1]} : vector<16x48xbf16> to vector<16x16xbf16>
    %cst_28 = arith.constant dense<0.000000e+00> : vector<16x16xf32>
    %107 = tpu.matmul %16, %106, %cst_28 {dimension_numbers = #tpu.dot_dimension_numbers<[1], [0], [0], [1], [0, 0, 1, 1], [], []>} : vector<16x16xbf16>, vector<16x16xbf16>, vector<16x16xf32> -> vector<16x16xf32>
    %108 = vector.extract_strided_slice %2 {offsets = [32, 0], sizes = [16, 16], strides = [1, 1]} : vector<96x16xf32> to vector<16x16xf32>
    %109 = arith.subf %108, %107 : vector<16x16xf32>
    %110 = arith.mulf %109, %109 : vector<16x16xf32>
    %cst_29 = arith.constant 9.99999996E-13 : f32
    %111 = vector.broadcast %cst_29 : f32 to vector<16x16xf32>
    %112 = arith.addf %110, %111 : vector<16x16xf32>
    %113 = math.sqrt %112 : vector<16x16xf32>
    %114 = vector.shape_cast %113 : vector<16x16xf32> to vector<1x16x16xf32>
    %cst_30 = arith.constant dense<0.000000e+00> : vector<1xf32>
    %115 = vector.multi_reduction <add>, %114, %cst_30 [1, 2] : vector<1x16x16xf32> to vector<1xf32>
    %116 = vector.shape_cast %115 : vector<1xf32> to vector<1x1x1xf32>
    %117 = vector.extract %116[0, 0, 0] : f32 from vector<1x1x1xf32>
    %118 = arith.addf %84, %117 : f32
    %119 = vector.extract_strided_slice %14 {offsets = [48, 0], sizes = [16, 48], strides = [1, 1]} : vector<96x48xbf16> to vector<16x48xbf16>
    %120 = vector.extract_strided_slice %119 {offsets = [0, 0], sizes = [16, 32], strides = [1, 1]} : vector<16x48xbf16> to vector<16x32xbf16>
    %cst_31 = arith.constant dense<0.000000e+00> : vector<18x32xf32>
    %121 = tpu.matmul %15, %120, %cst_31 {dimension_numbers = #tpu.dot_dimension_numbers<[1], [0], [0], [1], [0, 0, 1, 1], [], []>} : vector<18x16xbf16>, vector<16x32xbf16>, vector<18x32xf32> -> vector<18x32xf32>
    %122 = vector.extract_strided_slice %121 {offsets = [0, 0], sizes = [9, 16], strides = [1, 1]} : vector<18x32xf32> to vector<9x16xf32>
    %123 = vector.extract_strided_slice %121 {offsets = [9, 16], sizes = [9, 16], strides = [1, 1]} : vector<18x32xf32> to vector<9x16xf32>
    %124 = arith.subf %122, %123 : vector<9x16xf32>
    %125 = vector.extract_strided_slice %121 {offsets = [0, 16], sizes = [9, 16], strides = [1, 1]} : vector<18x32xf32> to vector<9x16xf32>
    %126 = vector.extract_strided_slice %121 {offsets = [9, 0], sizes = [9, 16], strides = [1, 1]} : vector<18x32xf32> to vector<9x16xf32>
    %127 = arith.addf %125, %126 : vector<9x16xf32>
    %128 = math.absf %124 : vector<9x16xf32>
    %129 = vector.shape_cast %128 : vector<9x16xf32> to vector<1x9x16xf32>
    %cst_32 = arith.constant dense<0.000000e+00> : vector<1xf32>
    %130 = vector.multi_reduction <add>, %129, %cst_32 [1, 2] : vector<1x9x16xf32> to vector<1xf32>
    %131 = vector.shape_cast %130 : vector<1xf32> to vector<1x1x1xf32>
    %132 = vector.extract %131[0, 0, 0] : f32 from vector<1x1x1xf32>
    %133 = arith.addf %105, %132 : f32
    %134 = math.absf %127 : vector<9x16xf32>
    %135 = vector.shape_cast %134 : vector<9x16xf32> to vector<1x9x16xf32>
    %cst_33 = arith.constant dense<0.000000e+00> : vector<1xf32>
    %136 = vector.multi_reduction <add>, %135, %cst_33 [1, 2] : vector<1x9x16xf32> to vector<1xf32>
    %137 = vector.shape_cast %136 : vector<1xf32> to vector<1x1x1xf32>
    %138 = vector.extract %137[0, 0, 0] : f32 from vector<1x1x1xf32>
    %139 = arith.addf %133, %138 : f32
    %140 = vector.extract_strided_slice %119 {offsets = [0, 32], sizes = [16, 16], strides = [1, 1]} : vector<16x48xbf16> to vector<16x16xbf16>
    %cst_34 = arith.constant dense<0.000000e+00> : vector<16x16xf32>
    %141 = tpu.matmul %16, %140, %cst_34 {dimension_numbers = #tpu.dot_dimension_numbers<[1], [0], [0], [1], [0, 0, 1, 1], [], []>} : vector<16x16xbf16>, vector<16x16xbf16>, vector<16x16xf32> -> vector<16x16xf32>
    %142 = vector.extract_strided_slice %2 {offsets = [48, 0], sizes = [16, 16], strides = [1, 1]} : vector<96x16xf32> to vector<16x16xf32>
    %143 = arith.subf %142, %141 : vector<16x16xf32>
    %144 = arith.mulf %143, %143 : vector<16x16xf32>
    %cst_35 = arith.constant 9.99999996E-13 : f32
    %145 = vector.broadcast %cst_35 : f32 to vector<16x16xf32>
    %146 = arith.addf %144, %145 : vector<16x16xf32>
    %147 = math.sqrt %146 : vector<16x16xf32>
    %148 = vector.shape_cast %147 : vector<16x16xf32> to vector<1x16x16xf32>
    %cst_36 = arith.constant dense<0.000000e+00> : vector<1xf32>
    %149 = vector.multi_reduction <add>, %148, %cst_36 [1, 2] : vector<1x16x16xf32> to vector<1xf32>
    %150 = vector.shape_cast %149 : vector<1xf32> to vector<1x1x1xf32>
    %151 = vector.extract %150[0, 0, 0] : f32 from vector<1x1x1xf32>
    %152 = arith.addf %118, %151 : f32
    %153 = vector.extract_strided_slice %14 {offsets = [64, 0], sizes = [16, 48], strides = [1, 1]} : vector<96x48xbf16> to vector<16x48xbf16>
    %154 = vector.extract_strided_slice %153 {offsets = [0, 0], sizes = [16, 32], strides = [1, 1]} : vector<16x48xbf16> to vector<16x32xbf16>
    %cst_37 = arith.constant dense<0.000000e+00> : vector<18x32xf32>
    %155 = tpu.matmul %15, %154, %cst_37 {dimension_numbers = #tpu.dot_dimension_numbers<[1], [0], [0], [1], [0, 0, 1, 1], [], []>} : vector<18x16xbf16>, vector<16x32xbf16>, vector<18x32xf32> -> vector<18x32xf32>
    %156 = vector.extract_strided_slice %155 {offsets = [0, 0], sizes = [9, 16], strides = [1, 1]} : vector<18x32xf32> to vector<9x16xf32>
    %157 = vector.extract_strided_slice %155 {offsets = [9, 16], sizes = [9, 16], strides = [1, 1]} : vector<18x32xf32> to vector<9x16xf32>
    %158 = arith.subf %156, %157 : vector<9x16xf32>
    %159 = vector.extract_strided_slice %155 {offsets = [0, 16], sizes = [9, 16], strides = [1, 1]} : vector<18x32xf32> to vector<9x16xf32>
    %160 = vector.extract_strided_slice %155 {offsets = [9, 0], sizes = [9, 16], strides = [1, 1]} : vector<18x32xf32> to vector<9x16xf32>
    %161 = arith.addf %159, %160 : vector<9x16xf32>
    %162 = math.absf %158 : vector<9x16xf32>
    %163 = vector.shape_cast %162 : vector<9x16xf32> to vector<1x9x16xf32>
    %cst_38 = arith.constant dense<0.000000e+00> : vector<1xf32>
    %164 = vector.multi_reduction <add>, %163, %cst_38 [1, 2] : vector<1x9x16xf32> to vector<1xf32>
    %165 = vector.shape_cast %164 : vector<1xf32> to vector<1x1x1xf32>
    %166 = vector.extract %165[0, 0, 0] : f32 from vector<1x1x1xf32>
    %167 = arith.addf %139, %166 : f32
    %168 = math.absf %161 : vector<9x16xf32>
    %169 = vector.shape_cast %168 : vector<9x16xf32> to vector<1x9x16xf32>
    %cst_39 = arith.constant dense<0.000000e+00> : vector<1xf32>
    %170 = vector.multi_reduction <add>, %169, %cst_39 [1, 2] : vector<1x9x16xf32> to vector<1xf32>
    %171 = vector.shape_cast %170 : vector<1xf32> to vector<1x1x1xf32>
    %172 = vector.extract %171[0, 0, 0] : f32 from vector<1x1x1xf32>
    %173 = arith.addf %167, %172 : f32
    %174 = vector.extract_strided_slice %153 {offsets = [0, 32], sizes = [16, 16], strides = [1, 1]} : vector<16x48xbf16> to vector<16x16xbf16>
    %cst_40 = arith.constant dense<0.000000e+00> : vector<16x16xf32>
    %175 = tpu.matmul %16, %174, %cst_40 {dimension_numbers = #tpu.dot_dimension_numbers<[1], [0], [0], [1], [0, 0, 1, 1], [], []>} : vector<16x16xbf16>, vector<16x16xbf16>, vector<16x16xf32> -> vector<16x16xf32>
    %176 = vector.extract_strided_slice %2 {offsets = [64, 0], sizes = [16, 16], strides = [1, 1]} : vector<96x16xf32> to vector<16x16xf32>
    %177 = arith.subf %176, %175 : vector<16x16xf32>
    %178 = arith.mulf %177, %177 : vector<16x16xf32>
    %cst_41 = arith.constant 9.99999996E-13 : f32
    %179 = vector.broadcast %cst_41 : f32 to vector<16x16xf32>
    %180 = arith.addf %178, %179 : vector<16x16xf32>
    %181 = math.sqrt %180 : vector<16x16xf32>
    %182 = vector.shape_cast %181 : vector<16x16xf32> to vector<1x16x16xf32>
    %cst_42 = arith.constant dense<0.000000e+00> : vector<1xf32>
    %183 = vector.multi_reduction <add>, %182, %cst_42 [1, 2] : vector<1x16x16xf32> to vector<1xf32>
    %184 = vector.shape_cast %183 : vector<1xf32> to vector<1x1x1xf32>
    %185 = vector.extract %184[0, 0, 0] : f32 from vector<1x1x1xf32>
    %186 = arith.addf %152, %185 : f32
    %187 = vector.extract_strided_slice %14 {offsets = [80, 0], sizes = [16, 48], strides = [1, 1]} : vector<96x48xbf16> to vector<16x48xbf16>
    %188 = vector.extract_strided_slice %187 {offsets = [0, 0], sizes = [16, 32], strides = [1, 1]} : vector<16x48xbf16> to vector<16x32xbf16>
    %cst_43 = arith.constant dense<0.000000e+00> : vector<18x32xf32>
    %189 = tpu.matmul %15, %188, %cst_43 {dimension_numbers = #tpu.dot_dimension_numbers<[1], [0], [0], [1], [0, 0, 1, 1], [], []>} : vector<18x16xbf16>, vector<16x32xbf16>, vector<18x32xf32> -> vector<18x32xf32>
    %190 = vector.extract_strided_slice %189 {offsets = [0, 0], sizes = [9, 16], strides = [1, 1]} : vector<18x32xf32> to vector<9x16xf32>
    %191 = vector.extract_strided_slice %189 {offsets = [9, 16], sizes = [9, 16], strides = [1, 1]} : vector<18x32xf32> to vector<9x16xf32>
    %192 = arith.subf %190, %191 : vector<9x16xf32>
    %193 = vector.extract_strided_slice %189 {offsets = [0, 16], sizes = [9, 16], strides = [1, 1]} : vector<18x32xf32> to vector<9x16xf32>
    %194 = vector.extract_strided_slice %189 {offsets = [9, 0], sizes = [9, 16], strides = [1, 1]} : vector<18x32xf32> to vector<9x16xf32>
    %195 = arith.addf %193, %194 : vector<9x16xf32>
    %196 = math.absf %192 : vector<9x16xf32>
    %197 = vector.shape_cast %196 : vector<9x16xf32> to vector<1x9x16xf32>
    %cst_44 = arith.constant dense<0.000000e+00> : vector<1xf32>
    %198 = vector.multi_reduction <add>, %197, %cst_44 [1, 2] : vector<1x9x16xf32> to vector<1xf32>
    %199 = vector.shape_cast %198 : vector<1xf32> to vector<1x1x1xf32>
    %200 = vector.extract %199[0, 0, 0] : f32 from vector<1x1x1xf32>
    %201 = arith.addf %173, %200 : f32
    %202 = math.absf %195 : vector<9x16xf32>
    %203 = vector.shape_cast %202 : vector<9x16xf32> to vector<1x9x16xf32>
    %cst_45 = arith.constant dense<0.000000e+00> : vector<1xf32>
    %204 = vector.multi_reduction <add>, %203, %cst_45 [1, 2] : vector<1x9x16xf32> to vector<1xf32>
    %205 = vector.shape_cast %204 : vector<1xf32> to vector<1x1x1xf32>
    %206 = vector.extract %205[0, 0, 0] : f32 from vector<1x1x1xf32>
    %207 = arith.addf %201, %206 : f32
    %208 = vector.extract_strided_slice %187 {offsets = [0, 32], sizes = [16, 16], strides = [1, 1]} : vector<16x48xbf16> to vector<16x16xbf16>
    %cst_46 = arith.constant dense<0.000000e+00> : vector<16x16xf32>
    %209 = tpu.matmul %16, %208, %cst_46 {dimension_numbers = #tpu.dot_dimension_numbers<[1], [0], [0], [1], [0, 0, 1, 1], [], []>} : vector<16x16xbf16>, vector<16x16xbf16>, vector<16x16xf32> -> vector<16x16xf32>
    %210 = vector.extract_strided_slice %2 {offsets = [80, 0], sizes = [16, 16], strides = [1, 1]} : vector<96x16xf32> to vector<16x16xf32>
    %211 = arith.subf %210, %209 : vector<16x16xf32>
    %212 = arith.mulf %211, %211 : vector<16x16xf32>
    %cst_47 = arith.constant 9.99999996E-13 : f32
    %213 = vector.broadcast %cst_47 : f32 to vector<16x16xf32>
    %214 = arith.addf %212, %213 : vector<16x16xf32>
    %215 = math.sqrt %214 : vector<16x16xf32>
    %216 = vector.shape_cast %215 : vector<16x16xf32> to vector<1x16x16xf32>
    %cst_48 = arith.constant dense<0.000000e+00> : vector<1xf32>
    %217 = vector.multi_reduction <add>, %216, %cst_48 [1, 2] : vector<1x16x16xf32> to vector<1xf32>
    %218 = vector.shape_cast %217 : vector<1xf32> to vector<1x1x1xf32>
    %219 = vector.extract %218[0, 0, 0] : f32 from vector<1x1x1xf32>
    %220 = arith.addf %186, %219 : f32
    %c0_49 = arith.constant 0 : index
    %c0_50 = arith.constant 0 : index
    %221 = memref.load %arg6[%c0_49, %c0_50] : memref<1x3xf32, #tpu.memory_space<smem>>
    memref.store %10, %arg6[%c0_49, %c0_50] : memref<1x3xf32, #tpu.memory_space<smem>>
    %c0_51 = arith.constant 0 : index
    %c1 = arith.constant 1 : index
    %222 = memref.load %arg6[%c0_51, %c1] : memref<1x3xf32, #tpu.memory_space<smem>>
    memref.store %207, %arg6[%c0_51, %c1] : memref<1x3xf32, #tpu.memory_space<smem>>
    %c0_52 = arith.constant 0 : index
    %c2 = arith.constant 2 : index
    %223 = memref.load %arg6[%c0_52, %c2] : memref<1x3xf32, #tpu.memory_space<smem>>
    memref.store %220, %arg6[%c0_52, %c2] : memref<1x3xf32, #tpu.memory_space<smem>>
    return
  }
  func.func @transform_0(%arg0: i32) -> (i32, i32) {
    %c0_i32 = arith.constant 0 : i32
    %c0_i32_0 = arith.constant 0 : i32
    return %arg0, %c0_i32 : i32, i32
  }
  func.func @transform_1(%arg0: i32) -> (i32, i32) {
    %c0_i32 = arith.constant 0 : i32
    %c0_i32_0 = arith.constant 0 : i32
    return %arg0, %c0_i32 : i32, i32
  }
  func.func @transform_2(%arg0: i32) -> (i32, i32) {
    %c0_i32 = arith.constant 0 : i32
    %c0_i32_0 = arith.constant 0 : i32
    %c0_i32_1 = arith.constant 0 : i32
    return %c0_i32, %c0_i32_0 : i32, i32
  }
  func.func @transform_3(%arg0: i32) -> (i32, i32) {
    %c0_i32 = arith.constant 0 : i32
    %c0_i32_0 = arith.constant 0 : i32
    %c0_i32_1 = arith.constant 0 : i32
    return %c0_i32, %c0_i32_0 : i32, i32
  }
  func.func @transform_4(%arg0: i32) -> (i32, i32) {
    %c0_i32 = arith.constant 0 : i32
    %c0_i32_0 = arith.constant 0 : i32
    %c0_i32_1 = arith.constant 0 : i32
    return %c0_i32, %c0_i32_0 : i32, i32
  }
  func.func @transform_5(%arg0: i32) -> (i32, i32) {
    %c0_i32 = arith.constant 0 : i32
    %c0_i32_0 = arith.constant 0 : i32
    return %arg0, %c0_i32 : i32, i32
  }
}

module attributes {stable_mosaic.version = 11 : i64} {
  func.func @kernel(%arg0: i32, %arg1: memref<96x16xf32, #tpu.memory_space<vmem>>, %arg2: memref<96x16xf32, #tpu.memory_space<vmem>>, %arg3: memref<18x16xbf16, #tpu.memory_space<vmem>>, %arg4: memref<16x16xbf16, #tpu.memory_space<vmem>>, %arg5: memref<16x48xbf16, #tpu.memory_space<vmem>>, %arg6: memref<1x3xf32, #tpu.memory_space<smem>>) attributes {dimension_semantics = [#tpu.dimension_semantics<parallel>], iteration_bounds = array<i64: 1>, scalar_prefetch = 0 : i64, scratch_operands = 0 : i64, tpu.core_type = #tpu.core_type<tc>, window_params = [{transform_indices = @transform_0, window_bounds = array<i64: 96, 16>}, {transform_indices = @transform_1, window_bounds = array<i64: 96, 16>}, {pipeline_mode = #tpu.pipeline_mode<synchronous>, transform_indices = @transform_2, window_bounds = array<i64: 18, 16>}, {pipeline_mode = #tpu.pipeline_mode<synchronous>, transform_indices = @transform_3, window_bounds = array<i64: 16, 16>}, {pipeline_mode = #tpu.pipeline_mode<synchronous>, transform_indices = @transform_4, window_bounds = array<i64: 16, 48>}, {transform_indices = @transform_5, window_bounds = array<i64: 1, 3>}]} {
    %c0 = arith.constant 0 : index
    %c0_0 = arith.constant 0 : index
    %0 = vector.load %arg1[%c0, %c0_0] : memref<96x16xf32, #tpu.memory_space<vmem>>, vector<96x16xf32>
    %c0_1 = arith.constant 0 : index
    %c0_2 = arith.constant 0 : index
    %1 = vector.load %arg2[%c0_1, %c0_2] : memref<96x16xf32, #tpu.memory_space<vmem>>, vector<96x16xf32>
    %2 = arith.subf %0, %1 : vector<96x16xf32>
    %3 = arith.mulf %2, %2 : vector<96x16xf32>
    %cst = arith.constant 9.99999996E-13 : f32
    %4 = vector.broadcast %cst : f32 to vector<96x16xf32>
    %5 = arith.addf %3, %4 : vector<96x16xf32>
    %6 = math.sqrt %5 : vector<96x16xf32>
    %7 = vector.shape_cast %6 : vector<96x16xf32> to vector<1x96x16xf32>
    %cst_3 = arith.constant dense<0.000000e+00> : vector<1xf32>
    %8 = vector.multi_reduction <add>, %7, %cst_3 [1, 2] : vector<1x96x16xf32> to vector<1xf32>
    %9 = vector.shape_cast %8 : vector<1xf32> to vector<1x1x1xf32>
    %10 = vector.extract %9[0, 0, 0] : f32 from vector<1x1x1xf32>
    %11 = arith.truncf %2 : vector<96x16xf32> to vector<96x16xbf16>
    %c0_4 = arith.constant 0 : index
    %c0_5 = arith.constant 0 : index
    %12 = vector.load %arg5[%c0_4, %c0_5] : memref<16x48xbf16, #tpu.memory_space<vmem>>, vector<16x48xbf16>
    %cst_6 = arith.constant dense<0.000000e+00> : vector<96x48xf32>
    %13 = tpu.matmul %11, %12, %cst_6 {dimension_numbers = #tpu.dot_dimension_numbers<[1], [0], [0], [1], [0, 0, 1, 1], [], []>} : vector<96x16xbf16>, vector<16x48xbf16>, vector<96x48xf32> -> vector<96x48xf32>
    %14 = arith.truncf %13 : vector<96x48xf32> to vector<96x48xbf16>
    %c0_7 = arith.constant 0 : index
    %c0_8 = arith.constant 0 : index
    %15 = vector.load %arg3[%c0_7, %c0_8] : memref<18x16xbf16, #tpu.memory_space<vmem>>, vector<18x16xbf16>
    %c0_9 = arith.constant 0 : index
    %c0_10 = arith.constant 0 : index
    %16 = vector.load %arg4[%c0_9, %c0_10] : memref<16x16xbf16, #tpu.memory_space<vmem>>, vector<16x16xbf16>
    %17 = vector.extract_strided_slice %14 {offsets = [0, 0], sizes = [16, 48], strides = [1, 1]} : vector<96x48xbf16> to vector<16x48xbf16>
    %18 = vector.extract_strided_slice %17 {offsets = [0, 0], sizes = [16, 32], strides = [1, 1]} : vector<16x48xbf16> to vector<16x32xbf16>
    %cst_11 = arith.constant dense<0.000000e+00> : vector<18x32xf32>
    %19 = tpu.matmul %15, %18, %cst_11 {dimension_numbers = #tpu.dot_dimension_numbers<[1], [0], [0], [1], [0, 0, 1, 1], [], []>} : vector<18x16xbf16>, vector<16x32xbf16>, vector<18x32xf32> -> vector<18x32xf32>
    %20 = vector.extract_strided_slice %19 {offsets = [0, 0], sizes = [9, 16], strides = [1, 1]} : vector<18x32xf32> to vector<9x16xf32>
    %21 = vector.extract_strided_slice %19 {offsets = [9, 16], sizes = [9, 16], strides = [1, 1]} : vector<18x32xf32> to vector<9x16xf32>
    %22 = arith.subf %20, %21 : vector<9x16xf32>
    %23 = vector.extract_strided_slice %19 {offsets = [0, 16], sizes = [9, 16], strides = [1, 1]} : vector<18x32xf32> to vector<9x16xf32>
    %24 = vector.extract_strided_slice %19 {offsets = [9, 0], sizes = [9, 16], strides = [1, 1]} : vector<18x32xf32> to vector<9x16xf32>
    %25 = arith.addf %23, %24 : vector<9x16xf32>
    %26 = math.absf %22 : vector<9x16xf32>
    %27 = vector.shape_cast %26 : vector<9x16xf32> to vector<1x9x16xf32>
    %cst_12 = arith.constant dense<0.000000e+00> : vector<1xf32>
    %28 = vector.multi_reduction <add>, %27, %cst_12 [1, 2] : vector<1x9x16xf32> to vector<1xf32>
    %29 = vector.shape_cast %28 : vector<1xf32> to vector<1x1x1xf32>
    %30 = vector.extract %29[0, 0, 0] : f32 from vector<1x1x1xf32>
    %cst_13 = arith.constant 0.000000e+00 : f32
    %31 = arith.addf %cst_13, %30 : f32
    %32 = math.absf %25 : vector<9x16xf32>
    %33 = vector.shape_cast %32 : vector<9x16xf32> to vector<1x9x16xf32>
    %cst_14 = arith.constant dense<0.000000e+00> : vector<1xf32>
    %34 = vector.multi_reduction <add>, %33, %cst_14 [1, 2] : vector<1x9x16xf32> to vector<1xf32>
    %35 = vector.shape_cast %34 : vector<1xf32> to vector<1x1x1xf32>
    %36 = vector.extract %35[0, 0, 0] : f32 from vector<1x1x1xf32>
    %37 = arith.addf %31, %36 : f32
    %38 = vector.extract_strided_slice %17 {offsets = [0, 32], sizes = [16, 16], strides = [1, 1]} : vector<16x48xbf16> to vector<16x16xbf16>
    %cst_15 = arith.constant dense<0.000000e+00> : vector<16x16xf32>
    %39 = tpu.matmul %16, %38, %cst_15 {dimension_numbers = #tpu.dot_dimension_numbers<[1], [0], [0], [1], [0, 0, 1, 1], [], []>} : vector<16x16xbf16>, vector<16x16xbf16>, vector<16x16xf32> -> vector<16x16xf32>
    %40 = vector.extract_strided_slice %2 {offsets = [0, 0], sizes = [16, 16], strides = [1, 1]} : vector<96x16xf32> to vector<16x16xf32>
    %41 = arith.subf %40, %39 : vector<16x16xf32>
    %42 = arith.mulf %41, %41 : vector<16x16xf32>
    %cst_16 = arith.constant 9.99999996E-13 : f32
    %43 = vector.broadcast %cst_16 : f32 to vector<16x16xf32>
    %44 = arith.addf %42, %43 : vector<16x16xf32>
    %45 = math.sqrt %44 : vector<16x16xf32>
    %46 = vector.shape_cast %45 : vector<16x16xf32> to vector<1x16x16xf32>
    %cst_17 = arith.constant dense<0.000000e+00> : vector<1xf32>
    %47 = vector.multi_reduction <add>, %46, %cst_17 [1, 2] : vector<1x16x16xf32> to vector<1xf32>
    %48 = vector.shape_cast %47 : vector<1xf32> to vector<1x1x1xf32>
    %49 = vector.extract %48[0, 0, 0] : f32 from vector<1x1x1xf32>
    %cst_18 = arith.constant 0.000000e+00 : f32
    %50 = arith.addf %cst_18, %49 : f32
    %51 = vector.extract_strided_slice %14 {offsets = [16, 0], sizes = [16, 48], strides = [1, 1]} : vector<96x48xbf16> to vector<16x48xbf16>
    %52 = vector.extract_strided_slice %51 {offsets = [0, 0], sizes = [16, 32], strides = [1, 1]} : vector<16x48xbf16> to vector<16x32xbf16>
    %cst_19 = arith.constant dense<0.000000e+00> : vector<18x32xf32>
    %53 = tpu.matmul %15, %52, %cst_19 {dimension_numbers = #tpu.dot_dimension_numbers<[1], [0], [0], [1], [0, 0, 1, 1], [], []>} : vector<18x16xbf16>, vector<16x32xbf16>, vector<18x32xf32> -> vector<18x32xf32>
    %54 = vector.extract_strided_slice %53 {offsets = [0, 0], sizes = [9, 16], strides = [1, 1]} : vector<18x32xf32> to vector<9x16xf32>
    %55 = vector.extract_strided_slice %53 {offsets = [9, 16], sizes = [9, 16], strides = [1, 1]} : vector<18x32xf32> to vector<9x16xf32>
    %56 = arith.subf %54, %55 : vector<9x16xf32>
    %57 = vector.extract_strided_slice %53 {offsets = [0, 16], sizes = [9, 16], strides = [1, 1]} : vector<18x32xf32> to vector<9x16xf32>
    %58 = vector.extract_strided_slice %53 {offsets = [9, 0], sizes = [9, 16], strides = [1, 1]} : vector<18x32xf32> to vector<9x16xf32>
    %59 = arith.addf %57, %58 : vector<9x16xf32>
    %60 = math.absf %56 : vector<9x16xf32>
    %61 = vector.shape_cast %60 : vector<9x16xf32> to vector<1x9x16xf32>
    %cst_20 = arith.constant dense<0.000000e+00> : vector<1xf32>
    %62 = vector.multi_reduction <add>, %61, %cst_20 [1, 2] : vector<1x9x16xf32> to vector<1xf32>
    %63 = vector.shape_cast %62 : vector<1xf32> to vector<1x1x1xf32>
    %64 = vector.extract %63[0, 0, 0] : f32 from vector<1x1x1xf32>
    %65 = arith.addf %37, %64 : f32
    %66 = math.absf %59 : vector<9x16xf32>
    %67 = vector.shape_cast %66 : vector<9x16xf32> to vector<1x9x16xf32>
    %cst_21 = arith.constant dense<0.000000e+00> : vector<1xf32>
    %68 = vector.multi_reduction <add>, %67, %cst_21 [1, 2] : vector<1x9x16xf32> to vector<1xf32>
    %69 = vector.shape_cast %68 : vector<1xf32> to vector<1x1x1xf32>
    %70 = vector.extract %69[0, 0, 0] : f32 from vector<1x1x1xf32>
    %71 = arith.addf %65, %70 : f32
    %72 = vector.extract_strided_slice %51 {offsets = [0, 32], sizes = [16, 16], strides = [1, 1]} : vector<16x48xbf16> to vector<16x16xbf16>
    %cst_22 = arith.constant dense<0.000000e+00> : vector<16x16xf32>
    %73 = tpu.matmul %16, %72, %cst_22 {dimension_numbers = #tpu.dot_dimension_numbers<[1], [0], [0], [1], [0, 0, 1, 1], [], []>} : vector<16x16xbf16>, vector<16x16xbf16>, vector<16x16xf32> -> vector<16x16xf32>
    %74 = vector.extract_strided_slice %2 {offsets = [16, 0], sizes = [16, 16], strides = [1, 1]} : vector<96x16xf32> to vector<16x16xf32>
    %75 = arith.subf %74, %73 : vector<16x16xf32>
    %76 = arith.mulf %75, %75 : vector<16x16xf32>
    %cst_23 = arith.constant 9.99999996E-13 : f32
    %77 = vector.broadcast %cst_23 : f32 to vector<16x16xf32>
    %78 = arith.addf %76, %77 : vector<16x16xf32>
    %79 = math.sqrt %78 : vector<16x16xf32>
    %80 = vector.shape_cast %79 : vector<16x16xf32> to vector<1x16x16xf32>
    %cst_24 = arith.constant dense<0.000000e+00> : vector<1xf32>
    %81 = vector.multi_reduction <add>, %80, %cst_24 [1, 2] : vector<1x16x16xf32> to vector<1xf32>
    %82 = vector.shape_cast %81 : vector<1xf32> to vector<1x1x1xf32>
    %83 = vector.extract %82[0, 0, 0] : f32 from vector<1x1x1xf32>
    %84 = arith.addf %50, %83 : f32
    %85 = vector.extract_strided_slice %14 {offsets = [32, 0], sizes = [16, 48], strides = [1, 1]} : vector<96x48xbf16> to vector<16x48xbf16>
    %86 = vector.extract_strided_slice %85 {offsets = [0, 0], sizes = [16, 32], strides = [1, 1]} : vector<16x48xbf16> to vector<16x32xbf16>
    %cst_25 = arith.constant dense<0.000000e+00> : vector<18x32xf32>
    %87 = tpu.matmul %15, %86, %cst_25 {dimension_numbers = #tpu.dot_dimension_numbers<[1], [0], [0], [1], [0, 0, 1, 1], [], []>} : vector<18x16xbf16>, vector<16x32xbf16>, vector<18x32xf32> -> vector<18x32xf32>
    %88 = vector.extract_strided_slice %87 {offsets = [0, 0], sizes = [9, 16], strides = [1, 1]} : vector<18x32xf32> to vector<9x16xf32>
    %89 = vector.extract_strided_slice %87 {offsets = [9, 16], sizes = [9, 16], strides = [1, 1]} : vector<18x32xf32> to vector<9x16xf32>
    %90 = arith.subf %88, %89 : vector<9x16xf32>
    %91 = vector.extract_strided_slice %87 {offsets = [0, 16], sizes = [9, 16], strides = [1, 1]} : vector<18x32xf32> to vector<9x16xf32>
    %92 = vector.extract_strided_slice %87 {offsets = [9, 0], sizes = [9, 16], strides = [1, 1]} : vector<18x32xf32> to vector<9x16xf32>
    %93 = arith.addf %91, %92 : vector<9x16xf32>
    %94 = math.absf %90 : vector<9x16xf32>
    %95 = vector.shape_cast %94 : vector<9x16xf32> to vector<1x9x16xf32>
    %cst_26 = arith.constant dense<0.000000e+00> : vector<1xf32>
    %96 = vector.multi_reduction <add>, %95, %cst_26 [1, 2] : vector<1x9x16xf32> to vector<1xf32>
    %97 = vector.shape_cast %96 : vector<1xf32> to vector<1x1x1xf32>
    %98 = vector.extract %97[0, 0, 0] : f32 from vector<1x1x1xf32>
    %99 = arith.addf %71, %98 : f32
    %100 = math.absf %93 : vector<9x16xf32>
    %101 = vector.shape_cast %100 : vector<9x16xf32> to vector<1x9x16xf32>
    %cst_27 = arith.constant dense<0.000000e+00> : vector<1xf32>
    %102 = vector.multi_reduction <add>, %101, %cst_27 [1, 2] : vector<1x9x16xf32> to vector<1xf32>
    %103 = vector.shape_cast %102 : vector<1xf32> to vector<1x1x1xf32>
    %104 = vector.extract %103[0, 0, 0] : f32 from vector<1x1x1xf32>
    %105 = arith.addf %99, %104 : f32
    %106 = vector.extract_strided_slice %85 {offsets = [0, 32], sizes = [16, 16], strides = [1, 1]} : vector<16x48xbf16> to vector<16x16xbf16>
    %cst_28 = arith.constant dense<0.000000e+00> : vector<16x16xf32>
    %107 = tpu.matmul %16, %106, %cst_28 {dimension_numbers = #tpu.dot_dimension_numbers<[1], [0], [0], [1], [0, 0, 1, 1], [], []>} : vector<16x16xbf16>, vector<16x16xbf16>, vector<16x16xf32> -> vector<16x16xf32>
    %108 = vector.extract_strided_slice %2 {offsets = [32, 0], sizes = [16, 16], strides = [1, 1]} : vector<96x16xf32> to vector<16x16xf32>
    %109 = arith.subf %108, %107 : vector<16x16xf32>
    %110 = arith.mulf %109, %109 : vector<16x16xf32>
    %cst_29 = arith.constant 9.99999996E-13 : f32
    %111 = vector.broadcast %cst_29 : f32 to vector<16x16xf32>
    %112 = arith.addf %110, %111 : vector<16x16xf32>
    %113 = math.sqrt %112 : vector<16x16xf32>
    %114 = vector.shape_cast %113 : vector<16x16xf32> to vector<1x16x16xf32>
    %cst_30 = arith.constant dense<0.000000e+00> : vector<1xf32>
    %115 = vector.multi_reduction <add>, %114, %cst_30 [1, 2] : vector<1x16x16xf32> to vector<1xf32>
    %116 = vector.shape_cast %115 : vector<1xf32> to vector<1x1x1xf32>
    %117 = vector.extract %116[0, 0, 0] : f32 from vector<1x1x1xf32>
    %118 = arith.addf %84, %117 : f32
    %119 = vector.extract_strided_slice %14 {offsets = [48, 0], sizes = [16, 48], strides = [1, 1]} : vector<96x48xbf16> to vector<16x48xbf16>
    %120 = vector.extract_strided_slice %119 {offsets = [0, 0], sizes = [16, 32], strides = [1, 1]} : vector<16x48xbf16> to vector<16x32xbf16>
    %cst_31 = arith.constant dense<0.000000e+00> : vector<18x32xf32>
    %121 = tpu.matmul %15, %120, %cst_31 {dimension_numbers = #tpu.dot_dimension_numbers<[1], [0], [0], [1], [0, 0, 1, 1], [], []>} : vector<18x16xbf16>, vector<16x32xbf16>, vector<18x32xf32> -> vector<18x32xf32>
    %122 = vector.extract_strided_slice %121 {offsets = [0, 0], sizes = [9, 16], strides = [1, 1]} : vector<18x32xf32> to vector<9x16xf32>
    %123 = vector.extract_strided_slice %121 {offsets = [9, 16], sizes = [9, 16], strides = [1, 1]} : vector<18x32xf32> to vector<9x16xf32>
    %124 = arith.subf %122, %123 : vector<9x16xf32>
    %125 = vector.extract_strided_slice %121 {offsets = [0, 16], sizes = [9, 16], strides = [1, 1]} : vector<18x32xf32> to vector<9x16xf32>
    %126 = vector.extract_strided_slice %121 {offsets = [9, 0], sizes = [9, 16], strides = [1, 1]} : vector<18x32xf32> to vector<9x16xf32>
    %127 = arith.addf %125, %126 : vector<9x16xf32>
    %128 = math.absf %124 : vector<9x16xf32>
    %129 = vector.shape_cast %128 : vector<9x16xf32> to vector<1x9x16xf32>
    %cst_32 = arith.constant dense<0.000000e+00> : vector<1xf32>
    %130 = vector.multi_reduction <add>, %129, %cst_32 [1, 2] : vector<1x9x16xf32> to vector<1xf32>
    %131 = vector.shape_cast %130 : vector<1xf32> to vector<1x1x1xf32>
    %132 = vector.extract %131[0, 0, 0] : f32 from vector<1x1x1xf32>
    %133 = arith.addf %105, %132 : f32
    %134 = math.absf %127 : vector<9x16xf32>
    %135 = vector.shape_cast %134 : vector<9x16xf32> to vector<1x9x16xf32>
    %cst_33 = arith.constant dense<0.000000e+00> : vector<1xf32>
    %136 = vector.multi_reduction <add>, %135, %cst_33 [1, 2] : vector<1x9x16xf32> to vector<1xf32>
    %137 = vector.shape_cast %136 : vector<1xf32> to vector<1x1x1xf32>
    %138 = vector.extract %137[0, 0, 0] : f32 from vector<1x1x1xf32>
    %139 = arith.addf %133, %138 : f32
    %140 = vector.extract_strided_slice %119 {offsets = [0, 32], sizes = [16, 16], strides = [1, 1]} : vector<16x48xbf16> to vector<16x16xbf16>
    %cst_34 = arith.constant dense<0.000000e+00> : vector<16x16xf32>
    %141 = tpu.matmul %16, %140, %cst_34 {dimension_numbers = #tpu.dot_dimension_numbers<[1], [0], [0], [1], [0, 0, 1, 1], [], []>} : vector<16x16xbf16>, vector<16x16xbf16>, vector<16x16xf32> -> vector<16x16xf32>
    %142 = vector.extract_strided_slice %2 {offsets = [48, 0], sizes = [16, 16], strides = [1, 1]} : vector<96x16xf32> to vector<16x16xf32>
    %143 = arith.subf %142, %141 : vector<16x16xf32>
    %144 = arith.mulf %143, %143 : vector<16x16xf32>
    %cst_35 = arith.constant 9.99999996E-13 : f32
    %145 = vector.broadcast %cst_35 : f32 to vector<16x16xf32>
    %146 = arith.addf %144, %145 : vector<16x16xf32>
    %147 = math.sqrt %146 : vector<16x16xf32>
    %148 = vector.shape_cast %147 : vector<16x16xf32> to vector<1x16x16xf32>
    %cst_36 = arith.constant dense<0.000000e+00> : vector<1xf32>
    %149 = vector.multi_reduction <add>, %148, %cst_36 [1, 2] : vector<1x16x16xf32> to vector<1xf32>
    %150 = vector.shape_cast %149 : vector<1xf32> to vector<1x1x1xf32>
    %151 = vector.extract %150[0, 0, 0] : f32 from vector<1x1x1xf32>
    %152 = arith.addf %118, %151 : f32
    %153 = vector.extract_strided_slice %14 {offsets = [64, 0], sizes = [16, 48], strides = [1, 1]} : vector<96x48xbf16> to vector<16x48xbf16>
    %154 = vector.extract_strided_slice %153 {offsets = [0, 0], sizes = [16, 32], strides = [1, 1]} : vector<16x48xbf16> to vector<16x32xbf16>
    %cst_37 = arith.constant dense<0.000000e+00> : vector<18x32xf32>
    %155 = tpu.matmul %15, %154, %cst_37 {dimension_numbers = #tpu.dot_dimension_numbers<[1], [0], [0], [1], [0, 0, 1, 1], [], []>} : vector<18x16xbf16>, vector<16x32xbf16>, vector<18x32xf32> -> vector<18x32xf32>
    %156 = vector.extract_strided_slice %155 {offsets = [0, 0], sizes = [9, 16], strides = [1, 1]} : vector<18x32xf32> to vector<9x16xf32>
    %157 = vector.extract_strided_slice %155 {offsets = [9, 16], sizes = [9, 16], strides = [1, 1]} : vector<18x32xf32> to vector<9x16xf32>
    %158 = arith.subf %156, %157 : vector<9x16xf32>
    %159 = vector.extract_strided_slice %155 {offsets = [0, 16], sizes = [9, 16], strides = [1, 1]} : vector<18x32xf32> to vector<9x16xf32>
    %160 = vector.extract_strided_slice %155 {offsets = [9, 0], sizes = [9, 16], strides = [1, 1]} : vector<18x32xf32> to vector<9x16xf32>
    %161 = arith.addf %159, %160 : vector<9x16xf32>
    %162 = math.absf %158 : vector<9x16xf32>
    %163 = vector.shape_cast %162 : vector<9x16xf32> to vector<1x9x16xf32>
    %cst_38 = arith.constant dense<0.000000e+00> : vector<1xf32>
    %164 = vector.multi_reduction <add>, %163, %cst_38 [1, 2] : vector<1x9x16xf32> to vector<1xf32>
    %165 = vector.shape_cast %164 : vector<1xf32> to vector<1x1x1xf32>
    %166 = vector.extract %165[0, 0, 0] : f32 from vector<1x1x1xf32>
    %167 = arith.addf %139, %166 : f32
    %168 = math.absf %161 : vector<9x16xf32>
    %169 = vector.shape_cast %168 : vector<9x16xf32> to vector<1x9x16xf32>
    %cst_39 = arith.constant dense<0.000000e+00> : vector<1xf32>
    %170 = vector.multi_reduction <add>, %169, %cst_39 [1, 2] : vector<1x9x16xf32> to vector<1xf32>
    %171 = vector.shape_cast %170 : vector<1xf32> to vector<1x1x1xf32>
    %172 = vector.extract %171[0, 0, 0] : f32 from vector<1x1x1xf32>
    %173 = arith.addf %167, %172 : f32
    %174 = vector.extract_strided_slice %153 {offsets = [0, 32], sizes = [16, 16], strides = [1, 1]} : vector<16x48xbf16> to vector<16x16xbf16>
    %cst_40 = arith.constant dense<0.000000e+00> : vector<16x16xf32>
    %175 = tpu.matmul %16, %174, %cst_40 {dimension_numbers = #tpu.dot_dimension_numbers<[1], [0], [0], [1], [0, 0, 1, 1], [], []>} : vector<16x16xbf16>, vector<16x16xbf16>, vector<16x16xf32> -> vector<16x16xf32>
    %176 = vector.extract_strided_slice %2 {offsets = [64, 0], sizes = [16, 16], strides = [1, 1]} : vector<96x16xf32> to vector<16x16xf32>
    %177 = arith.subf %176, %175 : vector<16x16xf32>
    %178 = arith.mulf %177, %177 : vector<16x16xf32>
    %cst_41 = arith.constant 9.99999996E-13 : f32
    %179 = vector.broadcast %cst_41 : f32 to vector<16x16xf32>
    %180 = arith.addf %178, %179 : vector<16x16xf32>
    %181 = math.sqrt %180 : vector<16x16xf32>
    %182 = vector.shape_cast %181 : vector<16x16xf32> to vector<1x16x16xf32>
    %cst_42 = arith.constant dense<0.000000e+00> : vector<1xf32>
    %183 = vector.multi_reduction <add>, %182, %cst_42 [1, 2] : vector<1x16x16xf32> to vector<1xf32>
    %184 = vector.shape_cast %183 : vector<1xf32> to vector<1x1x1xf32>
    %185 = vector.extract %184[0, 0, 0] : f32 from vector<1x1x1xf32>
    %186 = arith.addf %152, %185 : f32
    %187 = vector.extract_strided_slice %14 {offsets = [80, 0], sizes = [16, 48], strides = [1, 1]} : vector<96x48xbf16> to vector<16x48xbf16>
    %188 = vector.extract_strided_slice %187 {offsets = [0, 0], sizes = [16, 32], strides = [1, 1]} : vector<16x48xbf16> to vector<16x32xbf16>
    %cst_43 = arith.constant dense<0.000000e+00> : vector<18x32xf32>
    %189 = tpu.matmul %15, %188, %cst_43 {dimension_numbers = #tpu.dot_dimension_numbers<[1], [0], [0], [1], [0, 0, 1, 1], [], []>} : vector<18x16xbf16>, vector<16x32xbf16>, vector<18x32xf32> -> vector<18x32xf32>
    %190 = vector.extract_strided_slice %189 {offsets = [0, 0], sizes = [9, 16], strides = [1, 1]} : vector<18x32xf32> to vector<9x16xf32>
    %191 = vector.extract_strided_slice %189 {offsets = [9, 16], sizes = [9, 16], strides = [1, 1]} : vector<18x32xf32> to vector<9x16xf32>
    %192 = arith.subf %190, %191 : vector<9x16xf32>
    %193 = vector.extract_strided_slice %189 {offsets = [0, 16], sizes = [9, 16], strides = [1, 1]} : vector<18x32xf32> to vector<9x16xf32>
    %194 = vector.extract_strided_slice %189 {offsets = [9, 0], sizes = [9, 16], strides = [1, 1]} : vector<18x32xf32> to vector<9x16xf32>
    %195 = arith.addf %193, %194 : vector<9x16xf32>
    %196 = math.absf %192 : vector<9x16xf32>
    %197 = vector.shape_cast %196 : vector<9x16xf32> to vector<1x9x16xf32>
    %cst_44 = arith.constant dense<0.000000e+00> : vector<1xf32>
    %198 = vector.multi_reduction <add>, %197, %cst_44 [1, 2] : vector<1x9x16xf32> to vector<1xf32>
    %199 = vector.shape_cast %198 : vector<1xf32> to vector<1x1x1xf32>
    %200 = vector.extract %199[0, 0, 0] : f32 from vector<1x1x1xf32>
    %201 = arith.addf %173, %200 : f32
    %202 = math.absf %195 : vector<9x16xf32>
    %203 = vector.shape_cast %202 : vector<9x16xf32> to vector<1x9x16xf32>
    %cst_45 = arith.constant dense<0.000000e+00> : vector<1xf32>
    %204 = vector.multi_reduction <add>, %203, %cst_45 [1, 2] : vector<1x9x16xf32> to vector<1xf32>
    %205 = vector.shape_cast %204 : vector<1xf32> to vector<1x1x1xf32>
    %206 = vector.extract %205[0, 0, 0] : f32 from vector<1x1x1xf32>
    %207 = arith.addf %201, %206 : f32
    %208 = vector.extract_strided_slice %187 {offsets = [0, 32], sizes = [16, 16], strides = [1, 1]} : vector<16x48xbf16> to vector<16x16xbf16>
    %cst_46 = arith.constant dense<0.000000e+00> : vector<16x16xf32>
    %209 = tpu.matmul %16, %208, %cst_46 {dimension_numbers = #tpu.dot_dimension_numbers<[1], [0], [0], [1], [0, 0, 1, 1], [], []>} : vector<16x16xbf16>, vector<16x16xbf16>, vector<16x16xf32> -> vector<16x16xf32>
    %210 = vector.extract_strided_slice %2 {offsets = [80, 0], sizes = [16, 16], strides = [1, 1]} : vector<96x16xf32> to vector<16x16xf32>
    %211 = arith.subf %210, %209 : vector<16x16xf32>
    %212 = arith.mulf %211, %211 : vector<16x16xf32>
    %cst_47 = arith.constant 9.99999996E-13 : f32
    %213 = vector.broadcast %cst_47 : f32 to vector<16x16xf32>
    %214 = arith.addf %212, %213 : vector<16x16xf32>
    %215 = math.sqrt %214 : vector<16x16xf32>
    %216 = vector.shape_cast %215 : vector<16x16xf32> to vector<1x16x16xf32>
    %cst_48 = arith.constant dense<0.000000e+00> : vector<1xf32>
    %217 = vector.multi_reduction <add>, %216, %cst_48 [1, 2] : vector<1x16x16xf32> to vector<1xf32>
    %218 = vector.shape_cast %217 : vector<1xf32> to vector<1x1x1xf32>
    %219 = vector.extract %218[0, 0, 0] : f32 from vector<1x1x1xf32>
    %220 = arith.addf %186, %219 : f32
    %c0_49 = arith.constant 0 : index
    %c0_50 = arith.constant 0 : index
    %221 = memref.load %arg6[%c0_49, %c0_50] : memref<1x3xf32, #tpu.memory_space<smem>>
    memref.store %10, %arg6[%c0_49, %c0_50] : memref<1x3xf32, #tpu.memory_space<smem>>
    %c0_51 = arith.constant 0 : index
    %c1 = arith.constant 1 : index
    %222 = memref.load %arg6[%c0_51, %c1] : memref<1x3xf32, #tpu.memory_space<smem>>
    memref.store %207, %arg6[%c0_51, %c1] : memref<1x3xf32, #tpu.memory_space<smem>>
    %c0_52 = arith.constant 0 : index
    %c2 = arith.constant 2 : index
    %223 = memref.load %arg6[%c0_52, %c2] : memref<1x3xf32, #tpu.memory_space<smem>>
    memref.store %220, %arg6[%c0_52, %c2] : memref<1x3xf32, #tpu.memory_space<smem>>
    return
  }
  func.func @transform_0(%arg0: i32) -> (i32, i32) {
    %c0_i32 = arith.constant 0 : i32
    %c0_i32_0 = arith.constant 0 : i32
    return %arg0, %c0_i32 : i32, i32
  }
  func.func @transform_1(%arg0: i32) -> (i32, i32) {
    %c0_i32 = arith.constant 0 : i32
    %c0_i32_0 = arith.constant 0 : i32
    return %arg0, %c0_i32 : i32, i32
  }
  func.func @transform_2(%arg0: i32) -> (i32, i32) {
    %c0_i32 = arith.constant 0 : i32
    %c0_i32_0 = arith.constant 0 : i32
    %c0_i32_1 = arith.constant 0 : i32
    return %c0_i32, %c0_i32_0 : i32, i32
  }
  func.func @transform_3(%arg0: i32) -> (i32, i32) {
    %c0_i32 = arith.constant 0 : i32
    %c0_i32_0 = arith.constant 0 : i32
    %c0_i32_1 = arith.constant 0 : i32
    return %c0_i32, %c0_i32_0 : i32, i32
  }
  func.func @transform_4(%arg0: i32) -> (i32, i32) {
    %c0_i32 = arith.constant 0 : i32
    %c0_i32_0 = arith.constant 0 : i32
    %c0_i32_1 = arith.constant 0 : i32
    return %c0_i32, %c0_i32_0 : i32, i32
  }
  func.func @transform_5(%arg0: i32) -> (i32, i32) {
    %c0_i32 = arith.constant 0 : i32
    %c0_i32_0 = arith.constant 0 : i32
    return %arg0, %c0_i32 : i32, i32
  }
}

</mosaic_0001>

<bundles_post_ra>
// kernel: tpu_custom_call.1
= control target key start
LH: loop header
LB: loop body
LE: loop exit
PB: predicated region body
PF: predicated region fallthrough
CT: control target
= control target key end

     0   :  { %10 = vsyncpa [#allocation3], 0  ;;  %s2601_s0 = inlined_call_operand.hbm [shape: f32[96,16], index: 0, kind: input, shape index: {}]   ;;  %s2602_s1 = inlined_call_operand.hbm [shape: f32[96,16], index: 1, kind: input, shape index: {}]   ;;  %s2603_s2 = inlined_call_operand.hbm [shape: bf16[18,16], index: 2, kind: input, shape index: {}]   ;;  %s2604_s3 = inlined_call_operand.hbm [shape: bf16[16,16], index: 3, kind: input, shape index: {}]   ;;  %s2605_s4 = inlined_call_operand.hbm [shape: bf16[16,48], index: 4, kind: input, shape index: {}]   ;;  %s2606_s5 = inlined_call_operand.hbm [shape: f32[1,3], index: 5, kind: output, shape index: {}]  }
   0x1   :  { %11 = vsyncpa [#allocation6], 0 }
   0x2   :  { %12 = vsyncpa [#allocation9], 0 }
   0x3   :  { %13 = vsyncpa [#allocation4], 0  ;;  %s1931_s18 = smov [#allocation5]   ;;  %s1803_s22 = scalar_lea.hbm %s2602_s1, 1536 }
   0x4   :  { %s31_s19 = sshll.u32 %s1931_s18, 4  ;;  %p1804_p0 = scmp.ne.s32.totalorder %s2602_s1, %s1803_s22  ;;  %s32_s19 = int_to_ptr.vmem [resolvable:$true] %s31_s19 }
   0x5   :  { %p1807_p1 = scmp.lt.u32.totalorder %s1803_s22, %s2602_s1 }
   0x7   :  { %p1809_p2 = pnand %p1807_p1, %p1804_p0 }
   0x9   :  { %1812 = shalt.err (!%p1809_p2)
}
   0xa   :  { %s1813_s27 = scalar_lea.vmem %s32_s19, 1536  ;;  %p1818_p4 = scmp.lt.s32.totalorder %s32_s19, %s32_s19 }
   0xb   :  { %p1814_p3 = scmp.ne.s32.totalorder %s32_s19, %s1813_s27  ;;  %p1819_p5 = scmp.lt.s32.totalorder %s1813_s27, %s1813_s27 }
   0xd   :  { %p1820_p6 = por %p1819_p5, %p1818_p4 }
   0xf   :  { %p1821_p7 = pnand %p1820_p6, %p1814_p3 }
  0x11   :  { %1824 = shalt.err (!%p1821_p7)
}
  0x12   :  { %s1932_s28 = smov 128   ;;  %s1933_s29 = smov 8  }
  0x13   :  { %37 = dma.hbm_to_vmem [thread:$0]  %s2602_s1, 1536, %s32_s19, [#allocation6], %s1932_s28, %s1932_s28, %s1933_s29  }
  0x14   :  { %s1934_s7 = smov [#allocation8]   ;;  %s1935_s9 = smov [#allocation2]  }
  0x15   :  { %s55_s8 = sshll.u32 %s1934_s7, 4  ;;  %s19_s10 = sshll.u32 %s1935_s9, 4  ;;  %s56_s8 = int_to_ptr.vmem [resolvable:$true] %s55_s8  ;;  %s20_s10 = int_to_ptr.vmem [resolvable:$true] %s19_s10 }
  0x16   :  { %s1825_s13 = scalar_lea.hbm %s2604_s3, 128 }
  0x17   :  { %p1826_p8 = scmp.ne.s32.totalorder %s2604_s3, %s1825_s13  ;;  %p1829_p9 = scmp.lt.u32.totalorder %s1825_s13, %s2604_s3 }
  0x19   :  { %p1831_p10 = pnand %p1829_p9, %p1826_p8 }
  0x1b   :  { %1834 = shalt.err (!%p1831_p10)
}
  0x1c   :  { %s1835_s1 = scalar_lea.vmem %s56_s8, 128  ;;  %p1840_p12 = scmp.lt.s32.totalorder %s56_s8, %s56_s8 }
  0x1d   :  { %p1836_p11 = scmp.ne.s32.totalorder %s56_s8, %s1835_s1  ;;  %p1841_p13 = scmp.lt.s32.totalorder %s1835_s1, %s1835_s1 }
  0x1f   :  { %p1842_p0 = por %p1841_p13, %p1840_p12 }
  0x21   :  { %p1843_p1 = pnand %p1842_p0, %p1836_p11 }
  0x23   :  { %1846 = shalt.err (!%p1843_p1)
}
  0x24   :  { %s1936_s18 = smov 64   ;;  %s1937_s19 = smov 4  }
  0x25   :  { %61 = dma.hbm_to_vmem [thread:$0]  %s2604_s3, 128, %s56_s8, [#allocation9], %s1936_s18, %s1936_s18, %s1937_s19  }
  0x26   :  { %s1847_s24 = scalar_lea.hbm %s2601_s0, 1536 }
  0x27   :  { %p1848_p2 = scmp.ne.s32.totalorder %s2601_s0, %s1847_s24  ;;  %p1851_p3 = scmp.lt.u32.totalorder %s1847_s24, %s2601_s0 }
  0x29   :  { %p1853_p4 = pnand %p1851_p3, %p1848_p2 }
  0x2b   :  { %1856 = shalt.err (!%p1853_p4)
}
  0x2c   :  { %s1857_s6 = scalar_lea.vmem %s20_s10, 1536  ;;  %p1862_p6 = scmp.lt.s32.totalorder %s20_s10, %s20_s10 }
  0x2d   :  { %p1858_p5 = scmp.ne.s32.totalorder %s20_s10, %s1857_s6  ;;  %p1863_p7 = scmp.lt.s32.totalorder %s1857_s6, %s1857_s6 }
  0x2f   :  { %p1864_p8 = por %p1863_p7, %p1862_p6 }
  0x31   :  { %p1865_p9 = pnand %p1864_p8, %p1858_p5 }
  0x33   :  { %1868 = shalt.err (!%p1865_p9)
}
  0x34   :  { %25 = dma.hbm_to_vmem [thread:$0]  %s2601_s0, 1536, %s20_s10, [#allocation3], %s1932_s28, %s1932_s28, %s1933_s29  }
  0x35   :  { %s1938_s8 = smov [#allocation7]   ;;  %s1939_s11 = smov [#allocation10]  }
  0x36   :  { %s43_s9 = sshll.u32 %s1938_s8, 4  ;;  %s67_s12 = sshll.u32 %s1939_s11, 4  ;;  %s44_s9 = int_to_ptr.vmem [resolvable:$true] %s43_s9  ;;  %s68_s12 = int_to_ptr.vmem [resolvable:$true] %s67_s12 }
  0x37   :  { %s1869_s15 = scalar_lea.hbm %s2603_s2, 192 }
  0x38   :  { %p1870_p10 = scmp.ne.s32.totalorder %s2603_s2, %s1869_s15  ;;  %p1873_p11 = scmp.lt.u32.totalorder %s1869_s15, %s2603_s2 }
  0x3a   :  { %p1875_p12 = pnand %p1873_p11, %p1870_p10 }
  0x3c   :  { %1878 = shalt.err (!%p1875_p12)
}
  0x3d   :  { %s1879_s0 = scalar_lea.vmem %s44_s9, 192  ;;  %p1884_p0 = scmp.lt.s32.totalorder %s44_s9, %s44_s9 }
  0x3e   :  { %p1880_p13 = scmp.ne.s32.totalorder %s44_s9, %s1879_s0  ;;  %p1885_p1 = scmp.lt.s32.totalorder %s1879_s0, %s1879_s0 }
  0x40   :  { %p1886_p2 = por %p1885_p1, %p1884_p0 }
  0x42   :  { %p1887_p3 = pnand %p1886_p2, %p1880_p13 }
  0x44   :  { %1890 = shalt.err (!%p1887_p3)
}
  0x45   :  { %49 = dma.hbm_to_vmem [thread:$0]  %s2603_s2, 192, %s44_s9, [#allocation6], %s1936_s18, %s1936_s18, %s1937_s19  }
  0x46   :  { %s1891_s22 = scalar_lea.hbm %s2605_s4, 128 }
  0x47   :  { %p1892_p4 = scmp.ne.s32.totalorder %s2605_s4, %s1891_s22  ;;  %p1895_p5 = scmp.lt.u32.totalorder %s1891_s22, %s2605_s4 }
  0x49   :  { %p1897_p6 = pnand %p1895_p5, %p1892_p4 }
  0x4b   :  { %1900 = shalt.err (!%p1897_p6)
}
  0x4c   :  { %s1901_s27 = scalar_lea.vmem %s68_s12, 128  ;;  %p1906_p8 = scmp.lt.s32.totalorder %s68_s12, %s68_s12 }
  0x4d   :  { %p1902_p7 = scmp.ne.s32.totalorder %s68_s12, %s1901_s27  ;;  %p1907_p9 = scmp.lt.s32.totalorder %s1901_s27, %s1901_s27 }
  0x4f   :  { %p1908_p10 = por %p1907_p9, %p1906_p8 }
  0x51   :  { %p1909_p11 = pnand %p1908_p10, %p1902_p7 }
  0x53   :  { %1912 = shalt.err (!%p1909_p11)
}
  0x54   :  { %73 = dma.hbm_to_vmem [thread:$0]  %s2605_s4, 128, %s68_s12, [#allocation9], %s1936_s18, %s1936_s18, %s1937_s19  }
  0x55   :  { %1923 = dma.done.wait [#allocation3], 1536  }
  0x56   :  { %1924 = vsyncadd [#allocation3], 4294965760 }
  0x57   :  { %1925 = dma.done.wait [#allocation6], 1728  }
  0x58   :  { %1926 = vsyncadd [#allocation6], 4294965568 }
  0x59   :  { %1927 = dma.done.wait [#allocation9], 256  }
  0x5a   :  { %1928 = vsyncadd [#allocation9], 4294967040  ;;  %v1751_v0 = vld [vmem:[#allocation10] sm:$0xff]   ;;  %v90_v1 = vld [vmem:[#allocation2] sm:$0xff]  ;;  %vm234_vm0 = vcmask 130048   ;;  %v1940_v44 = vmov 0.0  }
  0x5b   :  { %v91_v2 = vld [vmem:[#allocation2 + $0x8] sm:$0xff]  ;;  %v102_v3 = vld [vmem:[#allocation5] sm:$0xff]  ;;  %1612 = vmatprep.subr.bf16.mxu0 %v1751_v0  ;;  %v92_v6 = vld [vmem:[#allocation2 + $0x10] sm:$0xff]  ;;  %vm1941_vm1 = vmmov 0   ;;  %s1942_s4 = smov 96   ;;  %s1943_s18 = smov 112  }
  0x5c   :  { %v103_v4 = vld [vmem:[#allocation5 + $0x8] sm:$0xff]  ;;  %v2051_v5 = vsub.f32 %v90_v1, %v102_v3  ;;  %v93_v7 = vld [vmem:[#allocation2 + $0x18] sm:$0xff]  ;;  %1613 = vmatpush3.bf16.msra.mxu0 %v1751_v0  ;;  %v104_v9 = vld [vmem:[#allocation5 + $0x10] sm:$0xff]  ;;  %s1944_s19 = smov 16  }
  0x5d   :  { %v2053_v8 = vsub.f32 %v91_v2, %v103_v4  ;;  %v105_v10 = vld [vmem:[#allocation5 + $0x18] sm:$0xff]  ;;  %v94_v11 = vld [vmem:[#allocation2 + $0x20] sm:$0xff]  ;;  %v2055_v12 = vsub.f32 %v92_v6, %v104_v9  ;;  %v95_v14 = vld [vmem:[#allocation2 + $0x28] sm:$0xff]  ;;  %1644 = vmatprep.subr.bf16.mxu0 %v1940_v44 }
  0x5e   :  { %v2057_v13 = vsub.f32 %v93_v7, %v105_v10  ;;  %v106_v15 = vld [vmem:[#allocation5 + $0x20] sm:$0xff]  ;;  %v107_v16 = vld [vmem:[#allocation5 + $0x28] sm:$0xff]  ;;  %v96_v20 = vld [vmem:[#allocation2 + $0x30] sm:$0xff]  ;;  %v126_v45 = vmul.f32 %v2051_v5, %v2051_v5 }
  0x5f   :  { %v267_v17 = vpack.c.bf16 %v2053_v8, %v2051_v5  ;;  %v2061_v18 = vsub.f32 %v94_v11, %v106_v15  ;;  %v2063_v19 = vsub.f32 %v95_v14, %v107_v16  ;;  %v108_v21 = vld [vmem:[#allocation5 + $0x30] sm:$0xff]  ;;  %v97_v23 = vld [vmem:[#allocation2 + $0x38] sm:$0xff]  ;;  %v98_v25 = vld [vmem:[#allocation2 + $0x40] sm:$0xff]  ;;  %v127_v46 = vmul.f32 %v2053_v8, %v2053_v8 }
  0x60   :  { %v268_v22 = vpack.c.bf16 %v2057_v13, %v2055_v12  ;;  %v109_v24 = vld [vmem:[#allocation5 + $0x38] sm:$0xff]  ;;  %v99_v27 = vld [vmem:[#allocation2 + $0x48] sm:$0xff]  ;;  %v110_v28 = vld [vmem:[#allocation5 + $0x40] sm:$0xff]  ;;  %v2071_v30 = vsub.f32 %v96_v20, %v108_v21  ;;  %v128_v47 = vmul.f32 %v2055_v12, %v2055_v12  ;;  %v2106_v48 = vadd.f32 1e-12, %v126_v45 }
  0x61   :  { %1614 = vmatprep.mubr.msk.bf16.mxu0 %vm234_vm0, %v267_v17  ;;  %v269_v26 = vpack.c.bf16 %v2063_v19, %v2061_v18  ;;  %v111_v29 = vld [vmem:[#allocation5 + $0x48] sm:$0xff]  ;;  %v2074_v31 = vsub.f32 %v97_v23, %v109_v24  ;;  %v2076_v32 = vsub.f32 %v98_v25, %v110_v28  ;;  %v100_v35 = vld [vmem:[#allocation2 + $0x50] sm:$0xff]  ;;  %v101_v37 = vld [vmem:[#allocation2 + $0x58] sm:$0xff]  ;;  %v129_v49 = vmul.f32 %v2057_v13, %v2057_v13 }
  0x62   :  { %1615 = vmatmul.mubr.msk.bf16.vlgmr.msra.gmra.mrb[0].mxu0 %vm234_vm0, %v268_v22  ;;  %v2078_v33 = vsub.f32 %v99_v27, %v111_v29  ;;  %v112_v38 = vld [vmem:[#allocation5 + $0x50] sm:$0xff]  ;;  %v113_v39 = vld [vmem:[#allocation5 + $0x58] sm:$0xff]  ;;  %v2093_v43 = vld [vmem:[#allocation7] sm:$0xff]   ;;  %v2110_v50 = vadd.f32 1e-12, %v127_v46  ;;  %v130_v51 = vmul.f32 %v2061_v18, %v2061_v18  ;;  %1755 = vrsqrt.f32 %v2106_v48 }
  0x63   :  { %1618 = vmatprep.mubr.msk.bf16.mxu0 %vm234_vm0, %v269_v26  ;;  %v270_v34 = vpack.c.bf16 %v2074_v31, %v2071_v30  ;;  %v2085_v40 = vsub.f32 %v100_v35, %v112_v38  ;;  %v2087_v41 = vsub.f32 %v101_v37, %v113_v39  ;;  %1628 = vmatprep.mubr.msk.bf16.mxu1 %vm234_vm0, %v2093_v43  ;;  %v2114_v52 = vadd.f32 1e-12, %v128_v47  ;;  %v2130_v61 = vld [vmem:[#allocation7 + $0x8] ss:$0 sps:$4 sm:$0x11]  }
  0x64   :  { %v271_v36 = vpack.c.bf16 %v2078_v33, %v2076_v32  ;;  %v2117_v53 = vadd.f32 1e-12, %v129_v49  ;;  %1757 = vrsqrt.f32 %v2110_v50  ;;  %v2120_v55 = vadd.f32 1e-12, %v130_v51 }
  0x65   :  { %v272_v42 = vpack.c.bf16 %v2087_v41, %v2085_v40  ;;  %1759 = vrsqrt.f32 %v2114_v52  ;;  %v131_v1 = vmul.f32 %v2063_v19, %v2063_v19  ;;  %v132_v2 = vmul.f32 %v2071_v30, %v2071_v30 }
  0x66   :  { %1761 = vrsqrt.f32 %v2117_v53  ;;  %v133_v6 = vmul.f32 %v2074_v31, %v2074_v31  ;;  %v134_v7 = vmul.f32 %v2076_v32, %v2076_v32  ;;  %v135_v11 = vmul.f32 %v2078_v33, %v2078_v33 }
  0x67   :  { %1763 = vrsqrt.f32 %v2120_v55  ;;  %v136_v14 = vmul.f32 %v2085_v40, %v2085_v40  ;;  %v2155_v22 = vadd.f32 1e-12, %v131_v1  ;;  %v2157_v23 = vadd.f32 1e-12, %v132_v2 }
  0x68   :  { %vm152_vm2 = vcmp.eq.f32.partialorder %v2106_v48, inf  ;;  %v2162_v25 = vadd.f32 1e-12, %v133_v6  ;;  %v2164_v26 = vadd.f32 1e-12, %v134_v7  ;;  %vm159_vm3 = vcmp.eq.f32.partialorder %v2110_v50, inf }
  0x69   :  { %v2167_v27 = vadd.f32 1e-12, %v135_v11  ;;  %v137_v28 = vmul.f32 %v2087_v41, %v2087_v41  ;;  %v2171_v29 = vadd.f32 1e-12, %v136_v14  ;;  %vm154_vm4 = vcmp.eq.f32.partialorder %v2106_v48, 0.0 }
  0x6a   :  { %1619 = vmatmul.mubr.msk.bf16.gmra.mrb[4].mxu0 %vm234_vm0, %v270_v34  ;;  %vm166_vm5 = vcmp.eq.f32.partialorder %v2114_v52, inf  ;;  %vm173_vm6 = vcmp.eq.f32.partialorder %v2117_v53, inf  ;;  %vm161_vm7 = vcmp.eq.f32.partialorder %v2110_v50, 0.0  ;;  %v162_v47 = vand.u32 2147483648, %v2110_v50 }
  0x6b   :  { %1622 = vmatprep.mubr.msk.bf16.mxu0 %vm234_vm0, %v271_v36  ;;  %v155_v36 = vand.u32 2147483648, %v2106_v48  ;;  %vm180_vm8 = vcmp.eq.f32.partialorder %v2120_v55, inf  ;;  %1765 = vrsqrt.f32 %v2155_v22  ;;  %vm168_vm9 = vcmp.eq.f32.partialorder %v2114_v52, 0.0 }
  0x6c   :  { %v1756_v0 = vpop.eup %1755  ;;  %v169_v51 = vand.u32 2147483648, %v2114_v52  ;;  %1767 = vrsqrt.f32 %v2157_v23  ;;  %vm175_vm10 = vcmp.eq.f32.partialorder %v2117_v53, 0.0  ;;  %vm182_vm11 = vcmp.eq.f32.partialorder %v2120_v55, 0.0 }
  0x6d   :  { %v151_v17 = vmul.f32 %v1756_v0, %v2106_v48  ;;  %1769 = vrsqrt.f32 %v2162_v25  ;;  %vm187_vm12 = vcmp.eq.f32.partialorder %v2155_v22, inf  ;;  %vm189_vm13 = vcmp.eq.f32.partialorder %v2155_v22, 0.0 }
  0x6e   :  { %v1758_v4 = vpop.eup %1757  ;;  %1771 = vrsqrt.f32 %v2164_v26  ;;  %vm194_vm14 = vcmp.eq.f32.partialorder %v2157_v23, inf  ;;  %vm196_vm15 = vcmp.eq.f32.partialorder %v2157_v23, 0.0  ;;  %v204_v11 = vand.u32 2147483648, %v2162_v25 }
  0x6f   :  { %v1760_v16 = vpop.eup %1759  ;;  %v158_v21 = vmul.f32 %v1758_v4, %v2110_v50  ;;  %v153_v35 = vsel %vm152_vm2, %v2106_v48, %v151_v17  ;;  %1773 = vrsqrt.f32 %v2167_v27  ;;  %v197_v48 = vand.u32 2147483648, %v2157_v23 }
  0x70   :  { %v1762_v20 = vpop.eup %1761  ;;  %v165_v37 = vmul.f32 %v1760_v16, %v2114_v52  ;;  %1775 = vrsqrt.f32 %v2171_v29  ;;  %vm201_vm2 = vcmp.eq.f32.partialorder %v2162_v25, inf }
  0x71   :  { %v1764_v24 = vpop.eup %1763  ;;  %v172_v38 = vmul.f32 %v1762_v20, %v2117_v53  ;;  %v211_v20 = vand.u32 2147483648, %v2164_v26 }
  0x72   :  { %1623 = vmatmul.mubr.msk.bf16.gmra.mrb[8].mxu0 %vm234_vm0, %v272_v42  ;;  %v160_v42 = vsel %vm159_vm3, %v2110_v50, %v158_v21  ;;  %v179_v45 = vmul.f32 %v1764_v24, %v2120_v55  ;;  %vm203_vm3 = vcmp.eq.f32.partialorder %v2162_v25, 0.0 }
  0x73   :  { %1646 = vmatprep.mubr.msk.bf16.mxu0 %vm1941_vm1, %v1940_v44 }
 0x135   :  { %v1616_v54 = vpop.f32.mrb[0].mxu0 }
 0x136   :  { %v333_v56 = vpop.f32.mrb[1].mxu0 }
 0x137   :  { %v1617_v57 = vpop.f32.mrb[2].mxu0 }
 0x138   :  { %v2123_v58 = vpack.c.bf16 %v1617_v57, %v1616_v54  ;;  %v336_v59 = vpop.f32.mrb[3].mxu0  ;;  %v176_v54 = vand.u32 2147483648, %v2117_v53  ;;  %v174_v57 = vsel %vm173_vm6, %v2117_v53, %v172_v38  ;;  %vm215_vm6 = vcmp.eq.f32.partialorder %v2167_v27, inf }
 0x139   :  { %v380_v60 = vpack.c.bf16 %v336_v59, %v333_v56  ;;  %v167_v56 = vsel %vm166_vm5, %v2114_v52, %v165_v37  ;;  %v183_v59 = vand.u32 2147483648, %v2120_v55  ;;  %v163_v52 = vsel %vm161_vm7, %v162_v47, %v160_v42 }
 0x13a   :  { %708 = vrot.lane.b32.xlu1 %v2123_v58, %s1942_s4  ;;  %v170_v0 = vsel %vm168_vm9, %v169_v51, %v167_v56  ;;  %v177_v53 = vsel %vm175_vm10, %v176_v54, %v174_v57  ;;  %v236_v2 = vsel %vm234_vm0, %v163_v52, 0.0  ;;  %vm210_vm5 = vcmp.eq.f32.partialorder %v2164_v26, 0.0 }
 0x13b   :  { %520 = vrot.lane.b32.xlu0 %v380_v60, %s1942_s4  ;;  %1626 = vmatprep.subr.bf16.mxu1 %v380_v60  ;;  %v240_v14 = vsel %vm234_vm0, %v177_v53, 0.0  ;;  %vm217_vm7 = vcmp.eq.f32.partialorder %v2167_v27, 0.0  ;;  %vm224_vm9 = vcmp.eq.f32.partialorder %v2171_v29, 0.0 }
 0x13c   :  { %1627 = vmatpush3.bf16.msra.mxu1 %v380_v60  ;;  %v2196_v60 = vadd.f32 1e-12, %v137_v28  ;;  %v218_v28 = vand.u32 2147483648, %v2167_v27 }
 0x13d   :  { %v1620_v62 = vpop.f32.mrb[4].mxu0  ;;  %1632 = vmatprep.subr.bf16.mxu1 %v1940_v44 }
 0x13e   :  { %v349_v63 = vpop.f32.mrb[5].mxu0  ;;  %1777 = vrsqrt.f32 %v2196_v60  ;;  %vm229_vm10 = vcmp.eq.f32.partialorder %v2196_v60, inf }
 0x13f   :  { %1629 = vmatmul.mubr.msk.bf16.vlgmr.msra.gmra.mrb[0].mxu1 %vm234_vm0, %v2130_v61  ;;  %v1621_v3 = vpop.f32.mrb[6].mxu0 }
 0x140   :  { %v2143_v9 = vpack.c.bf16 %v1621_v3, %v1620_v62  ;;  %v352_v10 = vpop.f32.mrb[7].mxu0  ;;  %1634 = vmatprep.mubr.msk.bf16.mxu1 %vm1941_vm1, %v1940_v44  ;;  %v181_v62 = vsel %vm180_vm8, %v2120_v55, %v179_v45  ;;  %v190_v55 = vand.u32 2147483648, %v2155_v22  ;;  %v238_v3 = vsel %vm234_vm0, %v170_v0, 0.0 }
 0x141   :  { %v2151_v15 = vpack.c.bf16 %v352_v10, %v349_v63  ;;  %v156_v63 = vsel %vm154_vm4, %v155_v36, %v153_v35  ;;  %v184_v1 = vsel %vm182_vm11, %v183_v59, %v181_v62  ;;  %v1766_v10 = vpop.eup %1765  ;;  %vm208_vm4 = vcmp.eq.f32.partialorder %v2164_v26, inf }
 0x142   :  { %v235_v50 = vsel %vm234_vm0, %v156_v63, 0.0  ;;  %v1768_v16 = vpop.eup %1767  ;;  %v186_v17 = vmul.f32 %v1766_v10, %v2155_v22  ;;  %vm222_vm8 = vcmp.eq.f32.partialorder %v2171_v29, inf  ;;  %vm231_vm11 = vcmp.eq.f32.partialorder %v2196_v60, 0.0 }
 0x143   :  { %893 = vrot.lane.b32.xlu1 %v2151_v15, %s1942_s4  ;;  %v237_v4 = vadd.f32 %v236_v2, %v235_v50  ;;  %v193_v24 = vmul.f32 %v1768_v16, %v2157_v23  ;;  %v1770_v35 = vpop.eup %1769 }
 0x144   :  { %v188_v36 = vsel %vm187_vm12, %v2155_v22, %v186_v17  ;;  %v1772_v38 = vpop.eup %1771  ;;  %v200_v45 = vmul.f32 %v1770_v35, %v2162_v25  ;;  %v1754_v35 = vld [vmem:[#allocation8] sm:$0xff]   ;;  %vm478_vm12 = vcmask 122880  }
 0x145   :  { %v1624_v34 = vpop.f32.mrb[8].mxu0  ;;  %v239_v21 = vadd.f32 %v238_v3, %v237_v4  ;;  %v195_v42 = vsel %vm194_vm14, %v2157_v23, %v193_v24  ;;  %v1774_v47 = vpop.eup %1773  ;;  %v207_v51 = vmul.f32 %v1772_v38, %v2164_v26  ;;  %v232_v3 = vand.u32 2147483648, %v2196_v60 }
 0x146   :  { %v365_v39 = vpop.f32.mrb[9].mxu0  ;;  %v1776_v57 = vpop.eup %1775  ;;  %v202_v22 = vsel %vm201_vm2, %v2162_v25, %v200_v45  ;;  %v214_v59 = vmul.f32 %v1774_v47, %v2167_v27 }
 0x147   :  { %1078 = vrot.lane.b32.xlu1 %v2143_v9, %s1942_s4  ;;  %v1625_v46 = vpop.f32.mrb[10].mxu0  ;;  %v241_v37 = vadd.f32 %v240_v14, %v239_v21  ;;  %v205_v23 = vsel %vm203_vm3, %v204_v11, %v202_v22  ;;  %v209_v52 = vsel %vm208_vm4, %v2164_v26, %v207_v51  ;;  %v221_v0 = vmul.f32 %v1776_v57, %v2171_v29 }
 0x148   :  { %v368_v49 = vpop.f32.mrb[11].mxu0  ;;  %v2220_v6 = vpack.c.bf16 %v1625_v46, %v1624_v34  ;;  %v242_v34 = vsel %vm234_vm0, %v184_v1, 0.0  ;;  %v225_v46 = vand.u32 2147483648, %v2171_v29  ;;  %v1778_v63 = vpop.eup %1777  ;;  %v212_v1 = vsel %vm210_vm5, %v211_v20, %v209_v52 }
 0x149   :  { %v2222_v7 = vpack.c.bf16 %v368_v49, %v365_v39  ;;  %v191_v39 = vsel %vm189_vm13, %v190_v55, %v188_v36  ;;  %v198_v49 = vsel %vm196_vm15, %v197_v48, %v195_v42  ;;  %v243_v54 = vadd.f32 %v242_v34, %v241_v37 }
 0x14a   :  { %v244_v56 = vsel %vm234_vm0, %v191_v39, 0.0  ;;  %v246_v62 = vsel %vm234_vm0, %v198_v49, 0.0  ;;  %v216_v55 = vsel %vm215_vm6, %v2167_v27, %v214_v59  ;;  %v228_v48 = vmul.f32 %v1778_v63, %v2196_v60 }
 0x14b   :  { %1263 = vrot.lane.b32.xlu1 %v2222_v7, %s1942_s4  ;;  %v245_v53 = vadd.f32 %v244_v56, %v243_v54  ;;  %v248_v50 = vsel %vm234_vm0, %v205_v23, 0.0  ;;  %v219_v25 = vsel %vm217_vm7, %v218_v28, %v216_v55  ;;  %v223_v2 = vsel %vm222_vm8, %v2171_v29, %v221_v0 }
 0x14c   :  { %v230_v26 = vsel %vm229_vm10, %v2196_v60, %v228_v48  ;;  %v250_v10 = vsel %vm234_vm0, %v212_v1, 0.0  ;;  %v226_v11 = vsel %vm224_vm9, %v225_v46, %v223_v2  ;;  %v252_v27 = vsel %vm234_vm0, %v219_v25, 0.0 }
 0x14d   :  { %v247_v4 = vadd.f32 %v246_v62, %v245_v53  ;;  %v233_v16 = vsel %vm231_vm11, %v232_v3, %v230_v26  ;;  %v254_v20 = vsel %vm234_vm0, %v226_v11, 0.0 }
 0x14e   :  { %v256_v24 = vsel %vm234_vm0, %v233_v16, 0.0 }
 0x14f   :  { %v249_v14 = vadd.f32 %v248_v50, %v247_v4 }
 0x151   :  { %v251_v17 = vadd.f32 %v250_v10, %v249_v14 }
 0x153   :  { %v253_v21 = vadd.f32 %v252_v27, %v251_v17 }
 0x155   :  { %v255_v28 = vadd.f32 %v254_v20, %v253_v21 }
 0x157   :  { %v257_v34 = vadd.f32 %v256_v24, %v255_v28 }
 0x15a   :  { %258 = vadd.xlane.f32.xlu0 %v257_v34 }
 0x170   :  { %1448 = vrot.lane.b32.xlu0 %v2220_v6, %s1942_s4 }
 0x1ac   :  { %v709_v60 = vpop.permute.xlu1 %708 }
 0x1ad   :  { %1645 = vmatpush3.bf16.msra.mxu0 %v709_v60  ;;  %v521_v29 = vpop.permute.xlu0 %520 }
 0x1ae   :  { %1633 = vmatpush3.bf16.msra.mxu1 %v521_v29  ;;  %1656 = vmatprep.subr.bf16.mxu0 %v1940_v44 }
 0x1af   :  { %1638 = vmatprep.subr.bf16.mxu1 %v2123_v58 }
 0x1b0   :  { %1647 = vmatmul.mubr.msk.bf16.vlgmr.msra.gmra.mrb[12].mxu0 %vm234_vm0, %v1754_v35 }
 0x1b1   :  { %1635 = vmatmul.mubr.msk.bf16.vlgmr.msra.gmra.mrb[4].mxu1 %vm234_vm0, %v1754_v35  ;;  %1658 = vmatprep.mubr.msk.bf16.mxu0 %vm1941_vm1, %v1940_v44 }
 0x1b2   :  { %1639 = vmatpush3.bf16.msra.mxu1 %v2123_v58  ;;  %1640 = vmatprep.mubr.msk.bf16.mxu1 %vm234_vm0, %v2093_v43 }
 0x1b3   :  { %1650 = vmatprep.subr.bf16.mxu1 %v2151_v15 }
 0x1b5   :  { %v894_v36 = vpop.permute.xlu1 %893 }
 0x1b6   :  { %1657 = vmatpush3.bf16.msra.mxu0 %v894_v36 }
 0x1b7   :  { %1668 = vmatprep.subr.bf16.mxu0 %v1940_v44 }
 0x1b9   :  { %1641 = vmatmul.mubr.msk.bf16.vlgmr.msra.gmra.mrb[8].mxu1 %vm234_vm0, %v2130_v61  ;;  %1659 = vmatmul.mubr.msk.bf16.vlgmr.msra.gmra.mrb[16].mxu0 %vm234_vm0, %v1754_v35  ;;  %v1079_v37 = vpop.permute.xlu1 %1078 }
 0x1ba   :  { %1651 = vmatpush3.bf16.msra.mxu1 %v2151_v15  ;;  %1652 = vmatprep.mubr.msk.bf16.mxu1 %vm234_vm0, %v2093_v43 }
 0x1bb   :  { %1662 = vmatprep.subr.bf16.mxu1 %v2143_v9  ;;  %1669 = vmatpush3.bf16.msra.mxu0 %v1079_v37 }
 0x1bc   :  { %1670 = vmatprep.mubr.msk.bf16.mxu0 %vm1941_vm1, %v1940_v44  ;;  %1680 = vmatprep.subr.bf16.mxu0 %v1940_v44 }
 0x1bd   :  { %v1264_v58 = vpop.permute.xlu1 %1263 }
 0x1c1   :  { %1653 = vmatmul.mubr.msk.bf16.vlgmr.msra.gmra.mrb[12].mxu1 %vm234_vm0, %v2130_v61  ;;  %1671 = vmatmul.mubr.msk.bf16.vlgmr.msra.gmra.mrb[20].mxu0 %vm234_vm0, %v1754_v35 }
 0x1c2   :  { %1663 = vmatpush3.bf16.msra.mxu1 %v2143_v9  ;;  %1664 = vmatprep.mubr.msk.bf16.mxu1 %vm234_vm0, %v2093_v43 }
 0x1c3   :  { %1674 = vmatprep.subr.bf16.mxu1 %v2222_v7  ;;  %1682 = vmatprep.mubr.msk.bf16.mxu0 %vm1941_vm1, %v1940_v44 }
 0x1c4   :  { %1681 = vmatpush3.bf16.msra.mxu0 %v1264_v58 }
 0x1c5   :  { %1692 = vmatprep.subr.bf16.mxu0 %v1940_v44 }
 0x1c9   :  { %1665 = vmatmul.mubr.msk.bf16.vlgmr.msra.gmra.mrb[16].mxu1 %vm234_vm0, %v2130_v61  ;;  %1683 = vmatmul.mubr.msk.bf16.vlgmr.msra.gmra.mrb[24].mxu0 %vm234_vm0, %v1754_v35 }
 0x1ca   :  { %1675 = vmatpush3.bf16.msra.mxu1 %v2222_v7  ;;  %1676 = vmatprep.mubr.msk.bf16.mxu1 %vm234_vm0, %v2093_v43 }
 0x1cb   :  { %1686 = vmatprep.subr.bf16.mxu1 %v2220_v6  ;;  %1694 = vmatprep.mubr.msk.bf16.mxu0 %vm1941_vm1, %v1940_v44  ;;  %vm455_vm1 = vcmask 1046528  }
 0x1d1   :  { %1677 = vmatmul.mubr.msk.bf16.vlgmr.msra.gmra.mrb[20].mxu1 %vm234_vm0, %v2130_v61 }
 0x1d2   :  { %1687 = vmatpush3.bf16.msra.mxu1 %v2220_v6  ;;  %1688 = vmatprep.mubr.msk.bf16.mxu1 %vm234_vm0, %v2093_v43 }
 0x1d9   :  { %1689 = vmatmul.mubr.msk.bf16.vlgmr.msra.gmra.mrb[24].mxu1 %vm234_vm0, %v2130_v61 }
 0x1e7   :  { %v2335_v9 = vpop.xlane.xlu0 %258 }
 0x1e8   :  { %v260_v2 = vrot.slane %v2335_v9, 4 }
 0x1eb   :  { %v1449_v15 = vpop.permute.xlu0 %1448 }
 0x1ec   :  { %1693 = vmatpush3.bf16.msra.mxu0 %v1449_v15 }
 0x1ef   :  { %1695 = vmatmul.mubr.msk.bf16.vlgmr.msra.gmra.mrb[28].mxu0 %vm234_vm0, %v1754_v35 }
 0x212   :  { %v1630_v7 = vpop.f32.mrb[0].mxu1 }
 0x213   :  { %v457_v38 = vrot.slane %v1630_v7, 1  ;;  %v2338_v44 = vpop.f32.mrb[1].mxu1 }
 0x214   :  { %v1631_v39 = vpop.f32.mrb[2].mxu1 }
 0x215   :  { %v442_v42 = vpop.f32.mrb[3].mxu1  ;;  %461 = vrot.lane.b32.xlu1 %v457_v38, %s1943_s18 }
 0x216   :  { %v456_v43 = vrot.slane %v442_v42, 1 }
 0x218   :  { %v458_v6 = vsel %vm455_vm1, %v456_v43, %v457_v38 }
 0x219   :  { %469 = vrot.lane.b32.xlu1 %v457_v38, %s1944_s19 }
 0x21d   :  { %459 = vrot.lane.b32.xlu1 %v458_v6, %s1943_s18 }
 0x221   :  { %467 = vrot.lane.b32.xlu1 %v458_v6, %s1944_s19 }
 0x283   :  { %v745_v61 = vpop.f32.mrb[12].mxu0 }
 0x284   :  { %v560_v45 = vpop.f32.mrb[4].mxu1  ;;  %v752_v46 = vsub.f32 %v2055_v12, %v745_v61  ;;  %v1648_v47 = vpop.f32.mrb[13].mxu0 }
 0x285   :  { %v567_v49 = vsub.f32 %v2051_v5, %v560_v45  ;;  %v1636_v51 = vpop.f32.mrb[5].mxu1  ;;  %v748_v54 = vpop.f32.mrb[14].mxu0 }
 0x286   :  { %v563_v56 = vpop.f32.mrb[6].mxu1  ;;  %v754_v57 = vmul.f32 %v752_v46, %v752_v46  ;;  %v753_v22 = vsub.f32 %v2057_v13, %v748_v54  ;;  %v1649_v59 = vpop.f32.mrb[15].mxu0 }
 0x287   :  { %v569_v62 = vmul.f32 %v567_v49, %v567_v49  ;;  %v568_v63 = vsub.f32 %v2053_v8, %v563_v56  ;;  %v462_v23 = vpop.permute.xlu1 %461  ;;  %v1637_v52 = vpop.f32.mrb[7].mxu1 }
 0x288   :  { %v2349_v0 = vadd.f32 1e-12, %v754_v57  ;;  %v755_v53 = vmul.f32 %v753_v22, %v753_v22  ;;  %v466_v13 = vsub.f32 %v442_v42, %v462_v23 }
 0x289   :  { %v2351_v1 = vadd.f32 1e-12, %v569_v62  ;;  %v570_v12 = vmul.f32 %v568_v63, %v568_v63 }
 0x28a   :  { %1779 = vrsqrt.f32 %v2349_v0  ;;  %v2354_v5 = vadd.f32 1e-12, %v755_v53  ;;  %v476_v16 = vand.u32 2147483647, %v466_v13  ;;  %vm760_vm13 = vcmp.eq.f32.partialorder %v2349_v0, inf }
 0x28b   :  { %1781 = vrsqrt.f32 %v2351_v1  ;;  %v2357_v55 = vadd.f32 1e-12, %v570_v12  ;;  %v470_v48 = vpop.permute.xlu1 %469  ;;  %vm762_vm14 = vcmp.eq.f32.partialorder %v2349_v0, 0.0  ;;  %v763_v29 = vand.u32 2147483648, %v2349_v0 }
 0x28c   :  { %v474_v50 = vadd.f32 %v470_v48, %v442_v42  ;;  %v1642_v8 = vpop.f32.mrb[8].mxu1  ;;  %1783 = vrsqrt.f32 %v2354_v5  ;;  %v930_v25 = vpop.f32.mrb[16].mxu0  ;;  %vm767_vm15 = vcmp.eq.f32.partialorder %v2354_v5, inf  ;;  %vm769_vm2 = vcmp.eq.f32.partialorder %v2354_v5, 0.0 }
 0x28d   :  { %1785 = vrsqrt.f32 %v2357_v55  ;;  %v651_v3 = vrot.slane %v1642_v8, 1  ;;  %v2362_v4 = vpop.f32.mrb[9].mxu1  ;;  %v1660_v26 = vpop.f32.mrb[17].mxu0  ;;  %v937_v14 = vsub.f32 %v2061_v18, %v930_v25  ;;  %v2373_v18 = vadd.f32 %v260_v2, %v2335_v9 }
 0x28e   :  { %v492_v10 = vand.u32 2147483647, %v474_v50  ;;  %v1643_v11 = vpop.f32.mrb[10].mxu1  ;;  %v933_v27 = vpop.f32.mrb[18].mxu0  ;;  %v770_v9 = vand.u32 2147483648, %v2354_v5  ;;  %vm575_vm3 = vcmp.eq.f32.partialorder %v2351_v1, inf }
 0x28f   :  { %v460_v17 = vpop.permute.xlu1 %459  ;;  %655 = vrot.lane.b32.xlu0 %v651_v3, %s1943_s18  ;;  %v2366_v20 = vpop.f32.mrb[11].mxu1  ;;  %v939_v28 = vmul.f32 %v937_v14, %v937_v14  ;;  %v938_v34 = vsub.f32 %v2063_v19, %v933_v27  ;;  %v479_v19 = vsel %vm478_vm12, %v476_v16, 0.0  ;;  %vm577_vm4 = vcmp.eq.f32.partialorder %v2351_v1, 0.0 }
 0x290   :  { %v465_v21 = vsub.f32 %v2338_v44, %v460_v17  ;;  %497 = vrot.lane.b32.xlu1 %v492_v10, %s1943_s18  ;;  %v650_v24 = vrot.slane %v2366_v20, 1  ;;  %v1661_v60 = vpop.f32.mrb[19].mxu0  ;;  %v578_v54 = vand.u32 2147483648, %v2351_v1  ;;  %vm582_vm5 = vcmp.eq.f32.partialorder %v2357_v55, inf }
 0x291   :  { %v2381_v37 = vadd.f32 1e-12, %v939_v28  ;;  %v940_v58 = vmul.f32 %v938_v34, %v938_v34  ;;  %v585_v25 = vand.u32 2147483648, %v2357_v55  ;;  %vm584_vm6 = vcmp.eq.f32.partialorder %v2357_v55, 0.0 }
 0x292   :  { %v475_v35 = vand.u32 2147483647, %v465_v21  ;;  %v2379_v36 = vsel %vm455_vm1, %v650_v24, %v651_v3 }
 0x293   :  { %v468_v15 = vpop.permute.xlu1 %467  ;;  %1787 = vrsqrt.f32 %v2381_v37  ;;  %v2391_v43 = vadd.f32 1e-12, %v940_v58  ;;  %vm945_vm7 = vcmp.eq.f32.partialorder %v2381_v37, inf  ;;  %vm947_vm8 = vcmp.eq.f32.partialorder %v2381_v37, 0.0 }
 0x294   :  { %v1780_v7 = vpop.eup %1779  ;;  %v473_v38 = vadd.f32 %v468_v15, %v2338_v44  ;;  %663 = vrot.lane.b32.xlu1 %v651_v3, %s1944_s19  ;;  %v1654_v39 = vpop.f32.mrb[12].mxu1  ;;  %v477_v42 = vsel %vm234_vm0, %v475_v35, 0.0 }
 0x295   :  { %v1782_v6 = vpop.eup %1781  ;;  %v2393_v61 = vpop.f32.mrb[13].mxu1  ;;  %v2395_v45 = vadd.f32 %v479_v19, %v477_v42  ;;  %v759_v46 = vmul.f32 %v1780_v7, %v2349_v0  ;;  %1789 = vrsqrt.f32 %v2391_v43  ;;  %v2403_v57 = vrot.slane %v1654_v39, 1 }
 0x296   :  { %v1784_v44 = vpop.eup %1783  ;;  %v491_v47 = vand.u32 2147483647, %v473_v38  ;;  %v1655_v49 = vpop.f32.mrb[14].mxu1  ;;  %v574_v51 = vmul.f32 %v1782_v6, %v2351_v1  ;;  %vm952_vm9 = vcmp.eq.f32.partialorder %v2391_v43, inf  ;;  %v955_v38 = vand.u32 2147483648, %v2391_v43 }
 0x297   :  { %v1786_v56 = vpop.eup %1785  ;;  %v2405_v22 = vpop.f32.mrb[15].mxu1  ;;  %v761_v59 = vsel %vm760_vm13, %v2349_v0, %v759_v46  ;;  %v766_v62 = vmul.f32 %v1784_v44, %v2354_v5  ;;  %vm954_vm10 = vcmp.eq.f32.partialorder %v2391_v43, 0.0 }
 0x298   :  { %v1115_v63 = vpop.f32.mrb[20].mxu0  ;;  %495 = vrot.lane.b32.xlu0 %v491_v47, %s1943_s18  ;;  %v835_v23 = vrot.slane %v2405_v22, 1  ;;  %v764_v52 = vsel %vm762_vm14, %v763_v29, %v761_v59  ;;  %v576_v53 = vsel %vm575_vm3, %v2351_v1, %v574_v51  ;;  %v581_v12 = vmul.f32 %v1786_v56, %v2357_v55 }
 0x299   :  { %v1672_v13 = vpop.f32.mrb[21].mxu0  ;;  %v768_v48 = vsel %vm767_vm15, %v2354_v5, %v766_v62  ;;  %v772_v50 = vsel %vm234_vm0, %v764_v52, 0.0  ;;  %v579_v8 = vsel %vm577_vm4, %v578_v54, %v576_v53  ;;  %v1122_v1 = vsub.f32 %v2071_v30, %v1115_v63 }
 0x29a   :  { %v1118_v0 = vpop.f32.mrb[22].mxu0  ;;  %v2429_v2 = vsel %vm455_vm1, %v835_v23, %v2403_v57  ;;  %v771_v3 = vsel %vm769_vm2, %v770_v9, %v768_v48  ;;  %v583_v26 = vsel %vm582_vm5, %v2357_v55, %v581_v12  ;;  %v587_v17 = vsel %vm234_vm0, %v579_v8, 0.0 }
 0x29b   :  { %v1673_v10 = vpop.f32.mrb[23].mxu0  ;;  %v773_v11 = vsel %vm234_vm0, %v771_v3, 0.0  ;;  %v586_v14 = vsel %vm584_vm6, %v585_v25, %v583_v26  ;;  %v1123_v21 = vsub.f32 %v2074_v31, %v1118_v0  ;;  %v1124_v28 = vmul.f32 %v1122_v1, %v1122_v1 }
 0x29c   :  { %653 = vrot.lane.b32.xlu0 %v2379_v36, %s1943_s18  ;;  %v2439_v27 = vadd.f32 %v773_v11, %v772_v50  ;;  %v1666_v16 = vpop.f32.mrb[16].mxu1  ;;  %v588_v5 = vsel %vm234_vm0, %v586_v14, 0.0  ;;  %v262_v30 = vrot.slane %v2373_v18, 2  ;;  %v948_v29 = vand.u32 2147483648, %v2381_v37 }
 0x29d   :  { %v2444_v24 = vpop.f32.mrb[17].mxu1  ;;  %v2446_v55 = vadd.f32 %v588_v5, %v587_v17  ;;  %v1788_v34 = vpop.eup %1787  ;;  %v1125_v35 = vmul.f32 %v1123_v21, %v1123_v21  ;;  %v1126_v31 = vadd.f32 1e-12, %v1124_v28  ;;  %v1021_v9 = vrot.slane %v1666_v16, 1 }
 0x29e   :  { %v1667_v60 = vpop.f32.mrb[18].mxu1  ;;  %v944_v15 = vmul.f32 %v1788_v34, %v2381_v37  ;;  %v263_v47 = vadd.f32 %v262_v30, %v2373_v18 }
 0x29f   :  { %v2451_v58 = vpop.f32.mrb[19].mxu1  ;;  %v1790_v19 = vpop.eup %1789  ;;  %v1127_v39 = vadd.f32 1e-12, %v1125_v35  ;;  %1791 = vrsqrt.f32 %v1126_v31  ;;  %vm1130_vm11 = vcmp.eq.f32.partialorder %v1126_v31, inf  ;;  %v1133_v13 = vand.u32 2147483648, %v1126_v31 }
 0x2a0   :  { %661 = vrot.lane.b32.xlu0 %v2379_v36, %s1944_s19  ;;  %v1020_v7 = vrot.slane %v2451_v58, 1  ;;  %v946_v42 = vsel %vm945_vm7, %v2381_v37, %v944_v15  ;;  %v951_v6 = vmul.f32 %v1790_v19, %v2391_v43  ;;  %v264_v54 = vrot.slane %v263_v47, 1 }
 0x2a1   :  { %v949_v44 = vsel %vm947_vm8, %v948_v29, %v946_v42  ;;  %1793 = vrsqrt.f32 %v1127_v39  ;;  %vm1132_vm13 = vcmp.eq.f32.partialorder %v1126_v31, 0.0  ;;  %vm1137_vm14 = vcmp.eq.f32.partialorder %v1127_v39, inf }
 0x2a2   :  { %v1022_v46 = vsel %vm455_vm1, %v1020_v7, %v1021_v9  ;;  %v953_v36 = vsel %vm952_vm9, %v2391_v43, %v951_v6  ;;  %v957_v49 = vsel %vm234_vm0, %v949_v44, 0.0  ;;  %v265_v23 = vadd.f32 %v264_v54, %v263_v47 }
 0x2a3   :  { %v956_v51 = vsel %vm954_vm10, %v955_v38, %v953_v36  ;;  %v1140_v25 = vand.u32 2147483648, %v1127_v39  ;;  %vm1139_vm15 = vcmp.eq.f32.partialorder %v1127_v39, 0.0 }
 0x2a4   :  { %840 = vrot.lane.b32.xlu0 %v2403_v57, %s1943_s18  ;;  %v1678_v37 = vpop.f32.mrb[20].mxu1  ;;  %v958_v59 = vsel %vm234_vm0, %v956_v51, 0.0  ;;  %1698 = vpush %v265_v23 }
 0x2a5   :  { %v2471_v56 = vpop.f32.mrb[21].mxu1  ;;  %v959_v63 = vadd.f32 %v958_v59, %v957_v49  ;;  %v1206_v43 = vrot.slane %v1678_v37, 1 }
 0x2a6   :  { %v1679_v62 = vpop.f32.mrb[22].mxu1 }
 0x2a7   :  { %v2474_v18 = vpop.f32.mrb[23].mxu1 }
 0x2a8   :  { %848 = vrot.lane.b32.xlu0 %v2403_v57, %s1944_s19  ;;  %v1205_v52 = vrot.slane %v2474_v18, 1 }
 0x2a9   :  { %v1792_v12 = vpop.eup %1791 }
 0x2aa   :  { %v1207_v53 = vsel %vm455_vm1, %v1205_v52, %v1206_v43  ;;  %v1129_v8 = vmul.f32 %v1792_v12, %v1126_v31 }
 0x2ab   :  { %v1794_v48 = vpop.eup %1793 }
 0x2ac   :  { %838 = vrot.lane.b32.xlu0 %v2429_v2, %s1943_s18  ;;  %v1690_v50 = vpop.f32.mrb[24].mxu1  ;;  %v1136_v57 = vmul.f32 %v1794_v48, %v1127_v39  ;;  %v1131_v26 = vsel %vm1130_vm11, %v1126_v31, %v1129_v8 }
 0x2ad   :  { %v2482_v0 = vpop.f32.mrb[25].mxu1  ;;  %v1134_v11 = vsel %vm1132_vm13, %v1133_v13, %v1131_v26  ;;  %v1391_v1 = vrot.slane %v1690_v50, 1 }
 0x2ae   :  { %v1691_v3 = vpop.f32.mrb[26].mxu1  ;;  %v1138_v14 = vsel %vm1137_vm14, %v1127_v39, %v1136_v57  ;;  %v1142_v5 = vsel %vm234_vm0, %v1134_v11, 0.0 }
 0x2af   :  { %v2484_v10 = vpop.f32.mrb[27].mxu1  ;;  %v1141_v17 = vsel %vm1139_vm15, %v1140_v25, %v1138_v14 }
 0x2b0   :  { %v1390_v16 = vrot.slane %v2484_v10, 1  ;;  %v1143_v21 = vsel %vm234_vm0, %v1141_v17, 0.0 }
 0x2b1   :  { %v1144_v34 = vadd.f32 %v1143_v21, %v1142_v5 }
 0x2b2   :  { %v1392_v28 = vsel %vm455_vm1, %v1390_v16, %v1391_v1  ;;  %v1300_v16 = vpop.f32.mrb[24].mxu0 }
 0x2b3   :  { %v1307_v5 = vsub.f32 %v2076_v32, %v1300_v16 }
 0x2b8   :  { %481 = vadd.xlane.f32.xlu1 %v2395_v45 }
 0x2c9   :  { %846 = vrot.lane.b32.xlu1 %v2429_v2, %s1944_s19 }
 0x2cb   :  { %775 = vadd.xlane.f32.xlu0 %v2439_v27 }
 0x2d5   :  { %s1699_s6 = spop %1698 }
 0x2d6   :  { %1526 = sst [smem:[#allocation11]] %s1699_s6 }
 0x2e1   :  { %1033 = vrot.lane.b32.xlu0 %v1021_v9, %s1944_s19 }
 0x2e5   :  { %1023 = vrot.lane.b32.xlu0 %v1022_v46, %s1943_s18 }
 0x2e9   :  { %1031 = vrot.lane.b32.xlu0 %v1022_v46, %s1944_s19 }
 0x2ed   :  { %590 = vadd.xlane.f32.xlu1 %v2446_v55 }
 0x2fe   :  { %1025 = vrot.lane.b32.xlu1 %v1021_v9, %s1943_s18 }
 0x301   :  { %v656_v45 = vpop.permute.xlu0 %655 }
 0x302   :  { %1218 = vrot.lane.b32.xlu1 %v1206_v43, %s1944_s19  ;;  %v660_v27 = vsub.f32 %v2366_v20, %v656_v45  ;;  %v498_v49 = vpop.permute.xlu1 %497 }
 0x303   :  { %v502_v51 = vsel %vm478_vm12, %v498_v49, 0.0 }
 0x304   :  { %v670_v60 = vand.u32 2147483647, %v660_v27 }
 0x306   :  { %1216 = vrot.lane.b32.xlu1 %v1207_v53, %s1944_s19  ;;  %v672_v31 = vsel %vm478_vm12, %v670_v60, 0.0  ;;  %v664_v59 = vpop.permute.xlu1 %663 }
 0x307   :  { %v668_v62 = vadd.f32 %v664_v59, %v2366_v20 }
 0x308   :  { %960 = vadd.xlane.f32.xlu0 %v959_v63 }
 0x309   :  { %v685_v52 = vand.u32 2147483647, %v668_v62 }
 0x30a   :  { %1403 = vrot.lane.b32.xlu1 %v1391_v1, %s1944_s19  ;;  %v496_v2 = vpop.permute.xlu0 %495 }
 0x30b   :  { %v501_v37 = vsel %vm234_vm0, %v496_v2, 0.0 }
 0x30c   :  { %v503_v54 = vadd.f32 %v502_v51, %v501_v37 }
 0x30e   :  { %1401 = vrot.lane.b32.xlu1 %v1392_v28, %s1944_s19  ;;  %v654_v30 = vpop.permute.xlu0 %653 }
 0x30f   :  { %v659_v29 = vsub.f32 %v2362_v4, %v654_v30 }
 0x311   :  { %v669_v55 = vand.u32 2147483647, %v659_v29 }
 0x312   :  { %v662_v35 = vpop.permute.xlu0 %661 }
 0x313   :  { %v671_v15 = vsel %vm234_vm0, %v669_v55, 0.0 }
 0x314   :  { %v673_v19 = vadd.f32 %v672_v31, %v671_v15 }
 0x316   :  { %v841_v9 = vpop.permute.xlu0 %840 }
 0x317   :  { %v845_v38 = vsub.f32 %v2405_v22, %v841_v9 }
 0x319   :  { %v855_v42 = vand.u32 2147483647, %v845_v38 }
 0x31a   :  { %v849_v7 = vpop.permute.xlu0 %848 }
 0x31b   :  { %v857_v47 = vsel %vm478_vm12, %v855_v42, 0.0  ;;  %v853_v50 = vadd.f32 %v849_v7, %v2405_v22 }
 0x31d   :  { %v870_v57 = vand.u32 2147483647, %v853_v50 }
 0x31e   :  { %1208 = vrot.lane.b32.xlu0 %v1207_v53, %s1943_s18  ;;  %v839_v39 = vpop.permute.xlu0 %838  ;;  %v667_v53 = vadd.f32 %v662_v35, %v2362_v4 }
 0x31f   :  { %v844_v6 = vsub.f32 %v2393_v61, %v839_v39 }
 0x320   :  { %v684_v48 = vand.u32 2147483647, %v667_v53 }
 0x321   :  { %v854_v46 = vand.u32 2147483647, %v844_v6 }
 0x322   :  { %1210 = vrot.lane.b32.xlu0 %v1206_v43, %s1943_s18 }
 0x323   :  { %v856_v44 = vsel %vm234_vm0, %v854_v46, 0.0 }
 0x324   :  { %v858_v36 = vadd.f32 %v857_v47, %v856_v44 }
 0x332   :  { %1145 = vadd.xlane.f32.xlu1 %v1144_v34  ;;  %v1309_v34 = vmul.f32 %v1307_v5, %v1307_v5 }
 0x334   :  { %v1311_v35 = vadd.f32 1e-12, %v1309_v34 }
 0x336   :  { %1795 = vrsqrt.f32 %v1311_v35  ;;  %vm1315_vm1 = vcmp.eq.f32.partialorder %v1311_v35, inf  ;;  %v1318_v47 = vand.u32 2147483648, %v1311_v35  ;;  %vm1317_vm3 = vcmp.eq.f32.partialorder %v1311_v35, 0.0 }
 0x340   :  { %v1796_v39 = vpop.eup %1795 }
 0x341   :  { %504 = vadd.xlane.f32.xlu0 %v503_v54  ;;  %v1314_v44 = vmul.f32 %v1796_v39, %v1311_v35 }
 0x343   :  { %1395 = vrot.lane.b32.xlu1 %v1391_v1, %s1943_s18 }
 0x345   :  { %v482_v63 = vpop.xlane.xlu1 %481  ;;  %674 = vadd.xlane.f32.xlu0 %v673_v19 }
 0x346   :  { %v483_v23 = vrot.slane %v482_v63, 4 }
 0x347   :  { %1393 = vrot.lane.b32.xlu1 %v1392_v28, %s1943_s18 }
 0x348   :  { %v484_v43 = vadd.f32 %v483_v23, %v482_v63 }
 0x349   :  { %859 = vadd.xlane.f32.xlu0 %v858_v36  ;;  %v847_v8 = vpop.permute.xlu1 %846  ;;  %v1316_v36 = vsel %vm1315_vm1, %v1311_v35, %v1314_v44 }
 0x34a   :  { %v485_v12 = vrot.slane %v484_v43, 2  ;;  %v852_v3 = vadd.f32 %v847_v8, %v2393_v61  ;;  %v1684_v61 = vpop.f32.mrb[25].mxu0  ;;  %v1319_v54 = vsel %vm1317_vm3, %v1318_v47, %v1316_v36 }
 0x34b   :  { %690 = vrot.lane.b32.xlu1 %v685_v52, %s1943_s18  ;;  %v1303_v28 = vpop.f32.mrb[26].mxu0  ;;  %v1327_v63 = vsel %vm234_vm0, %v1319_v54, 0.0 }
 0x34c   :  { %v486_v13 = vadd.f32 %v485_v12, %v484_v43  ;;  %v869_v4 = vand.u32 2147483647, %v852_v3  ;;  %v1308_v45 = vsub.f32 %v2078_v33, %v1303_v28  ;;  %v1685_v2 = vpop.f32.mrb[27].mxu0 }
 0x34d   :  { %v1485_v30 = vpop.f32.mrb[28].mxu0 }
 0x34e   :  { %v487_v25 = vrot.slane %v486_v13, 1  ;;  %v1310_v60 = vmul.f32 %v1308_v45, %v1308_v45  ;;  %v1696_v29 = vpop.f32.mrb[29].mxu0  ;;  %v1492_v15 = vsub.f32 %v2085_v40, %v1485_v30 }
 0x34f   :  { %688 = vrot.lane.b32.xlu1 %v684_v48, %s1943_s18  ;;  %v1488_v55 = vpop.f32.mrb[30].mxu0 }
 0x350   :  { %v488_v20 = vadd.f32 %v487_v25, %v486_v13  ;;  %v1697_v31 = vpop.f32.mrb[31].mxu0  ;;  %v1312_v32 = vadd.f32 1e-12, %v1310_v60  ;;  %v1493_v19 = vsub.f32 %v2087_v41, %v1488_v55  ;;  %v1494_v9 = vmul.f32 %v1492_v15, %v1492_v15 }
 0x352   :  { %1700 = vpush %v488_v20  ;;  %1797 = vrsqrt.f32 %v1312_v32  ;;  %v1495_v7 = vmul.f32 %v1493_v19, %v1493_v19  ;;  %v1496_v33 = vadd.f32 1e-12, %v1494_v9  ;;  %vm1322_vm2 = vcmp.eq.f32.partialorder %v1312_v32, inf }
 0x353   :  { %875 = vrot.lane.b32.xlu1 %v870_v57, %s1943_s18  ;;  %vm1324_vm4 = vcmp.eq.f32.partialorder %v1312_v32, 0.0  ;;  %v1325_v59 = vand.u32 2147483648, %v1312_v32 }
 0x354   :  { %v1497_v38 = vadd.f32 1e-12, %v1495_v7  ;;  %1799 = vrsqrt.f32 %v1496_v33  ;;  %vm1500_vm5 = vcmp.eq.f32.partialorder %v1496_v33, inf  ;;  %v1503_v25 = vand.u32 2147483648, %v1496_v33 }
 0x355   :  { %vm1502_vm6 = vcmp.eq.f32.partialorder %v1496_v33, 0.0 }
 0x356   :  { %1801 = vrsqrt.f32 %v1497_v38  ;;  %vm1507_vm7 = vcmp.eq.f32.partialorder %v1497_v38, inf  ;;  %vm1509_vm8 = vcmp.eq.f32.partialorder %v1497_v38, 0.0 }
 0x357   :  { %873 = vrot.lane.b32.xlu1 %v869_v4, %s1943_s18 }
 0x358   :  { %v2525_v26 = vpop.xlane.xlu0 %775 }
 0x35c   :  { %v1034_v11 = vpop.permute.xlu0 %1033  ;;  %v1798_v42 = vpop.eup %1797 }
 0x35d   :  { %v1038_v14 = vadd.f32 %v1034_v11, %v2451_v58  ;;  %v1321_v40 = vmul.f32 %v1798_v42, %v1312_v32 }
 0x35e   :  { %v1800_v62 = vpop.eup %1799 }
 0x35f   :  { %v1055_v22 = vand.u32 2147483647, %v1038_v14  ;;  %v1323_v49 = vsel %vm1322_vm2, %v1312_v32, %v1321_v40  ;;  %v1499_v8 = vmul.f32 %v1800_v62, %v1496_v33  ;;  %v1510_v14 = vand.u32 2147483648, %v1497_v38 }
 0x360   :  { %v1024_v1 = vpop.permute.xlu0 %1023  ;;  %v1802_v23 = vpop.eup %1801  ;;  %v1326_v43 = vsel %vm1324_vm4, %v1325_v59, %v1323_v49 }
 0x361   :  { %1060 = vrot.lane.b32.xlu1 %v1055_v22, %s1943_s18  ;;  %v1029_v46 = vsub.f32 %v2444_v24, %v1024_v1  ;;  %v1328_v53 = vsel %vm234_vm0, %v1326_v43, 0.0  ;;  %v1501_v57 = vsel %vm1500_vm5, %v1496_v33, %v1499_v8 }
 0x362   :  { %v2543_v48 = vadd.f32 %v1328_v53, %v1327_v63  ;;  %v1504_v4 = vsel %vm1502_vm6, %v1503_v25, %v1501_v57 }
 0x363   :  { %v1039_v37 = vand.u32 2147483647, %v1029_v46  ;;  %v1512_v22 = vsel %vm234_vm0, %v1504_v4, 0.0 }
 0x364   :  { %v1032_v17 = vpop.permute.xlu0 %1031 }
 0x365   :  { %v1037_v21 = vadd.f32 %v1032_v17, %v2444_v24  ;;  %v1041_v12 = vsel %vm234_vm0, %v1039_v37, 0.0 }
 0x367   :  { %v1054_v27 = vand.u32 2147483647, %v1037_v21 }
 0x369   :  { %1058 = vrot.lane.b32.xlu1 %v1054_v27, %s1943_s18 }
 0x37a   :  { %v2535_v6 = vpop.xlane.xlu1 %590 }
 0x37e   :  { %v1026_v41 = vpop.permute.xlu1 %1025 }
 0x37f   :  { %v1030_v51 = vsub.f32 %v2451_v58, %v1026_v41  ;;  %v1506_v58 = vmul.f32 %v1802_v23, %v1497_v38 }
 0x381   :  { %v1040_v24 = vand.u32 2147483647, %v1030_v51  ;;  %v1508_v11 = vsel %vm1507_vm7, %v1497_v38, %v1506_v58 }
 0x382   :  { %v1219_v52 = vpop.permute.xlu1 %1218  ;;  %v1511_v16 = vsel %vm1509_vm8, %v1510_v14, %v1508_v11 }
 0x383   :  { %v1042_v13 = vsel %vm478_vm12, %v1040_v24, 0.0  ;;  %v1513_v5 = vsel %vm234_vm0, %v1511_v16, 0.0  ;;  %v1223_v30 = vadd.f32 %v1219_v52, %v2474_v18  ;;  %s1701_s3 = spop %1700 }
 0x384   :  { %v1043_v50 = vadd.f32 %v1042_v13, %v1041_v12  ;;  %v2549_v61 = vadd.f32 %v1513_v5, %v1512_v22 }
 0x385   :  { %v1240_v29 = vand.u32 2147483647, %v1223_v30 }
 0x386   :  { %v1217_v20 = vpop.permute.xlu1 %1216  ;;  %1044 = vadd.xlane.f32.xlu0 %v1043_v50 }
 0x387   :  { %v1222_v3 = vadd.f32 %v1217_v20, %v2471_v56 }
 0x389   :  { %v1239_v1 = vand.u32 2147483647, %v1222_v3 }
 0x38a   :  { %v1404_v17 = vpop.permute.xlu1 %1403 }
 0x38b   :  { %1243 = vrot.lane.b32.xlu1 %v1239_v1, %s1943_s18  ;;  %v1408_v34 = vadd.f32 %v1404_v17, %v2484_v10 }
 0x38d   :  { %v1425_v2 = vand.u32 2147483647, %v1408_v34 }
 0x38e   :  { %v1402_v21 = vpop.permute.xlu1 %1401 }
 0x38f   :  { %v1407_v28 = vadd.f32 %v1402_v21, %v2482_v0 }
 0x391   :  { %v1424_v45 = vand.u32 2147483647, %v1407_v28 }
 0x393   :  { %1428 = vrot.lane.b32.xlu1 %v1424_v45, %s1943_s18 }
 0x395   :  { %v2554_v27 = vpop.xlane.xlu0 %960 }
 0x397   :  { %1430 = vrot.lane.b32.xlu1 %v1425_v2, %s1943_s18 }
 0x399   :  { %v1209_v60 = vpop.permute.xlu0 %1208 }
 0x39a   :  { %v1214_v55 = vsub.f32 %v2471_v56, %v1209_v60  ;;  %v592_v56 = vrot.slane %v2535_v6, 4 }
 0x39c   :  { %1245 = vrot.lane.b32.xlu0 %v1240_v29, %s1943_s18  ;;  %v1224_v15 = vand.u32 2147483647, %v1214_v55 }
 0x39d   :  { %v1211_v35 = vpop.permute.xlu0 %1210 }
 0x39e   :  { %v1215_v31 = vsub.f32 %v2474_v18, %v1211_v35  ;;  %v1226_v19 = vsel %vm234_vm0, %v1224_v15, 0.0  ;;  %v593_v18 = vadd.f32 %v592_v56, %v2535_v6 }
 0x3a0   :  { %v1225_v32 = vand.u32 2147483647, %v1215_v31  ;;  %v594_v37 = vrot.slane %v593_v18, 2 }
 0x3a2   :  { %v1227_v9 = vsel %vm478_vm12, %v1225_v32, 0.0  ;;  %v595_v24 = vadd.f32 %v594_v37, %v593_v18 }
 0x3a3   :  { %v1228_v7 = vadd.f32 %v1227_v9, %v1226_v19 }
 0x3a4   :  { %v596_v13 = vrot.slane %v595_v24, 1 }
 0x3a6   :  { %v597_v11 = vadd.f32 %v596_v13, %v595_v24 }
 0x3bb   :  { %1229 = vadd.xlane.f32.xlu0 %v1228_v7 }
 0x3bf   :  { %v2563_v33 = vpop.xlane.xlu1 %1145 }
 0x3c3   :  { %v1396_v38 = vpop.permute.xlu1 %1395 }
 0x3c4   :  { %v1400_v39 = vsub.f32 %v2484_v10, %v1396_v38  ;;  %v962_v38 = vrot.slane %v2554_v27, 4 }
 0x3c6   :  { %v1410_v46 = vand.u32 2147483647, %v1400_v39  ;;  %v963_v18 = vadd.f32 %v962_v38, %v2554_v27 }
 0x3c7   :  { %v1394_v42 = vpop.permute.xlu1 %1393 }
 0x3c8   :  { %v1399_v44 = vsub.f32 %v2482_v0, %v1394_v42  ;;  %v1412_v36 = vsel %vm478_vm12, %v1410_v46, 0.0 }
 0x3ca   :  { %v1409_v40 = vand.u32 2147483647, %v1399_v44 }
 0x3cb   :  { %v691_v47 = vpop.permute.xlu1 %690 }
 0x3cc   :  { %v1411_v41 = vsel %vm234_vm0, %v1409_v40, 0.0  ;;  %v695_v10 = vsel %vm478_vm12, %v691_v47, 0.0 }
 0x3cd   :  { %v1413_v49 = vadd.f32 %v1412_v36, %v1411_v41 }
 0x3ce   :  { %v505_v51 = vpop.xlane.xlu0 %504 }
 0x3cf   :  { %v506_v54 = vrot.slane %v505_v51, 4  ;;  %v689_v59 = vpop.permute.xlu1 %688 }
 0x3d0   :  { %v694_v62 = vsel %vm234_vm0, %v689_v59, 0.0 }
 0x3d1   :  { %v507_v63 = vadd.f32 %v506_v54, %v505_v51  ;;  %v696_v23 = vadd.f32 %v695_v10, %v694_v62  ;;  %v964_v51 = vrot.slane %v963_v18, 2 }
 0x3d2   :  { %v675_v0 = vpop.xlane.xlu0 %674 }
 0x3d3   :  { %v508_v6 = vrot.slane %v507_v63, 2  ;;  %v676_v43 = vrot.slane %v675_v0, 4  ;;  %v876_v52 = vpop.permute.xlu1 %875  ;;  %697 = vadd.xlane.f32.xlu1 %v696_v23 }
 0x3d4   :  { %v880_v25 = vsel %vm478_vm12, %v876_v52, 0.0  ;;  %v965_v52 = vadd.f32 %v964_v51, %v963_v18 }
 0x3d5   :  { %v677_v53 = vadd.f32 %v676_v43, %v675_v0  ;;  %v509_v12 = vadd.f32 %v508_v6, %v507_v63 }
 0x3d6   :  { %v860_v34 = vpop.xlane.xlu0 %859 }
 0x3d7   :  { %v678_v50 = vrot.slane %v677_v53, 2  ;;  %v874_v8 = vpop.permute.xlu1 %873  ;;  %v510_v58 = vrot.slane %v509_v12, 1 }
 0x3d8   :  { %v879_v20 = vsel %vm234_vm0, %v874_v8, 0.0 }
 0x3d9   :  { %v881_v57 = vadd.f32 %v880_v25, %v879_v20  ;;  %v511_v3 = vadd.f32 %v510_v58, %v509_v12  ;;  %v679_v4 = vadd.f32 %v678_v50, %v677_v53  ;;  %v966_v20 = vrot.slane %v965_v52, 1 }
 0x3db   :  { %v1061_v14 = vpop.permute.xlu1 %1060  ;;  %882 = vadd.xlane.f32.xlu1 %v881_v57  ;;  %1702 = vpush %v511_v3  ;;  %v680_v22 = vrot.slane %v679_v4, 1 }
 0x3dc   :  { %1704 = vpush %v597_v11  ;;  %v1065_v17 = vsel %vm478_vm12, %v1061_v14, 0.0 }
 0x3dd   :  { %v681_v1 = vadd.f32 %v680_v22, %v679_v4 }
 0x3df   :  { %1414 = vadd.xlane.f32.xlu1 %v1413_v49  ;;  %v1059_v16 = vpop.permute.xlu1 %1058  ;;  %1706 = vpush %v681_v1 }
 0x3e0   :  { %v1064_v5 = vsel %vm234_vm0, %v1059_v16, 0.0 }
 0x3e1   :  { %v1066_v21 = vadd.f32 %v1065_v17, %v1064_v5 }
 0x3e3   :  { %1067 = vadd.xlane.f32.xlu0 %v1066_v21 }
 0x3e7   :  { %1330 = vadd.xlane.f32.xlu0 %v2543_v48  ;;  %v777_v48 = vrot.slane %v2525_v26, 4 }
 0x3e9   :  { %v778_v19 = vadd.f32 %v777_v48, %v2525_v26  ;;  %v1147_v26 = vrot.slane %v2563_v33, 4 }
 0x3eb   :  { %1515 = vadd.xlane.f32.xlu0 %v2549_v61  ;;  %v861_v61 = vrot.slane %v860_v34, 4  ;;  %v779_v7 = vrot.slane %v778_v19, 2  ;;  %v1148_v27 = vadd.f32 %v1147_v26, %v2563_v33  ;;  %v967_v33 = vadd.f32 %v966_v20, %v965_v52 }
 0x3ed   :  { %v862_v9 = vadd.f32 %v861_v61, %v860_v34  ;;  %v780_v40 = vadd.f32 %v779_v7, %v778_v19  ;;  %v1149_v58 = vrot.slane %v1148_v27, 2 }
 0x3ef   :  { %v863_v39 = vrot.slane %v862_v9, 2  ;;  %v781_v59 = vrot.slane %v780_v40, 1  ;;  %v1150_v1 = vadd.f32 %v1149_v58, %v1148_v27 }
 0x3f1   :  { %v864_v47 = vadd.f32 %v863_v39, %v862_v9  ;;  %v782_v43 = vadd.f32 %v781_v59, %v780_v40 }
 0x3f3   :  { %v865_v10 = vrot.slane %v864_v47, 1 }
 0x3f5   :  { %v866_v13 = vadd.f32 %v865_v10, %v864_v47 }
 0x3fd   :  { %v1244_v28 = vpop.permute.xlu1 %1243 }
 0x3fe   :  { %v1249_v29 = vsel %vm234_vm0, %v1244_v28, 0.0  ;;  %v1151_v28 = vrot.slane %v1150_v1, 1 }
 0x405   :  { %v1429_v45 = vpop.permute.xlu1 %1428 }
 0x406   :  { %v1434_v31 = vsel %vm234_vm0, %v1429_v45, 0.0 }
 0x409   :  { %v1431_v30 = vpop.permute.xlu1 %1430 }
 0x40a   :  { %v1435_v15 = vsel %vm478_vm12, %v1431_v30, 0.0  ;;  %v1152_v30 = vadd.f32 %v1151_v28, %v1150_v1 }
 0x40b   :  { %v1436_v32 = vadd.f32 %v1435_v15, %v1434_v31 }
 0x40c   :  { %s1703_s7 = spop %1702 }
 0x40d   :  { %s1705_s8 = spop %1704  ;;  %s513_s11 = sadd.f32 %s1703_s7, %s1701_s3 }
 0x410   :  { %s1707_s9 = spop %1706 }
 0x411   :  { %s683_s13 = sadd.f32 %s1707_s9, %s513_s11 }
 0x413   :  { %v1045_v2 = vpop.xlane.xlu0 %1044 }
 0x414   :  { %v1046_v42 = vrot.slane %v1045_v2, 4 }
 0x416   :  { %v1047_v41 = vadd.f32 %v1046_v42, %v1045_v2 }
 0x417   :  { %v1246_v60 = vpop.permute.xlu0 %1245 }
 0x418   :  { %v1250_v55 = vsel %vm478_vm12, %v1246_v60, 0.0  ;;  %v1048_v62 = vrot.slane %v1047_v41, 2 }
 0x419   :  { %v1251_v35 = vadd.f32 %v1250_v55, %v1249_v29 }
 0x41a   :  { %v1049_v50 = vadd.f32 %v1048_v62, %v1047_v41 }
 0x41b   :  { %1252 = vadd.xlane.f32.xlu1 %v1251_v35 }
 0x41c   :  { %v1050_v11 = vrot.slane %v1049_v50, 1 }
 0x41e   :  { %v1051_v17 = vadd.f32 %v1050_v11, %v1049_v50 }
 0x41f   :  { %1437 = vadd.xlane.f32.xlu1 %v1436_v32 }
 0x448   :  { %v1230_v49 = vpop.xlane.xlu0 %1229 }
 0x449   :  { %v1231_v63 = vrot.slane %v1230_v49, 4 }
 0x44b   :  { %v1232_v53 = vadd.f32 %v1231_v63, %v1230_v49 }
 0x44d   :  { %v1233_v57 = vrot.slane %v1232_v53, 2 }
 0x44f   :  { %v1234_v5 = vadd.f32 %v1233_v57, %v1232_v53 }
 0x451   :  { %v1235_v45 = vrot.slane %v1234_v5, 1 }
 0x453   :  { %v1236_v60 = vadd.f32 %v1235_v45, %v1234_v5 }
 0x460   :  { %v698_v56 = vpop.xlane.xlu1 %697 }
 0x461   :  { %v699_v46 = vrot.slane %v698_v56, 4 }
 0x463   :  { %v700_v44 = vadd.f32 %v699_v46, %v698_v56 }
 0x465   :  { %v701_v36 = vrot.slane %v700_v44, 2 }
 0x467   :  { %v702_v37 = vadd.f32 %v701_v36, %v700_v44 }
 0x468   :  { %v883_v54 = vpop.xlane.xlu1 %882 }
 0x469   :  { %v884_v23 = vrot.slane %v883_v54, 4  ;;  %v703_v0 = vrot.slane %v702_v37, 1 }
 0x46b   :  { %v885_v24 = vadd.f32 %v884_v23, %v883_v54  ;;  %v704_v6 = vadd.f32 %v703_v0, %v702_v37 }
 0x46c   :  { %v1415_v55 = vpop.xlane.xlu1 %1414 }
 0x46d   :  { %v886_v12 = vrot.slane %v885_v24, 2  ;;  %1708 = vpush %v704_v6  ;;  %v1416_v15 = vrot.slane %v1415_v55, 4 }
 0x46e   :  { %1710 = vpush %v782_v43 }
 0x46f   :  { %1712 = vpush %v866_v13  ;;  %v887_v8 = vadd.f32 %v886_v12, %v885_v24  ;;  %v1417_v61 = vadd.f32 %v1416_v15, %v1415_v55 }
 0x470   :  { %v1068_v25 = vpop.xlane.xlu0 %1067 }
 0x471   :  { %v1069_v3 = vrot.slane %v1068_v25, 4  ;;  %v888_v4 = vrot.slane %v887_v8, 1  ;;  %v1418_v38 = vrot.slane %v1417_v61, 2 }
 0x473   :  { %v1070_v14 = vadd.f32 %v1069_v3, %v1068_v25  ;;  %v889_v22 = vadd.f32 %v888_v4, %v887_v8  ;;  %v1419_v47 = vadd.f32 %v1418_v38, %v1417_v61 }
 0x474   :  { %v1331_v29 = vpop.xlane.xlu0 %1330 }
 0x475   :  { %v1071_v16 = vrot.slane %v1070_v14, 2  ;;  %1714 = vpush %v889_v22  ;;  %v1332_v35 = vrot.slane %v1331_v29, 4  ;;  %v1420_v54 = vrot.slane %v1419_v47, 1 }
 0x476   :  { %1716 = vpush %v967_v33 }
 0x477   :  { %1718 = vpush %v1051_v17  ;;  %v1072_v21 = vadd.f32 %v1071_v16, %v1070_v14  ;;  %v1333_v32 = vadd.f32 %v1332_v35, %v1331_v29  ;;  %v1421_v23 = vadd.f32 %v1420_v54, %v1419_v47 }
 0x478   :  { %v1516_v31 = vpop.xlane.xlu0 %1515 }
 0x479   :  { %v1073_v34 = vrot.slane %v1072_v21, 1  ;;  %v1517_v48 = vrot.slane %v1516_v31, 4  ;;  %v1334_v19 = vrot.slane %v1333_v32, 2 }
 0x47b   :  { %v1074_v2 = vadd.f32 %v1073_v34, %v1072_v21  ;;  %v1518_v9 = vadd.f32 %v1517_v48, %v1516_v31  ;;  %v1335_v44 = vadd.f32 %v1334_v19, %v1333_v32 }
 0x47d   :  { %1720 = vpush %v1074_v2  ;;  %v1519_v42 = vrot.slane %v1518_v9, 2  ;;  %v1336_v37 = vrot.slane %v1335_v44, 1 }
 0x47e   :  { %1722 = vpush %v1152_v30 }
 0x47f   :  { %1724 = vpush %v1236_v60  ;;  %v1520_v49 = vadd.f32 %v1519_v42, %v1518_v9  ;;  %v1337_v62 = vadd.f32 %v1336_v37, %v1335_v44 }
 0x481   :  { %v1521_v63 = vrot.slane %v1520_v49, 1 }
 0x483   :  { %v1522_v6 = vadd.f32 %v1521_v63, %v1520_v49 }
 0x49e   :  { %s1709_s12 = spop %1708 }
 0x49f   :  { %s706_s14 = sadd.f32 %s1709_s12, %s683_s13  ;;  %s1711_s15 = spop %1710 }
 0x4a0   :  { %s1713_s16 = spop %1712  ;;  %s784_s23 = sadd.f32 %s1711_s15, %s1705_s8 }
 0x4a1   :  { %s868_s1 = sadd.f32 %s1713_s16, %s706_s14  ;;  %s1913_s8 = scalar_lea.hbm %s2606_s5, 16 }
 0x4a2   :  { %p1914_p12 = scmp.ne.s32.totalorder %s2606_s5, %s1913_s8  ;;  %p1917_p13 = scmp.lt.u32.totalorder %s1913_s8, %s2606_s5 }
 0x4a4   :  { %p1919_p0 = pnand %p1917_p13, %p1914_p12 }
 0x4a6   :  { %s1715_s17 = spop %1714 }
 0x4a7   :  { %s891_s20 = sadd.f32 %s1715_s17, %s868_s1  ;;  %s1717_s0 = spop %1716 }
 0x4a8   :  { %v1253_v7 = vpop.xlane.xlu1 %1252  ;;  %s1719_s28 = spop %1718  ;;  %s969_s26 = sadd.f32 %s1717_s0, %s784_s23 }
 0x4a9   :  { %v1254_v39 = vrot.slane %v1253_v7, 4  ;;  %s1053_s10 = sadd.f32 %s1719_s28, %s891_s20 }
 0x4ab   :  { %v1255_v56 = vadd.f32 %v1254_v39, %v1253_v7 }
 0x4ac   :  { %v1438_v46 = vpop.xlane.xlu1 %1437 }
 0x4ad   :  { %v1256_v18 = vrot.slane %v1255_v56, 2  ;;  %v1439_v40 = vrot.slane %v1438_v46, 4 }
 0x4ae   :  { %s1721_s29 = spop %1720 }
 0x4af   :  { %v1440_v41 = vadd.f32 %v1439_v40, %v1438_v46  ;;  %v1257_v36 = vadd.f32 %v1256_v18, %v1255_v56  ;;  %s1076_s21 = sadd.f32 %s1721_s29, %s1053_s10  ;;  %s1723_s22 = spop %1722 }
 0x4b0   :  { %s1725_s24 = spop %1724  ;;  %s1154_s4 = sadd.f32 %s1723_s22, %s969_s26 }
 0x4b1   :  { %v1441_v51 = vrot.slane %v1440_v41, 2  ;;  %v1258_v26 = vrot.slane %v1257_v36, 1  ;;  %s1238_s25 = sadd.f32 %s1725_s24, %s1076_s21 }
 0x4b3   :  { %v1442_v59 = vadd.f32 %v1441_v51, %v1440_v41  ;;  %v1259_v10 = vadd.f32 %v1258_v26, %v1257_v36 }
 0x4b5   :  { %1726 = vpush %v1259_v10  ;;  %v1443_v0 = vrot.slane %v1442_v59, 1 }
 0x4b6   :  { %1728 = vpush %v1337_v62 }
 0x4b7   :  { %1730 = vpush %v1421_v23  ;;  %v1444_v24 = vadd.f32 %v1443_v0, %v1442_v59 }
 0x4b9   :  { %1732 = vpush %v1444_v24 }
 0x4ba   :  { %1734 = vpush %v1522_v6 }
 0x4e6   :  { %s1727_s27 = spop %1726 }
 0x4e7   :  { %s1261_s2 = sadd.f32 %s1727_s27, %s1238_s25  ;;  %s1729_s30 = spop %1728 }
 0x4e8   :  { %s1731_s18 = spop %1730  ;;  %s1339_s6 = sadd.f32 %s1729_s30, %s1154_s4 }
 0x4e9   :  { %s1423_s19 = sadd.f32 %s1731_s18, %s1261_s2 }
 0x4ea   :  { %s1733_s3 = spop %1732 }
 0x4eb   :  { %s1446_s7 = sadd.f32 %s1733_s3, %s1423_s19  ;;  %s1735_s9 = spop %1734 }
 0x4ec   :  { %s1524_s11 = sadd.f32 %s1735_s9, %s1339_s6 }
 0x4ed   :  { %1528 = sst [smem:[#allocation11 + $0x1]] %s1446_s7 }
 0x4ee   :  { %1530 = sst [smem:[#allocation11 + $0x2]] %s1524_s11 }
 0x4ef   :  { %1922 = shalt.err (!%p1919_p0)
}
 0x4f0   :  { %s1945_s1 = smov [#allocation11]  }
 0x4f1   :  { %1538 = dma.smem_to_hbm %s1945_s1, 16, %s2606_s5, [#allocation4]  }
 0x4f2   :  { %1929 = dma.done.wait [#allocation4], 16  }
 0x4f3   :  { %1930 = vsyncadd [#allocation4], 4294967280 }
 0x4f4   :  { %1542 = sfence }
 0x4f5   :  { %1543 = vsyncpa [#allocation3], 1 }
 0x4f6   :  { %1544 = vsyncpa [#allocation6], 1 }
 0x4f7   :  { %1545 = vsyncpa [#allocation9], 1 }
 0x4f8   :  { %1546 = vsyncpa [#allocation4], 1 }

// kernel: tpu_custom_call.1
= control target key start
LH: loop header
LB: loop body
LE: loop exit
PB: predicated region body
PF: predicated region fallthrough
CT: control target
= control target key end

     0   :  { %10 = vsyncpa [#allocation3], 0  ;;  %s2601_s0 = inlined_call_operand.hbm [shape: f32[96,16], index: 0, kind: input, shape index: {}]   ;;  %s2602_s1 = inlined_call_operand.hbm [shape: f32[96,16], index: 1, kind: input, shape index: {}]   ;;  %s2603_s2 = inlined_call_operand.hbm [shape: bf16[18,16], index: 2, kind: input, shape index: {}]   ;;  %s2604_s3 = inlined_call_operand.hbm [shape: bf16[16,16], index: 3, kind: input, shape index: {}]   ;;  %s2605_s4 = inlined_call_operand.hbm [shape: bf16[16,48], index: 4, kind: input, shape index: {}]   ;;  %s2606_s5 = inlined_call_operand.hbm [shape: f32[1,3], index: 5, kind: output, shape index: {}]  }
   0x1   :  { %11 = vsyncpa [#allocation6], 0 }
   0x2   :  { %12 = vsyncpa [#allocation9], 0 }
   0x3   :  { %13 = vsyncpa [#allocation4], 0  ;;  %s1931_s18 = smov [#allocation5]   ;;  %s1803_s22 = scalar_lea.hbm %s2602_s1, 1536 }
   0x4   :  { %s31_s19 = sshll.u32 %s1931_s18, 4  ;;  %p1804_p0 = scmp.ne.s32.totalorder %s2602_s1, %s1803_s22  ;;  %s32_s19 = int_to_ptr.vmem [resolvable:$true] %s31_s19 }
   0x5   :  { %p1807_p1 = scmp.lt.u32.totalorder %s1803_s22, %s2602_s1 }
   0x7   :  { %p1809_p2 = pnand %p1807_p1, %p1804_p0 }
   0x9   :  { %1812 = shalt.err (!%p1809_p2)
}
   0xa   :  { %s1813_s27 = scalar_lea.vmem %s32_s19, 1536  ;;  %p1818_p4 = scmp.lt.s32.totalorder %s32_s19, %s32_s19 }
   0xb   :  { %p1814_p3 = scmp.ne.s32.totalorder %s32_s19, %s1813_s27  ;;  %p1819_p5 = scmp.lt.s32.totalorder %s1813_s27, %s1813_s27 }
   0xd   :  { %p1820_p6 = por %p1819_p5, %p1818_p4 }
   0xf   :  { %p1821_p7 = pnand %p1820_p6, %p1814_p3 }
  0x11   :  { %1824 = shalt.err (!%p1821_p7)
}
  0x12   :  { %s1932_s28 = smov 128   ;;  %s1933_s29 = smov 8  }
  0x13   :  { %37 = dma.hbm_to_vmem [thread:$0]  %s2602_s1, 1536, %s32_s19, [#allocation6], %s1932_s28, %s1932_s28, %s1933_s29  }
  0x14   :  { %s1934_s7 = smov [#allocation8]   ;;  %s1935_s9 = smov [#allocation2]  }
  0x15   :  { %s55_s8 = sshll.u32 %s1934_s7, 4  ;;  %s19_s10 = sshll.u32 %s1935_s9, 4  ;;  %s56_s8 = int_to_ptr.vmem [resolvable:$true] %s55_s8  ;;  %s20_s10 = int_to_ptr.vmem [resolvable:$true] %s19_s10 }
  0x16   :  { %s1825_s13 = scalar_lea.hbm %s2604_s3, 128 }
  0x17   :  { %p1826_p8 = scmp.ne.s32.totalorder %s2604_s3, %s1825_s13  ;;  %p1829_p9 = scmp.lt.u32.totalorder %s1825_s13, %s2604_s3 }
  0x19   :  { %p1831_p10 = pnand %p1829_p9, %p1826_p8 }
  0x1b   :  { %1834 = shalt.err (!%p1831_p10)
}
  0x1c   :  { %s1835_s1 = scalar_lea.vmem %s56_s8, 128  ;;  %p1840_p12 = scmp.lt.s32.totalorder %s56_s8, %s56_s8 }
  0x1d   :  { %p1836_p11 = scmp.ne.s32.totalorder %s56_s8, %s1835_s1  ;;  %p1841_p13 = scmp.lt.s32.totalorder %s1835_s1, %s1835_s1 }
  0x1f   :  { %p1842_p0 = por %p1841_p13, %p1840_p12 }
  0x21   :  { %p1843_p1 = pnand %p1842_p0, %p1836_p11 }
  0x23   :  { %1846 = shalt.err (!%p1843_p1)
}
  0x24   :  { %s1936_s18 = smov 64   ;;  %s1937_s19 = smov 4  }
  0x25   :  { %61 = dma.hbm_to_vmem [thread:$0]  %s2604_s3, 128, %s56_s8, [#allocation9], %s1936_s18, %s1936_s18, %s1937_s19  }
  0x26   :  { %s1847_s24 = scalar_lea.hbm %s2601_s0, 1536 }
  0x27   :  { %p1848_p2 = scmp.ne.s32.totalorder %s2601_s0, %s1847_s24  ;;  %p1851_p3 = scmp.lt.u32.totalorder %s1847_s24, %s2601_s0 }
  0x29   :  { %p1853_p4 = pnand %p1851_p3, %p1848_p2 }
  0x2b   :  { %1856 = shalt.err (!%p1853_p4)
}
  0x2c   :  { %s1857_s6 = scalar_lea.vmem %s20_s10, 1536  ;;  %p1862_p6 = scmp.lt.s32.totalorder %s20_s10, %s20_s10 }
  0x2d   :  { %p1858_p5 = scmp.ne.s32.totalorder %s20_s10, %s1857_s6  ;;  %p1863_p7 = scmp.lt.s32.totalorder %s1857_s6, %s1857_s6 }
  0x2f   :  { %p1864_p8 = por %p1863_p7, %p1862_p6 }
  0x31   :  { %p1865_p9 = pnand %p1864_p8, %p1858_p5 }
  0x33   :  { %1868 = shalt.err (!%p1865_p9)
}
  0x34   :  { %25 = dma.hbm_to_vmem [thread:$0]  %s2601_s0, 1536, %s20_s10, [#allocation3], %s1932_s28, %s1932_s28, %s1933_s29  }
  0x35   :  { %s1938_s8 = smov [#allocation7]   ;;  %s1939_s11 = smov [#allocation10]  }
  0x36   :  { %s43_s9 = sshll.u32 %s1938_s8, 4  ;;  %s67_s12 = sshll.u32 %s1939_s11, 4  ;;  %s44_s9 = int_to_ptr.vmem [resolvable:$true] %s43_s9  ;;  %s68_s12 = int_to_ptr.vmem [resolvable:$true] %s67_s12 }
  0x37   :  { %s1869_s15 = scalar_lea.hbm %s2603_s2, 192 }
  0x38   :  { %p1870_p10 = scmp.ne.s32.totalorder %s2603_s2, %s1869_s15  ;;  %p1873_p11 = scmp.lt.u32.totalorder %s1869_s15, %s2603_s2 }
  0x3a   :  { %p1875_p12 = pnand %p1873_p11, %p1870_p10 }
  0x3c   :  { %1878 = shalt.err (!%p1875_p12)
}
  0x3d   :  { %s1879_s0 = scalar_lea.vmem %s44_s9, 192  ;;  %p1884_p0 = scmp.lt.s32.totalorder %s44_s9, %s44_s9 }
  0x3e   :  { %p1880_p13 = scmp.ne.s32.totalorder %s44_s9, %s1879_s0  ;;  %p1885_p1 = scmp.lt.s32.totalorder %s1879_s0, %s1879_s0 }
  0x40   :  { %p1886_p2 = por %p1885_p1, %p1884_p0 }
  0x42   :  { %p1887_p3 = pnand %p1886_p2, %p1880_p13 }
  0x44   :  { %1890 = shalt.err (!%p1887_p3)
}
  0x45   :  { %49 = dma.hbm_to_vmem [thread:$0]  %s2603_s2, 192, %s44_s9, [#allocation6], %s1936_s18, %s1936_s18, %s1937_s19  }
  0x46   :  { %s1891_s22 = scalar_lea.hbm %s2605_s4, 128 }
  0x47   :  { %p1892_p4 = scmp.ne.s32.totalorder %s2605_s4, %s1891_s22  ;;  %p1895_p5 = scmp.lt.u32.totalorder %s1891_s22, %s2605_s4 }
  0x49   :  { %p1897_p6 = pnand %p1895_p5, %p1892_p4 }
  0x4b   :  { %1900 = shalt.err (!%p1897_p6)
}
  0x4c   :  { %s1901_s27 = scalar_lea.vmem %s68_s12, 128  ;;  %p1906_p8 = scmp.lt.s32.totalorder %s68_s12, %s68_s12 }
  0x4d   :  { %p1902_p7 = scmp.ne.s32.totalorder %s68_s12, %s1901_s27  ;;  %p1907_p9 = scmp.lt.s32.totalorder %s1901_s27, %s1901_s27 }
  0x4f   :  { %p1908_p10 = por %p1907_p9, %p1906_p8 }
  0x51   :  { %p1909_p11 = pnand %p1908_p10, %p1902_p7 }
  0x53   :  { %1912 = shalt.err (!%p1909_p11)
}
  0x54   :  { %73 = dma.hbm_to_vmem [thread:$0]  %s2605_s4, 128, %s68_s12, [#allocation9], %s1936_s18, %s1936_s18, %s1937_s19  }
  0x55   :  { %1923 = dma.done.wait [#allocation3], 1536  }
  0x56   :  { %1924 = vsyncadd [#allocation3], 4294965760 }
  0x57   :  { %1925 = dma.done.wait [#allocation6], 1728  }
  0x58   :  { %1926 = vsyncadd [#allocation6], 4294965568 }
  0x59   :  { %1927 = dma.done.wait [#allocation9], 256  }
  0x5a   :  { %1928 = vsyncadd [#allocation9], 4294967040  ;;  %v1751_v0 = vld [vmem:[#allocation10] sm:$0xff]   ;;  %v90_v1 = vld [vmem:[#allocation2] sm:$0xff]  ;;  %vm234_vm0 = vcmask 130048   ;;  %v1940_v44 = vmov 0.0  }
  0x5b   :  { %v91_v2 = vld [vmem:[#allocation2 + $0x8] sm:$0xff]  ;;  %v102_v3 = vld [vmem:[#allocation5] sm:$0xff]  ;;  %1612 = vmatprep.subr.bf16.mxu0 %v1751_v0  ;;  %v92_v6 = vld [vmem:[#allocation2 + $0x10] sm:$0xff]  ;;  %vm1941_vm1 = vmmov 0   ;;  %s1942_s4 = smov 96   ;;  %s1943_s18 = smov 112  }
  0x5c   :  { %v103_v4 = vld [vmem:[#allocation5 + $0x8] sm:$0xff]  ;;  %v2051_v5 = vsub.f32 %v90_v1, %v102_v3  ;;  %v93_v7 = vld [vmem:[#allocation2 + $0x18] sm:$0xff]  ;;  %1613 = vmatpush3.bf16.msra.mxu0 %v1751_v0  ;;  %v104_v9 = vld [vmem:[#allocation5 + $0x10] sm:$0xff]  ;;  %s1944_s19 = smov 16  }
  0x5d   :  { %v2053_v8 = vsub.f32 %v91_v2, %v103_v4  ;;  %v105_v10 = vld [vmem:[#allocation5 + $0x18] sm:$0xff]  ;;  %v94_v11 = vld [vmem:[#allocation2 + $0x20] sm:$0xff]  ;;  %v2055_v12 = vsub.f32 %v92_v6, %v104_v9  ;;  %v95_v14 = vld [vmem:[#allocation2 + $0x28] sm:$0xff]  ;;  %1644 = vmatprep.subr.bf16.mxu0 %v1940_v44 }
  0x5e   :  { %v2057_v13 = vsub.f32 %v93_v7, %v105_v10  ;;  %v106_v15 = vld [vmem:[#allocation5 + $0x20] sm:$0xff]  ;;  %v107_v16 = vld [vmem:[#allocation5 + $0x28] sm:$0xff]  ;;  %v96_v20 = vld [vmem:[#allocation2 + $0x30] sm:$0xff]  ;;  %v126_v45 = vmul.f32 %v2051_v5, %v2051_v5 }
  0x5f   :  { %v267_v17 = vpack.c.bf16 %v2053_v8, %v2051_v5  ;;  %v2061_v18 = vsub.f32 %v94_v11, %v106_v15  ;;  %v2063_v19 = vsub.f32 %v95_v14, %v107_v16  ;;  %v108_v21 = vld [vmem:[#allocation5 + $0x30] sm:$0xff]  ;;  %v97_v23 = vld [vmem:[#allocation2 + $0x38] sm:$0xff]  ;;  %v98_v25 = vld [vmem:[#allocation2 + $0x40] sm:$0xff]  ;;  %v127_v46 = vmul.f32 %v2053_v8, %v2053_v8 }
  0x60   :  { %v268_v22 = vpack.c.bf16 %v2057_v13, %v2055_v12  ;;  %v109_v24 = vld [vmem:[#allocation5 + $0x38] sm:$0xff]  ;;  %v99_v27 = vld [vmem:[#allocation2 + $0x48] sm:$0xff]  ;;  %v110_v28 = vld [vmem:[#allocation5 + $0x40] sm:$0xff]  ;;  %v2071_v30 = vsub.f32 %v96_v20, %v108_v21  ;;  %v128_v47 = vmul.f32 %v2055_v12, %v2055_v12  ;;  %v2106_v48 = vadd.f32 1e-12, %v126_v45 }
  0x61   :  { %1614 = vmatprep.mubr.msk.bf16.mxu0 %vm234_vm0, %v267_v17  ;;  %v269_v26 = vpack.c.bf16 %v2063_v19, %v2061_v18  ;;  %v111_v29 = vld [vmem:[#allocation5 + $0x48] sm:$0xff]  ;;  %v2074_v31 = vsub.f32 %v97_v23, %v109_v24  ;;  %v2076_v32 = vsub.f32 %v98_v25, %v110_v28  ;;  %v100_v35 = vld [vmem:[#allocation2 + $0x50] sm:$0xff]  ;;  %v101_v37 = vld [vmem:[#allocation2 + $0x58] sm:$0xff]  ;;  %v129_v49 = vmul.f32 %v2057_v13, %v2057_v13 }
  0x62   :  { %1615 = vmatmul.mubr.msk.bf16.vlgmr.msra.gmra.mrb[0].mxu0 %vm234_vm0, %v268_v22  ;;  %v2078_v33 = vsub.f32 %v99_v27, %v111_v29  ;;  %v112_v38 = vld [vmem:[#allocation5 + $0x50] sm:$0xff]  ;;  %v113_v39 = vld [vmem:[#allocation5 + $0x58] sm:$0xff]  ;;  %v2093_v43 = vld [vmem:[#allocation7] sm:$0xff]   ;;  %v2110_v50 = vadd.f32 1e-12, %v127_v46  ;;  %v130_v51 = vmul.f32 %v2061_v18, %v2061_v18  ;;  %1755 = vrsqrt.f32 %v2106_v48 }
  0x63   :  { %1618 = vmatprep.mubr.msk.bf16.mxu0 %vm234_vm0, %v269_v26  ;;  %v270_v34 = vpack.c.bf16 %v2074_v31, %v2071_v30  ;;  %v2085_v40 = vsub.f32 %v100_v35, %v112_v38  ;;  %v2087_v41 = vsub.f32 %v101_v37, %v113_v39  ;;  %1628 = vmatprep.mubr.msk.bf16.mxu1 %vm234_vm0, %v2093_v43  ;;  %v2114_v52 = vadd.f32 1e-12, %v128_v47  ;;  %v2130_v61 = vld [vmem:[#allocation7 + $0x8] ss:$0 sps:$4 sm:$0x11]  }
  0x64   :  { %v271_v36 = vpack.c.bf16 %v2078_v33, %v2076_v32  ;;  %v2117_v53 = vadd.f32 1e-12, %v129_v49  ;;  %1757 = vrsqrt.f32 %v2110_v50  ;;  %v2120_v55 = vadd.f32 1e-12, %v130_v51 }
  0x65   :  { %v272_v42 = vpack.c.bf16 %v2087_v41, %v2085_v40  ;;  %1759 = vrsqrt.f32 %v2114_v52  ;;  %v131_v1 = vmul.f32 %v2063_v19, %v2063_v19  ;;  %v132_v2 = vmul.f32 %v2071_v30, %v2071_v30 }
  0x66   :  { %1761 = vrsqrt.f32 %v2117_v53  ;;  %v133_v6 = vmul.f32 %v2074_v31, %v2074_v31  ;;  %v134_v7 = vmul.f32 %v2076_v32, %v2076_v32  ;;  %v135_v11 = vmul.f32 %v2078_v33, %v2078_v33 }
  0x67   :  { %1763 = vrsqrt.f32 %v2120_v55  ;;  %v136_v14 = vmul.f32 %v2085_v40, %v2085_v40  ;;  %v2155_v22 = vadd.f32 1e-12, %v131_v1  ;;  %v2157_v23 = vadd.f32 1e-12, %v132_v2 }
  0x68   :  { %vm152_vm2 = vcmp.eq.f32.partialorder %v2106_v48, inf  ;;  %v2162_v25 = vadd.f32 1e-12, %v133_v6  ;;  %v2164_v26 = vadd.f32 1e-12, %v134_v7  ;;  %vm159_vm3 = vcmp.eq.f32.partialorder %v2110_v50, inf }
  0x69   :  { %v2167_v27 = vadd.f32 1e-12, %v135_v11  ;;  %v137_v28 = vmul.f32 %v2087_v41, %v2087_v41  ;;  %v2171_v29 = vadd.f32 1e-12, %v136_v14  ;;  %vm154_vm4 = vcmp.eq.f32.partialorder %v2106_v48, 0.0 }
  0x6a   :  { %1619 = vmatmul.mubr.msk.bf16.gmra.mrb[4].mxu0 %vm234_vm0, %v270_v34  ;;  %vm166_vm5 = vcmp.eq.f32.partialorder %v2114_v52, inf  ;;  %vm173_vm6 = vcmp.eq.f32.partialorder %v2117_v53, inf  ;;  %vm161_vm7 = vcmp.eq.f32.partialorder %v2110_v50, 0.0  ;;  %v162_v47 = vand.u32 2147483648, %v2110_v50 }
  0x6b   :  { %1622 = vmatprep.mubr.msk.bf16.mxu0 %vm234_vm0, %v271_v36  ;;  %v155_v36 = vand.u32 2147483648, %v2106_v48  ;;  %vm180_vm8 = vcmp.eq.f32.partialorder %v2120_v55, inf  ;;  %1765 = vrsqrt.f32 %v2155_v22  ;;  %vm168_vm9 = vcmp.eq.f32.partialorder %v2114_v52, 0.0 }
  0x6c   :  { %v1756_v0 = vpop.eup %1755  ;;  %v169_v51 = vand.u32 2147483648, %v2114_v52  ;;  %1767 = vrsqrt.f32 %v2157_v23  ;;  %vm175_vm10 = vcmp.eq.f32.partialorder %v2117_v53, 0.0  ;;  %vm182_vm11 = vcmp.eq.f32.partialorder %v2120_v55, 0.0 }
  0x6d   :  { %v151_v17 = vmul.f32 %v1756_v0, %v2106_v48  ;;  %1769 = vrsqrt.f32 %v2162_v25  ;;  %vm187_vm12 = vcmp.eq.f32.partialorder %v2155_v22, inf  ;;  %vm189_vm13 = vcmp.eq.f32.partialorder %v2155_v22, 0.0 }
  0x6e   :  { %v1758_v4 = vpop.eup %1757  ;;  %1771 = vrsqrt.f32 %v2164_v26  ;;  %vm194_vm14 = vcmp.eq.f32.partialorder %v2157_v23, inf  ;;  %vm196_vm15 = vcmp.eq.f32.partialorder %v2157_v23, 0.0  ;;  %v204_v11 = vand.u32 2147483648, %v2162_v25 }
  0x6f   :  { %v1760_v16 = vpop.eup %1759  ;;  %v158_v21 = vmul.f32 %v1758_v4, %v2110_v50  ;;  %v153_v35 = vsel %vm152_vm2, %v2106_v48, %v151_v17  ;;  %1773 = vrsqrt.f32 %v2167_v27  ;;  %v197_v48 = vand.u32 2147483648, %v2157_v23 }
  0x70   :  { %v1762_v20 = vpop.eup %1761  ;;  %v165_v37 = vmul.f32 %v1760_v16, %v2114_v52  ;;  %1775 = vrsqrt.f32 %v2171_v29  ;;  %vm201_vm2 = vcmp.eq.f32.partialorder %v2162_v25, inf }
  0x71   :  { %v1764_v24 = vpop.eup %1763  ;;  %v172_v38 = vmul.f32 %v1762_v20, %v2117_v53  ;;  %v211_v20 = vand.u32 2147483648, %v2164_v26 }
  0x72   :  { %1623 = vmatmul.mubr.msk.bf16.gmra.mrb[8].mxu0 %vm234_vm0, %v272_v42  ;;  %v160_v42 = vsel %vm159_vm3, %v2110_v50, %v158_v21  ;;  %v179_v45 = vmul.f32 %v1764_v24, %v2120_v55  ;;  %vm203_vm3 = vcmp.eq.f32.partialorder %v2162_v25, 0.0 }
  0x73   :  { %1646 = vmatprep.mubr.msk.bf16.mxu0 %vm1941_vm1, %v1940_v44 }
 0x135   :  { %v1616_v54 = vpop.f32.mrb[0].mxu0 }
 0x136   :  { %v333_v56 = vpop.f32.mrb[1].mxu0 }
 0x137   :  { %v1617_v57 = vpop.f32.mrb[2].mxu0 }
 0x138   :  { %v2123_v58 = vpack.c.bf16 %v1617_v57, %v1616_v54  ;;  %v336_v59 = vpop.f32.mrb[3].mxu0  ;;  %v176_v54 = vand.u32 2147483648, %v2117_v53  ;;  %v174_v57 = vsel %vm173_vm6, %v2117_v53, %v172_v38  ;;  %vm215_vm6 = vcmp.eq.f32.partialorder %v2167_v27, inf }
 0x139   :  { %v380_v60 = vpack.c.bf16 %v336_v59, %v333_v56  ;;  %v167_v56 = vsel %vm166_vm5, %v2114_v52, %v165_v37  ;;  %v183_v59 = vand.u32 2147483648, %v2120_v55  ;;  %v163_v52 = vsel %vm161_vm7, %v162_v47, %v160_v42 }
 0x13a   :  { %708 = vrot.lane.b32.xlu1 %v2123_v58, %s1942_s4  ;;  %v170_v0 = vsel %vm168_vm9, %v169_v51, %v167_v56  ;;  %v177_v53 = vsel %vm175_vm10, %v176_v54, %v174_v57  ;;  %v236_v2 = vsel %vm234_vm0, %v163_v52, 0.0  ;;  %vm210_vm5 = vcmp.eq.f32.partialorder %v2164_v26, 0.0 }
 0x13b   :  { %520 = vrot.lane.b32.xlu0 %v380_v60, %s1942_s4  ;;  %1626 = vmatprep.subr.bf16.mxu1 %v380_v60  ;;  %v240_v14 = vsel %vm234_vm0, %v177_v53, 0.0  ;;  %vm217_vm7 = vcmp.eq.f32.partialorder %v2167_v27, 0.0  ;;  %vm224_vm9 = vcmp.eq.f32.partialorder %v2171_v29, 0.0 }
 0x13c   :  { %1627 = vmatpush3.bf16.msra.mxu1 %v380_v60  ;;  %v2196_v60 = vadd.f32 1e-12, %v137_v28  ;;  %v218_v28 = vand.u32 2147483648, %v2167_v27 }
 0x13d   :  { %v1620_v62 = vpop.f32.mrb[4].mxu0  ;;  %1632 = vmatprep.subr.bf16.mxu1 %v1940_v44 }
 0x13e   :  { %v349_v63 = vpop.f32.mrb[5].mxu0  ;;  %1777 = vrsqrt.f32 %v2196_v60  ;;  %vm229_vm10 = vcmp.eq.f32.partialorder %v2196_v60, inf }
 0x13f   :  { %1629 = vmatmul.mubr.msk.bf16.vlgmr.msra.gmra.mrb[0].mxu1 %vm234_vm0, %v2130_v61  ;;  %v1621_v3 = vpop.f32.mrb[6].mxu0 }
 0x140   :  { %v2143_v9 = vpack.c.bf16 %v1621_v3, %v1620_v62  ;;  %v352_v10 = vpop.f32.mrb[7].mxu0  ;;  %1634 = vmatprep.mubr.msk.bf16.mxu1 %vm1941_vm1, %v1940_v44  ;;  %v181_v62 = vsel %vm180_vm8, %v2120_v55, %v179_v45  ;;  %v190_v55 = vand.u32 2147483648, %v2155_v22  ;;  %v238_v3 = vsel %vm234_vm0, %v170_v0, 0.0 }
 0x141   :  { %v2151_v15 = vpack.c.bf16 %v352_v10, %v349_v63  ;;  %v156_v63 = vsel %vm154_vm4, %v155_v36, %v153_v35  ;;  %v184_v1 = vsel %vm182_vm11, %v183_v59, %v181_v62  ;;  %v1766_v10 = vpop.eup %1765  ;;  %vm208_vm4 = vcmp.eq.f32.partialorder %v2164_v26, inf }
 0x142   :  { %v235_v50 = vsel %vm234_vm0, %v156_v63, 0.0  ;;  %v1768_v16 = vpop.eup %1767  ;;  %v186_v17 = vmul.f32 %v1766_v10, %v2155_v22  ;;  %vm222_vm8 = vcmp.eq.f32.partialorder %v2171_v29, inf  ;;  %vm231_vm11 = vcmp.eq.f32.partialorder %v2196_v60, 0.0 }
 0x143   :  { %893 = vrot.lane.b32.xlu1 %v2151_v15, %s1942_s4  ;;  %v237_v4 = vadd.f32 %v236_v2, %v235_v50  ;;  %v193_v24 = vmul.f32 %v1768_v16, %v2157_v23  ;;  %v1770_v35 = vpop.eup %1769 }
 0x144   :  { %v188_v36 = vsel %vm187_vm12, %v2155_v22, %v186_v17  ;;  %v1772_v38 = vpop.eup %1771  ;;  %v200_v45 = vmul.f32 %v1770_v35, %v2162_v25  ;;  %v1754_v35 = vld [vmem:[#allocation8] sm:$0xff]   ;;  %vm478_vm12 = vcmask 122880  }
 0x145   :  { %v1624_v34 = vpop.f32.mrb[8].mxu0  ;;  %v239_v21 = vadd.f32 %v238_v3, %v237_v4  ;;  %v195_v42 = vsel %vm194_vm14, %v2157_v23, %v193_v24  ;;  %v1774_v47 = vpop.eup %1773  ;;  %v207_v51 = vmul.f32 %v1772_v38, %v2164_v26  ;;  %v232_v3 = vand.u32 2147483648, %v2196_v60 }
 0x146   :  { %v365_v39 = vpop.f32.mrb[9].mxu0  ;;  %v1776_v57 = vpop.eup %1775  ;;  %v202_v22 = vsel %vm201_vm2, %v2162_v25, %v200_v45  ;;  %v214_v59 = vmul.f32 %v1774_v47, %v2167_v27 }
 0x147   :  { %1078 = vrot.lane.b32.xlu1 %v2143_v9, %s1942_s4  ;;  %v1625_v46 = vpop.f32.mrb[10].mxu0  ;;  %v241_v37 = vadd.f32 %v240_v14, %v239_v21  ;;  %v205_v23 = vsel %vm203_vm3, %v204_v11, %v202_v22  ;;  %v209_v52 = vsel %vm208_vm4, %v2164_v26, %v207_v51  ;;  %v221_v0 = vmul.f32 %v1776_v57, %v2171_v29 }
 0x148   :  { %v368_v49 = vpop.f32.mrb[11].mxu0  ;;  %v2220_v6 = vpack.c.bf16 %v1625_v46, %v1624_v34  ;;  %v242_v34 = vsel %vm234_vm0, %v184_v1, 0.0  ;;  %v225_v46 = vand.u32 2147483648, %v2171_v29  ;;  %v1778_v63 = vpop.eup %1777  ;;  %v212_v1 = vsel %vm210_vm5, %v211_v20, %v209_v52 }
 0x149   :  { %v2222_v7 = vpack.c.bf16 %v368_v49, %v365_v39  ;;  %v191_v39 = vsel %vm189_vm13, %v190_v55, %v188_v36  ;;  %v198_v49 = vsel %vm196_vm15, %v197_v48, %v195_v42  ;;  %v243_v54 = vadd.f32 %v242_v34, %v241_v37 }
 0x14a   :  { %v244_v56 = vsel %vm234_vm0, %v191_v39, 0.0  ;;  %v246_v62 = vsel %vm234_vm0, %v198_v49, 0.0  ;;  %v216_v55 = vsel %vm215_vm6, %v2167_v27, %v214_v59  ;;  %v228_v48 = vmul.f32 %v1778_v63, %v2196_v60 }
 0x14b   :  { %1263 = vrot.lane.b32.xlu1 %v2222_v7, %s1942_s4  ;;  %v245_v53 = vadd.f32 %v244_v56, %v243_v54  ;;  %v248_v50 = vsel %vm234_vm0, %v205_v23, 0.0  ;;  %v219_v25 = vsel %vm217_vm7, %v218_v28, %v216_v55  ;;  %v223_v2 = vsel %vm222_vm8, %v2171_v29, %v221_v0 }
 0x14c   :  { %v230_v26 = vsel %vm229_vm10, %v2196_v60, %v228_v48  ;;  %v250_v10 = vsel %vm234_vm0, %v212_v1, 0.0  ;;  %v226_v11 = vsel %vm224_vm9, %v225_v46, %v223_v2  ;;  %v252_v27 = vsel %vm234_vm0, %v219_v25, 0.0 }
 0x14d   :  { %v247_v4 = vadd.f32 %v246_v62, %v245_v53  ;;  %v233_v16 = vsel %vm231_vm11, %v232_v3, %v230_v26  ;;  %v254_v20 = vsel %vm234_vm0, %v226_v11, 0.0 }
 0x14e   :  { %v256_v24 = vsel %vm234_vm0, %v233_v16, 0.0 }
 0x14f   :  { %v249_v14 = vadd.f32 %v248_v50, %v247_v4 }
 0x151   :  { %v251_v17 = vadd.f32 %v250_v10, %v249_v14 }
 0x153   :  { %v253_v21 = vadd.f32 %v252_v27, %v251_v17 }
 0x155   :  { %v255_v28 = vadd.f32 %v254_v20, %v253_v21 }
 0x157   :  { %v257_v34 = vadd.f32 %v256_v24, %v255_v28 }
 0x15a   :  { %258 = vadd.xlane.f32.xlu0 %v257_v34 }
 0x170   :  { %1448 = vrot.lane.b32.xlu0 %v2220_v6, %s1942_s4 }
 0x1ac   :  { %v709_v60 = vpop.permute.xlu1 %708 }
 0x1ad   :  { %1645 = vmatpush3.bf16.msra.mxu0 %v709_v60  ;;  %v521_v29 = vpop.permute.xlu0 %520 }
 0x1ae   :  { %1633 = vmatpush3.bf16.msra.mxu1 %v521_v29  ;;  %1656 = vmatprep.subr.bf16.mxu0 %v1940_v44 }
 0x1af   :  { %1638 = vmatprep.subr.bf16.mxu1 %v2123_v58 }
 0x1b0   :  { %1647 = vmatmul.mubr.msk.bf16.vlgmr.msra.gmra.mrb[12].mxu0 %vm234_vm0, %v1754_v35 }
 0x1b1   :  { %1635 = vmatmul.mubr.msk.bf16.vlgmr.msra.gmra.mrb[4].mxu1 %vm234_vm0, %v1754_v35  ;;  %1658 = vmatprep.mubr.msk.bf16.mxu0 %vm1941_vm1, %v1940_v44 }
 0x1b2   :  { %1639 = vmatpush3.bf16.msra.mxu1 %v2123_v58  ;;  %1640 = vmatprep.mubr.msk.bf16.mxu1 %vm234_vm0, %v2093_v43 }
 0x1b3   :  { %1650 = vmatprep.subr.bf16.mxu1 %v2151_v15 }
 0x1b5   :  { %v894_v36 = vpop.permute.xlu1 %893 }
 0x1b6   :  { %1657 = vmatpush3.bf16.msra.mxu0 %v894_v36 }
 0x1b7   :  { %1668 = vmatprep.subr.bf16.mxu0 %v1940_v44 }
 0x1b9   :  { %1641 = vmatmul.mubr.msk.bf16.vlgmr.msra.gmra.mrb[8].mxu1 %vm234_vm0, %v2130_v61  ;;  %1659 = vmatmul.mubr.msk.bf16.vlgmr.msra.gmra.mrb[16].mxu0 %vm234_vm0, %v1754_v35  ;;  %v1079_v37 = vpop.permute.xlu1 %1078 }
 0x1ba   :  { %1651 = vmatpush3.bf16.msra.mxu1 %v2151_v15  ;;  %1652 = vmatprep.mubr.msk.bf16.mxu1 %vm234_vm0, %v2093_v43 }
 0x1bb   :  { %1662 = vmatprep.subr.bf16.mxu1 %v2143_v9  ;;  %1669 = vmatpush3.bf16.msra.mxu0 %v1079_v37 }
 0x1bc   :  { %1670 = vmatprep.mubr.msk.bf16.mxu0 %vm1941_vm1, %v1940_v44  ;;  %1680 = vmatprep.subr.bf16.mxu0 %v1940_v44 }
 0x1bd   :  { %v1264_v58 = vpop.permute.xlu1 %1263 }
 0x1c1   :  { %1653 = vmatmul.mubr.msk.bf16.vlgmr.msra.gmra.mrb[12].mxu1 %vm234_vm0, %v2130_v61  ;;  %1671 = vmatmul.mubr.msk.bf16.vlgmr.msra.gmra.mrb[20].mxu0 %vm234_vm0, %v1754_v35 }
 0x1c2   :  { %1663 = vmatpush3.bf16.msra.mxu1 %v2143_v9  ;;  %1664 = vmatprep.mubr.msk.bf16.mxu1 %vm234_vm0, %v2093_v43 }
 0x1c3   :  { %1674 = vmatprep.subr.bf16.mxu1 %v2222_v7  ;;  %1682 = vmatprep.mubr.msk.bf16.mxu0 %vm1941_vm1, %v1940_v44 }
 0x1c4   :  { %1681 = vmatpush3.bf16.msra.mxu0 %v1264_v58 }
 0x1c5   :  { %1692 = vmatprep.subr.bf16.mxu0 %v1940_v44 }
 0x1c9   :  { %1665 = vmatmul.mubr.msk.bf16.vlgmr.msra.gmra.mrb[16].mxu1 %vm234_vm0, %v2130_v61  ;;  %1683 = vmatmul.mubr.msk.bf16.vlgmr.msra.gmra.mrb[24].mxu0 %vm234_vm0, %v1754_v35 }
 0x1ca   :  { %1675 = vmatpush3.bf16.msra.mxu1 %v2222_v7  ;;  %1676 = vmatprep.mubr.msk.bf16.mxu1 %vm234_vm0, %v2093_v43 }
 0x1cb   :  { %1686 = vmatprep.subr.bf16.mxu1 %v2220_v6  ;;  %1694 = vmatprep.mubr.msk.bf16.mxu0 %vm1941_vm1, %v1940_v44  ;;  %vm455_vm1 = vcmask 1046528  }
 0x1d1   :  { %1677 = vmatmul.mubr.msk.bf16.vlgmr.msra.gmra.mrb[20].mxu1 %vm234_vm0, %v2130_v61 }
 0x1d2   :  { %1687 = vmatpush3.bf16.msra.mxu1 %v2220_v6  ;;  %1688 = vmatprep.mubr.msk.bf16.mxu1 %vm234_vm0, %v2093_v43 }
 0x1d9   :  { %1689 = vmatmul.mubr.msk.bf16.vlgmr.msra.gmra.mrb[24].mxu1 %vm234_vm0, %v2130_v61 }
 0x1e7   :  { %v2335_v9 = vpop.xlane.xlu0 %258 }
 0x1e8   :  { %v260_v2 = vrot.slane %v2335_v9, 4 }
 0x1eb   :  { %v1449_v15 = vpop.permute.xlu0 %1448 }
 0x1ec   :  { %1693 = vmatpush3.bf16.msra.mxu0 %v1449_v15 }
 0x1ef   :  { %1695 = vmatmul.mubr.msk.bf16.vlgmr.msra.gmra.mrb[28].mxu0 %vm234_vm0, %v1754_v35 }
 0x212   :  { %v1630_v7 = vpop.f32.mrb[0].mxu1 }
 0x213   :  { %v457_v38 = vrot.slane %v1630_v7, 1  ;;  %v2338_v44 = vpop.f32.mrb[1].mxu1 }
 0x214   :  { %v1631_v39 = vpop.f32.mrb[2].mxu1 }
 0x215   :  { %v442_v42 = vpop.f32.mrb[3].mxu1  ;;  %461 = vrot.lane.b32.xlu1 %v457_v38, %s1943_s18 }
 0x216   :  { %v456_v43 = vrot.slane %v442_v42, 1 }
 0x218   :  { %v458_v6 = vsel %vm455_vm1, %v456_v43, %v457_v38 }
 0x219   :  { %469 = vrot.lane.b32.xlu1 %v457_v38, %s1944_s19 }
 0x21d   :  { %459 = vrot.lane.b32.xlu1 %v458_v6, %s1943_s18 }
 0x221   :  { %467 = vrot.lane.b32.xlu1 %v458_v6, %s1944_s19 }
 0x283   :  { %v745_v61 = vpop.f32.mrb[12].mxu0 }
 0x284   :  { %v560_v45 = vpop.f32.mrb[4].mxu1  ;;  %v752_v46 = vsub.f32 %v2055_v12, %v745_v61  ;;  %v1648_v47 = vpop.f32.mrb[13].mxu0 }
 0x285   :  { %v567_v49 = vsub.f32 %v2051_v5, %v560_v45  ;;  %v1636_v51 = vpop.f32.mrb[5].mxu1  ;;  %v748_v54 = vpop.f32.mrb[14].mxu0 }
 0x286   :  { %v563_v56 = vpop.f32.mrb[6].mxu1  ;;  %v754_v57 = vmul.f32 %v752_v46, %v752_v46  ;;  %v753_v22 = vsub.f32 %v2057_v13, %v748_v54  ;;  %v1649_v59 = vpop.f32.mrb[15].mxu0 }
 0x287   :  { %v569_v62 = vmul.f32 %v567_v49, %v567_v49  ;;  %v568_v63 = vsub.f32 %v2053_v8, %v563_v56  ;;  %v462_v23 = vpop.permute.xlu1 %461  ;;  %v1637_v52 = vpop.f32.mrb[7].mxu1 }
 0x288   :  { %v2349_v0 = vadd.f32 1e-12, %v754_v57  ;;  %v755_v53 = vmul.f32 %v753_v22, %v753_v22  ;;  %v466_v13 = vsub.f32 %v442_v42, %v462_v23 }
 0x289   :  { %v2351_v1 = vadd.f32 1e-12, %v569_v62  ;;  %v570_v12 = vmul.f32 %v568_v63, %v568_v63 }
 0x28a   :  { %1779 = vrsqrt.f32 %v2349_v0  ;;  %v2354_v5 = vadd.f32 1e-12, %v755_v53  ;;  %v476_v16 = vand.u32 2147483647, %v466_v13  ;;  %vm760_vm13 = vcmp.eq.f32.partialorder %v2349_v0, inf }
 0x28b   :  { %1781 = vrsqrt.f32 %v2351_v1  ;;  %v2357_v55 = vadd.f32 1e-12, %v570_v12  ;;  %v470_v48 = vpop.permute.xlu1 %469  ;;  %vm762_vm14 = vcmp.eq.f32.partialorder %v2349_v0, 0.0  ;;  %v763_v29 = vand.u32 2147483648, %v2349_v0 }
 0x28c   :  { %v474_v50 = vadd.f32 %v470_v48, %v442_v42  ;;  %v1642_v8 = vpop.f32.mrb[8].mxu1  ;;  %1783 = vrsqrt.f32 %v2354_v5  ;;  %v930_v25 = vpop.f32.mrb[16].mxu0  ;;  %vm767_vm15 = vcmp.eq.f32.partialorder %v2354_v5, inf  ;;  %vm769_vm2 = vcmp.eq.f32.partialorder %v2354_v5, 0.0 }
 0x28d   :  { %1785 = vrsqrt.f32 %v2357_v55  ;;  %v651_v3 = vrot.slane %v1642_v8, 1  ;;  %v2362_v4 = vpop.f32.mrb[9].mxu1  ;;  %v1660_v26 = vpop.f32.mrb[17].mxu0  ;;  %v937_v14 = vsub.f32 %v2061_v18, %v930_v25  ;;  %v2373_v18 = vadd.f32 %v260_v2, %v2335_v9 }
 0x28e   :  { %v492_v10 = vand.u32 2147483647, %v474_v50  ;;  %v1643_v11 = vpop.f32.mrb[10].mxu1  ;;  %v933_v27 = vpop.f32.mrb[18].mxu0  ;;  %v770_v9 = vand.u32 2147483648, %v2354_v5  ;;  %vm575_vm3 = vcmp.eq.f32.partialorder %v2351_v1, inf }
 0x28f   :  { %v460_v17 = vpop.permute.xlu1 %459  ;;  %655 = vrot.lane.b32.xlu0 %v651_v3, %s1943_s18  ;;  %v2366_v20 = vpop.f32.mrb[11].mxu1  ;;  %v939_v28 = vmul.f32 %v937_v14, %v937_v14  ;;  %v938_v34 = vsub.f32 %v2063_v19, %v933_v27  ;;  %v479_v19 = vsel %vm478_vm12, %v476_v16, 0.0  ;;  %vm577_vm4 = vcmp.eq.f32.partialorder %v2351_v1, 0.0 }
 0x290   :  { %v465_v21 = vsub.f32 %v2338_v44, %v460_v17  ;;  %497 = vrot.lane.b32.xlu1 %v492_v10, %s1943_s18  ;;  %v650_v24 = vrot.slane %v2366_v20, 1  ;;  %v1661_v60 = vpop.f32.mrb[19].mxu0  ;;  %v578_v54 = vand.u32 2147483648, %v2351_v1  ;;  %vm582_vm5 = vcmp.eq.f32.partialorder %v2357_v55, inf }
 0x291   :  { %v2381_v37 = vadd.f32 1e-12, %v939_v28  ;;  %v940_v58 = vmul.f32 %v938_v34, %v938_v34  ;;  %v585_v25 = vand.u32 2147483648, %v2357_v55  ;;  %vm584_vm6 = vcmp.eq.f32.partialorder %v2357_v55, 0.0 }
 0x292   :  { %v475_v35 = vand.u32 2147483647, %v465_v21  ;;  %v2379_v36 = vsel %vm455_vm1, %v650_v24, %v651_v3 }
 0x293   :  { %v468_v15 = vpop.permute.xlu1 %467  ;;  %1787 = vrsqrt.f32 %v2381_v37  ;;  %v2391_v43 = vadd.f32 1e-12, %v940_v58  ;;  %vm945_vm7 = vcmp.eq.f32.partialorder %v2381_v37, inf  ;;  %vm947_vm8 = vcmp.eq.f32.partialorder %v2381_v37, 0.0 }
 0x294   :  { %v1780_v7 = vpop.eup %1779  ;;  %v473_v38 = vadd.f32 %v468_v15, %v2338_v44  ;;  %663 = vrot.lane.b32.xlu1 %v651_v3, %s1944_s19  ;;  %v1654_v39 = vpop.f32.mrb[12].mxu1  ;;  %v477_v42 = vsel %vm234_vm0, %v475_v35, 0.0 }
 0x295   :  { %v1782_v6 = vpop.eup %1781  ;;  %v2393_v61 = vpop.f32.mrb[13].mxu1  ;;  %v2395_v45 = vadd.f32 %v479_v19, %v477_v42  ;;  %v759_v46 = vmul.f32 %v1780_v7, %v2349_v0  ;;  %1789 = vrsqrt.f32 %v2391_v43  ;;  %v2403_v57 = vrot.slane %v1654_v39, 1 }
 0x296   :  { %v1784_v44 = vpop.eup %1783  ;;  %v491_v47 = vand.u32 2147483647, %v473_v38  ;;  %v1655_v49 = vpop.f32.mrb[14].mxu1  ;;  %v574_v51 = vmul.f32 %v1782_v6, %v2351_v1  ;;  %vm952_vm9 = vcmp.eq.f32.partialorder %v2391_v43, inf  ;;  %v955_v38 = vand.u32 2147483648, %v2391_v43 }
 0x297   :  { %v1786_v56 = vpop.eup %1785  ;;  %v2405_v22 = vpop.f32.mrb[15].mxu1  ;;  %v761_v59 = vsel %vm760_vm13, %v2349_v0, %v759_v46  ;;  %v766_v62 = vmul.f32 %v1784_v44, %v2354_v5  ;;  %vm954_vm10 = vcmp.eq.f32.partialorder %v2391_v43, 0.0 }
 0x298   :  { %v1115_v63 = vpop.f32.mrb[20].mxu0  ;;  %495 = vrot.lane.b32.xlu0 %v491_v47, %s1943_s18  ;;  %v835_v23 = vrot.slane %v2405_v22, 1  ;;  %v764_v52 = vsel %vm762_vm14, %v763_v29, %v761_v59  ;;  %v576_v53 = vsel %vm575_vm3, %v2351_v1, %v574_v51  ;;  %v581_v12 = vmul.f32 %v1786_v56, %v2357_v55 }
 0x299   :  { %v1672_v13 = vpop.f32.mrb[21].mxu0  ;;  %v768_v48 = vsel %vm767_vm15, %v2354_v5, %v766_v62  ;;  %v772_v50 = vsel %vm234_vm0, %v764_v52, 0.0  ;;  %v579_v8 = vsel %vm577_vm4, %v578_v54, %v576_v53  ;;  %v1122_v1 = vsub.f32 %v2071_v30, %v1115_v63 }
 0x29a   :  { %v1118_v0 = vpop.f32.mrb[22].mxu0  ;;  %v2429_v2 = vsel %vm455_vm1, %v835_v23, %v2403_v57  ;;  %v771_v3 = vsel %vm769_vm2, %v770_v9, %v768_v48  ;;  %v583_v26 = vsel %vm582_vm5, %v2357_v55, %v581_v12  ;;  %v587_v17 = vsel %vm234_vm0, %v579_v8, 0.0 }
 0x29b   :  { %v1673_v10 = vpop.f32.mrb[23].mxu0  ;;  %v773_v11 = vsel %vm234_vm0, %v771_v3, 0.0  ;;  %v586_v14 = vsel %vm584_vm6, %v585_v25, %v583_v26  ;;  %v1123_v21 = vsub.f32 %v2074_v31, %v1118_v0  ;;  %v1124_v28 = vmul.f32 %v1122_v1, %v1122_v1 }
 0x29c   :  { %653 = vrot.lane.b32.xlu0 %v2379_v36, %s1943_s18  ;;  %v2439_v27 = vadd.f32 %v773_v11, %v772_v50  ;;  %v1666_v16 = vpop.f32.mrb[16].mxu1  ;;  %v588_v5 = vsel %vm234_vm0, %v586_v14, 0.0  ;;  %v262_v30 = vrot.slane %v2373_v18, 2  ;;  %v948_v29 = vand.u32 2147483648, %v2381_v37 }
 0x29d   :  { %v2444_v24 = vpop.f32.mrb[17].mxu1  ;;  %v2446_v55 = vadd.f32 %v588_v5, %v587_v17  ;;  %v1788_v34 = vpop.eup %1787  ;;  %v1125_v35 = vmul.f32 %v1123_v21, %v1123_v21  ;;  %v1126_v31 = vadd.f32 1e-12, %v1124_v28  ;;  %v1021_v9 = vrot.slane %v1666_v16, 1 }
 0x29e   :  { %v1667_v60 = vpop.f32.mrb[18].mxu1  ;;  %v944_v15 = vmul.f32 %v1788_v34, %v2381_v37  ;;  %v263_v47 = vadd.f32 %v262_v30, %v2373_v18 }
 0x29f   :  { %v2451_v58 = vpop.f32.mrb[19].mxu1  ;;  %v1790_v19 = vpop.eup %1789  ;;  %v1127_v39 = vadd.f32 1e-12, %v1125_v35  ;;  %1791 = vrsqrt.f32 %v1126_v31  ;;  %vm1130_vm11 = vcmp.eq.f32.partialorder %v1126_v31, inf  ;;  %v1133_v13 = vand.u32 2147483648, %v1126_v31 }
 0x2a0   :  { %661 = vrot.lane.b32.xlu0 %v2379_v36, %s1944_s19  ;;  %v1020_v7 = vrot.slane %v2451_v58, 1  ;;  %v946_v42 = vsel %vm945_vm7, %v2381_v37, %v944_v15  ;;  %v951_v6 = vmul.f32 %v1790_v19, %v2391_v43  ;;  %v264_v54 = vrot.slane %v263_v47, 1 }
 0x2a1   :  { %v949_v44 = vsel %vm947_vm8, %v948_v29, %v946_v42  ;;  %1793 = vrsqrt.f32 %v1127_v39  ;;  %vm1132_vm13 = vcmp.eq.f32.partialorder %v1126_v31, 0.0  ;;  %vm1137_vm14 = vcmp.eq.f32.partialorder %v1127_v39, inf }
 0x2a2   :  { %v1022_v46 = vsel %vm455_vm1, %v1020_v7, %v1021_v9  ;;  %v953_v36 = vsel %vm952_vm9, %v2391_v43, %v951_v6  ;;  %v957_v49 = vsel %vm234_vm0, %v949_v44, 0.0  ;;  %v265_v23 = vadd.f32 %v264_v54, %v263_v47 }
 0x2a3   :  { %v956_v51 = vsel %vm954_vm10, %v955_v38, %v953_v36  ;;  %v1140_v25 = vand.u32 2147483648, %v1127_v39  ;;  %vm1139_vm15 = vcmp.eq.f32.partialorder %v1127_v39, 0.0 }
 0x2a4   :  { %840 = vrot.lane.b32.xlu0 %v2403_v57, %s1943_s18  ;;  %v1678_v37 = vpop.f32.mrb[20].mxu1  ;;  %v958_v59 = vsel %vm234_vm0, %v956_v51, 0.0  ;;  %1698 = vpush %v265_v23 }
 0x2a5   :  { %v2471_v56 = vpop.f32.mrb[21].mxu1  ;;  %v959_v63 = vadd.f32 %v958_v59, %v957_v49  ;;  %v1206_v43 = vrot.slane %v1678_v37, 1 }
 0x2a6   :  { %v1679_v62 = vpop.f32.mrb[22].mxu1 }
 0x2a7   :  { %v2474_v18 = vpop.f32.mrb[23].mxu1 }
 0x2a8   :  { %848 = vrot.lane.b32.xlu0 %v2403_v57, %s1944_s19  ;;  %v1205_v52 = vrot.slane %v2474_v18, 1 }
 0x2a9   :  { %v1792_v12 = vpop.eup %1791 }
 0x2aa   :  { %v1207_v53 = vsel %vm455_vm1, %v1205_v52, %v1206_v43  ;;  %v1129_v8 = vmul.f32 %v1792_v12, %v1126_v31 }
 0x2ab   :  { %v1794_v48 = vpop.eup %1793 }
 0x2ac   :  { %838 = vrot.lane.b32.xlu0 %v2429_v2, %s1943_s18  ;;  %v1690_v50 = vpop.f32.mrb[24].mxu1  ;;  %v1136_v57 = vmul.f32 %v1794_v48, %v1127_v39  ;;  %v1131_v26 = vsel %vm1130_vm11, %v1126_v31, %v1129_v8 }
 0x2ad   :  { %v2482_v0 = vpop.f32.mrb[25].mxu1  ;;  %v1134_v11 = vsel %vm1132_vm13, %v1133_v13, %v1131_v26  ;;  %v1391_v1 = vrot.slane %v1690_v50, 1 }
 0x2ae   :  { %v1691_v3 = vpop.f32.mrb[26].mxu1  ;;  %v1138_v14 = vsel %vm1137_vm14, %v1127_v39, %v1136_v57  ;;  %v1142_v5 = vsel %vm234_vm0, %v1134_v11, 0.0 }
 0x2af   :  { %v2484_v10 = vpop.f32.mrb[27].mxu1  ;;  %v1141_v17 = vsel %vm1139_vm15, %v1140_v25, %v1138_v14 }
 0x2b0   :  { %v1390_v16 = vrot.slane %v2484_v10, 1  ;;  %v1143_v21 = vsel %vm234_vm0, %v1141_v17, 0.0 }
 0x2b1   :  { %v1144_v34 = vadd.f32 %v1143_v21, %v1142_v5 }
 0x2b2   :  { %v1392_v28 = vsel %vm455_vm1, %v1390_v16, %v1391_v1  ;;  %v1300_v16 = vpop.f32.mrb[24].mxu0 }
 0x2b3   :  { %v1307_v5 = vsub.f32 %v2076_v32, %v1300_v16 }
 0x2b8   :  { %481 = vadd.xlane.f32.xlu1 %v2395_v45 }
 0x2c9   :  { %846 = vrot.lane.b32.xlu1 %v2429_v2, %s1944_s19 }
 0x2cb   :  { %775 = vadd.xlane.f32.xlu0 %v2439_v27 }
 0x2d5   :  { %s1699_s6 = spop %1698 }
 0x2d6   :  { %1526 = sst [smem:[#allocation11]] %s1699_s6 }
 0x2e1   :  { %1033 = vrot.lane.b32.xlu0 %v1021_v9, %s1944_s19 }
 0x2e5   :  { %1023 = vrot.lane.b32.xlu0 %v1022_v46, %s1943_s18 }
 0x2e9   :  { %1031 = vrot.lane.b32.xlu0 %v1022_v46, %s1944_s19 }
 0x2ed   :  { %590 = vadd.xlane.f32.xlu1 %v2446_v55 }
 0x2fe   :  { %1025 = vrot.lane.b32.xlu1 %v1021_v9, %s1943_s18 }
 0x301   :  { %v656_v45 = vpop.permute.xlu0 %655 }
 0x302   :  { %1218 = vrot.lane.b32.xlu1 %v1206_v43, %s1944_s19  ;;  %v660_v27 = vsub.f32 %v2366_v20, %v656_v45  ;;  %v498_v49 = vpop.permute.xlu1 %497 }
 0x303   :  { %v502_v51 = vsel %vm478_vm12, %v498_v49, 0.0 }
 0x304   :  { %v670_v60 = vand.u32 2147483647, %v660_v27 }
 0x306   :  { %1216 = vrot.lane.b32.xlu1 %v1207_v53, %s1944_s19  ;;  %v672_v31 = vsel %vm478_vm12, %v670_v60, 0.0  ;;  %v664_v59 = vpop.permute.xlu1 %663 }
 0x307   :  { %v668_v62 = vadd.f32 %v664_v59, %v2366_v20 }
 0x308   :  { %960 = vadd.xlane.f32.xlu0 %v959_v63 }
 0x309   :  { %v685_v52 = vand.u32 2147483647, %v668_v62 }
 0x30a   :  { %1403 = vrot.lane.b32.xlu1 %v1391_v1, %s1944_s19  ;;  %v496_v2 = vpop.permute.xlu0 %495 }
 0x30b   :  { %v501_v37 = vsel %vm234_vm0, %v496_v2, 0.0 }
 0x30c   :  { %v503_v54 = vadd.f32 %v502_v51, %v501_v37 }
 0x30e   :  { %1401 = vrot.lane.b32.xlu1 %v1392_v28, %s1944_s19  ;;  %v654_v30 = vpop.permute.xlu0 %653 }
 0x30f   :  { %v659_v29 = vsub.f32 %v2362_v4, %v654_v30 }
 0x311   :  { %v669_v55 = vand.u32 2147483647, %v659_v29 }
 0x312   :  { %v662_v35 = vpop.permute.xlu0 %661 }
 0x313   :  { %v671_v15 = vsel %vm234_vm0, %v669_v55, 0.0 }
 0x314   :  { %v673_v19 = vadd.f32 %v672_v31, %v671_v15 }
 0x316   :  { %v841_v9 = vpop.permute.xlu0 %840 }
 0x317   :  { %v845_v38 = vsub.f32 %v2405_v22, %v841_v9 }
 0x319   :  { %v855_v42 = vand.u32 2147483647, %v845_v38 }
 0x31a   :  { %v849_v7 = vpop.permute.xlu0 %848 }
 0x31b   :  { %v857_v47 = vsel %vm478_vm12, %v855_v42, 0.0  ;;  %v853_v50 = vadd.f32 %v849_v7, %v2405_v22 }
 0x31d   :  { %v870_v57 = vand.u32 2147483647, %v853_v50 }
 0x31e   :  { %1208 = vrot.lane.b32.xlu0 %v1207_v53, %s1943_s18  ;;  %v839_v39 = vpop.permute.xlu0 %838  ;;  %v667_v53 = vadd.f32 %v662_v35, %v2362_v4 }
 0x31f   :  { %v844_v6 = vsub.f32 %v2393_v61, %v839_v39 }
 0x320   :  { %v684_v48 = vand.u32 2147483647, %v667_v53 }
 0x321   :  { %v854_v46 = vand.u32 2147483647, %v844_v6 }
 0x322   :  { %1210 = vrot.lane.b32.xlu0 %v1206_v43, %s1943_s18 }
 0x323   :  { %v856_v44 = vsel %vm234_vm0, %v854_v46, 0.0 }
 0x324   :  { %v858_v36 = vadd.f32 %v857_v47, %v856_v44 }
 0x332   :  { %1145 = vadd.xlane.f32.xlu1 %v1144_v34  ;;  %v1309_v34 = vmul.f32 %v1307_v5, %v1307_v5 }
 0x334   :  { %v1311_v35 = vadd.f32 1e-12, %v1309_v34 }
 0x336   :  { %1795 = vrsqrt.f32 %v1311_v35  ;;  %vm1315_vm1 = vcmp.eq.f32.partialorder %v1311_v35, inf  ;;  %v1318_v47 = vand.u32 2147483648, %v1311_v35  ;;  %vm1317_vm3 = vcmp.eq.f32.partialorder %v1311_v35, 0.0 }
 0x340   :  { %v1796_v39 = vpop.eup %1795 }
 0x341   :  { %504 = vadd.xlane.f32.xlu0 %v503_v54  ;;  %v1314_v44 = vmul.f32 %v1796_v39, %v1311_v35 }
 0x343   :  { %1395 = vrot.lane.b32.xlu1 %v1391_v1, %s1943_s18 }
 0x345   :  { %v482_v63 = vpop.xlane.xlu1 %481  ;;  %674 = vadd.xlane.f32.xlu0 %v673_v19 }
 0x346   :  { %v483_v23 = vrot.slane %v482_v63, 4 }
 0x347   :  { %1393 = vrot.lane.b32.xlu1 %v1392_v28, %s1943_s18 }
 0x348   :  { %v484_v43 = vadd.f32 %v483_v23, %v482_v63 }
 0x349   :  { %859 = vadd.xlane.f32.xlu0 %v858_v36  ;;  %v847_v8 = vpop.permute.xlu1 %846  ;;  %v1316_v36 = vsel %vm1315_vm1, %v1311_v35, %v1314_v44 }
 0x34a   :  { %v485_v12 = vrot.slane %v484_v43, 2  ;;  %v852_v3 = vadd.f32 %v847_v8, %v2393_v61  ;;  %v1684_v61 = vpop.f32.mrb[25].mxu0  ;;  %v1319_v54 = vsel %vm1317_vm3, %v1318_v47, %v1316_v36 }
 0x34b   :  { %690 = vrot.lane.b32.xlu1 %v685_v52, %s1943_s18  ;;  %v1303_v28 = vpop.f32.mrb[26].mxu0  ;;  %v1327_v63 = vsel %vm234_vm0, %v1319_v54, 0.0 }
 0x34c   :  { %v486_v13 = vadd.f32 %v485_v12, %v484_v43  ;;  %v869_v4 = vand.u32 2147483647, %v852_v3  ;;  %v1308_v45 = vsub.f32 %v2078_v33, %v1303_v28  ;;  %v1685_v2 = vpop.f32.mrb[27].mxu0 }
 0x34d   :  { %v1485_v30 = vpop.f32.mrb[28].mxu0 }
 0x34e   :  { %v487_v25 = vrot.slane %v486_v13, 1  ;;  %v1310_v60 = vmul.f32 %v1308_v45, %v1308_v45  ;;  %v1696_v29 = vpop.f32.mrb[29].mxu0  ;;  %v1492_v15 = vsub.f32 %v2085_v40, %v1485_v30 }
 0x34f   :  { %688 = vrot.lane.b32.xlu1 %v684_v48, %s1943_s18  ;;  %v1488_v55 = vpop.f32.mrb[30].mxu0 }
 0x350   :  { %v488_v20 = vadd.f32 %v487_v25, %v486_v13  ;;  %v1697_v31 = vpop.f32.mrb[31].mxu0  ;;  %v1312_v32 = vadd.f32 1e-12, %v1310_v60  ;;  %v1493_v19 = vsub.f32 %v2087_v41, %v1488_v55  ;;  %v1494_v9 = vmul.f32 %v1492_v15, %v1492_v15 }
 0x352   :  { %1700 = vpush %v488_v20  ;;  %1797 = vrsqrt.f32 %v1312_v32  ;;  %v1495_v7 = vmul.f32 %v1493_v19, %v1493_v19  ;;  %v1496_v33 = vadd.f32 1e-12, %v1494_v9  ;;  %vm1322_vm2 = vcmp.eq.f32.partialorder %v1312_v32, inf }
 0x353   :  { %875 = vrot.lane.b32.xlu1 %v870_v57, %s1943_s18  ;;  %vm1324_vm4 = vcmp.eq.f32.partialorder %v1312_v32, 0.0  ;;  %v1325_v59 = vand.u32 2147483648, %v1312_v32 }
 0x354   :  { %v1497_v38 = vadd.f32 1e-12, %v1495_v7  ;;  %1799 = vrsqrt.f32 %v1496_v33  ;;  %vm1500_vm5 = vcmp.eq.f32.partialorder %v1496_v33, inf  ;;  %v1503_v25 = vand.u32 2147483648, %v1496_v33 }
 0x355   :  { %vm1502_vm6 = vcmp.eq.f32.partialorder %v1496_v33, 0.0 }
 0x356   :  { %1801 = vrsqrt.f32 %v1497_v38  ;;  %vm1507_vm7 = vcmp.eq.f32.partialorder %v1497_v38, inf  ;;  %vm1509_vm8 = vcmp.eq.f32.partialorder %v1497_v38, 0.0 }
 0x357   :  { %873 = vrot.lane.b32.xlu1 %v869_v4, %s1943_s18 }
 0x358   :  { %v2525_v26 = vpop.xlane.xlu0 %775 }
 0x35c   :  { %v1034_v11 = vpop.permute.xlu0 %1033  ;;  %v1798_v42 = vpop.eup %1797 }
 0x35d   :  { %v1038_v14 = vadd.f32 %v1034_v11, %v2451_v58  ;;  %v1321_v40 = vmul.f32 %v1798_v42, %v1312_v32 }
 0x35e   :  { %v1800_v62 = vpop.eup %1799 }
 0x35f   :  { %v1055_v22 = vand.u32 2147483647, %v1038_v14  ;;  %v1323_v49 = vsel %vm1322_vm2, %v1312_v32, %v1321_v40  ;;  %v1499_v8 = vmul.f32 %v1800_v62, %v1496_v33  ;;  %v1510_v14 = vand.u32 2147483648, %v1497_v38 }
 0x360   :  { %v1024_v1 = vpop.permute.xlu0 %1023  ;;  %v1802_v23 = vpop.eup %1801  ;;  %v1326_v43 = vsel %vm1324_vm4, %v1325_v59, %v1323_v49 }
 0x361   :  { %1060 = vrot.lane.b32.xlu1 %v1055_v22, %s1943_s18  ;;  %v1029_v46 = vsub.f32 %v2444_v24, %v1024_v1  ;;  %v1328_v53 = vsel %vm234_vm0, %v1326_v43, 0.0  ;;  %v1501_v57 = vsel %vm1500_vm5, %v1496_v33, %v1499_v8 }
 0x362   :  { %v2543_v48 = vadd.f32 %v1328_v53, %v1327_v63  ;;  %v1504_v4 = vsel %vm1502_vm6, %v1503_v25, %v1501_v57 }
 0x363   :  { %v1039_v37 = vand.u32 2147483647, %v1029_v46  ;;  %v1512_v22 = vsel %vm234_vm0, %v1504_v4, 0.0 }
 0x364   :  { %v1032_v17 = vpop.permute.xlu0 %1031 }
 0x365   :  { %v1037_v21 = vadd.f32 %v1032_v17, %v2444_v24  ;;  %v1041_v12 = vsel %vm234_vm0, %v1039_v37, 0.0 }
 0x367   :  { %v1054_v27 = vand.u32 2147483647, %v1037_v21 }
 0x369   :  { %1058 = vrot.lane.b32.xlu1 %v1054_v27, %s1943_s18 }
 0x37a   :  { %v2535_v6 = vpop.xlane.xlu1 %590 }
 0x37e   :  { %v1026_v41 = vpop.permute.xlu1 %1025 }
 0x37f   :  { %v1030_v51 = vsub.f32 %v2451_v58, %v1026_v41  ;;  %v1506_v58 = vmul.f32 %v1802_v23, %v1497_v38 }
 0x381   :  { %v1040_v24 = vand.u32 2147483647, %v1030_v51  ;;  %v1508_v11 = vsel %vm1507_vm7, %v1497_v38, %v1506_v58 }
 0x382   :  { %v1219_v52 = vpop.permute.xlu1 %1218  ;;  %v1511_v16 = vsel %vm1509_vm8, %v1510_v14, %v1508_v11 }
 0x383   :  { %v1042_v13 = vsel %vm478_vm12, %v1040_v24, 0.0  ;;  %v1513_v5 = vsel %vm234_vm0, %v1511_v16, 0.0  ;;  %v1223_v30 = vadd.f32 %v1219_v52, %v2474_v18  ;;  %s1701_s3 = spop %1700 }
 0x384   :  { %v1043_v50 = vadd.f32 %v1042_v13, %v1041_v12  ;;  %v2549_v61 = vadd.f32 %v1513_v5, %v1512_v22 }
 0x385   :  { %v1240_v29 = vand.u32 2147483647, %v1223_v30 }
 0x386   :  { %v1217_v20 = vpop.permute.xlu1 %1216  ;;  %1044 = vadd.xlane.f32.xlu0 %v1043_v50 }
 0x387   :  { %v1222_v3 = vadd.f32 %v1217_v20, %v2471_v56 }
 0x389   :  { %v1239_v1 = vand.u32 2147483647, %v1222_v3 }
 0x38a   :  { %v1404_v17 = vpop.permute.xlu1 %1403 }
 0x38b   :  { %1243 = vrot.lane.b32.xlu1 %v1239_v1, %s1943_s18  ;;  %v1408_v34 = vadd.f32 %v1404_v17, %v2484_v10 }
 0x38d   :  { %v1425_v2 = vand.u32 2147483647, %v1408_v34 }
 0x38e   :  { %v1402_v21 = vpop.permute.xlu1 %1401 }
 0x38f   :  { %v1407_v28 = vadd.f32 %v1402_v21, %v2482_v0 }
 0x391   :  { %v1424_v45 = vand.u32 2147483647, %v1407_v28 }
 0x393   :  { %1428 = vrot.lane.b32.xlu1 %v1424_v45, %s1943_s18 }
 0x395   :  { %v2554_v27 = vpop.xlane.xlu0 %960 }
 0x397   :  { %1430 = vrot.lane.b32.xlu1 %v1425_v2, %s1943_s18 }
 0x399   :  { %v1209_v60 = vpop.permute.xlu0 %1208 }
 0x39a   :  { %v1214_v55 = vsub.f32 %v2471_v56, %v1209_v60  ;;  %v592_v56 = vrot.slane %v2535_v6, 4 }
 0x39c   :  { %1245 = vrot.lane.b32.xlu0 %v1240_v29, %s1943_s18  ;;  %v1224_v15 = vand.u32 2147483647, %v1214_v55 }
 0x39d   :  { %v1211_v35 = vpop.permute.xlu0 %1210 }
 0x39e   :  { %v1215_v31 = vsub.f32 %v2474_v18, %v1211_v35  ;;  %v1226_v19 = vsel %vm234_vm0, %v1224_v15, 0.0  ;;  %v593_v18 = vadd.f32 %v592_v56, %v2535_v6 }
 0x3a0   :  { %v1225_v32 = vand.u32 2147483647, %v1215_v31  ;;  %v594_v37 = vrot.slane %v593_v18, 2 }
 0x3a2   :  { %v1227_v9 = vsel %vm478_vm12, %v1225_v32, 0.0  ;;  %v595_v24 = vadd.f32 %v594_v37, %v593_v18 }
 0x3a3   :  { %v1228_v7 = vadd.f32 %v1227_v9, %v1226_v19 }
 0x3a4   :  { %v596_v13 = vrot.slane %v595_v24, 1 }
 0x3a6   :  { %v597_v11 = vadd.f32 %v596_v13, %v595_v24 }
 0x3bb   :  { %1229 = vadd.xlane.f32.xlu0 %v1228_v7 }
 0x3bf   :  { %v2563_v33 = vpop.xlane.xlu1 %1145 }
 0x3c3   :  { %v1396_v38 = vpop.permute.xlu1 %1395 }
 0x3c4   :  { %v1400_v39 = vsub.f32 %v2484_v10, %v1396_v38  ;;  %v962_v38 = vrot.slane %v2554_v27, 4 }
 0x3c6   :  { %v1410_v46 = vand.u32 2147483647, %v1400_v39  ;;  %v963_v18 = vadd.f32 %v962_v38, %v2554_v27 }
 0x3c7   :  { %v1394_v42 = vpop.permute.xlu1 %1393 }
 0x3c8   :  { %v1399_v44 = vsub.f32 %v2482_v0, %v1394_v42  ;;  %v1412_v36 = vsel %vm478_vm12, %v1410_v46, 0.0 }
 0x3ca   :  { %v1409_v40 = vand.u32 2147483647, %v1399_v44 }
 0x3cb   :  { %v691_v47 = vpop.permute.xlu1 %690 }
 0x3cc   :  { %v1411_v41 = vsel %vm234_vm0, %v1409_v40, 0.0  ;;  %v695_v10 = vsel %vm478_vm12, %v691_v47, 0.0 }
 0x3cd   :  { %v1413_v49 = vadd.f32 %v1412_v36, %v1411_v41 }
 0x3ce   :  { %v505_v51 = vpop.xlane.xlu0 %504 }
 0x3cf   :  { %v506_v54 = vrot.slane %v505_v51, 4  ;;  %v689_v59 = vpop.permute.xlu1 %688 }
 0x3d0   :  { %v694_v62 = vsel %vm234_vm0, %v689_v59, 0.0 }
 0x3d1   :  { %v507_v63 = vadd.f32 %v506_v54, %v505_v51  ;;  %v696_v23 = vadd.f32 %v695_v10, %v694_v62  ;;  %v964_v51 = vrot.slane %v963_v18, 2 }
 0x3d2   :  { %v675_v0 = vpop.xlane.xlu0 %674 }
 0x3d3   :  { %v508_v6 = vrot.slane %v507_v63, 2  ;;  %v676_v43 = vrot.slane %v675_v0, 4  ;;  %v876_v52 = vpop.permute.xlu1 %875  ;;  %697 = vadd.xlane.f32.xlu1 %v696_v23 }
 0x3d4   :  { %v880_v25 = vsel %vm478_vm12, %v876_v52, 0.0  ;;  %v965_v52 = vadd.f32 %v964_v51, %v963_v18 }
 0x3d5   :  { %v677_v53 = vadd.f32 %v676_v43, %v675_v0  ;;  %v509_v12 = vadd.f32 %v508_v6, %v507_v63 }
 0x3d6   :  { %v860_v34 = vpop.xlane.xlu0 %859 }
 0x3d7   :  { %v678_v50 = vrot.slane %v677_v53, 2  ;;  %v874_v8 = vpop.permute.xlu1 %873  ;;  %v510_v58 = vrot.slane %v509_v12, 1 }
 0x3d8   :  { %v879_v20 = vsel %vm234_vm0, %v874_v8, 0.0 }
 0x3d9   :  { %v881_v57 = vadd.f32 %v880_v25, %v879_v20  ;;  %v511_v3 = vadd.f32 %v510_v58, %v509_v12  ;;  %v679_v4 = vadd.f32 %v678_v50, %v677_v53  ;;  %v966_v20 = vrot.slane %v965_v52, 1 }
 0x3db   :  { %v1061_v14 = vpop.permute.xlu1 %1060  ;;  %882 = vadd.xlane.f32.xlu1 %v881_v57  ;;  %1702 = vpush %v511_v3  ;;  %v680_v22 = vrot.slane %v679_v4, 1 }
 0x3dc   :  { %1704 = vpush %v597_v11  ;;  %v1065_v17 = vsel %vm478_vm12, %v1061_v14, 0.0 }
 0x3dd   :  { %v681_v1 = vadd.f32 %v680_v22, %v679_v4 }
 0x3df   :  { %1414 = vadd.xlane.f32.xlu1 %v1413_v49  ;;  %v1059_v16 = vpop.permute.xlu1 %1058  ;;  %1706 = vpush %v681_v1 }
 0x3e0   :  { %v1064_v5 = vsel %vm234_vm0, %v1059_v16, 0.0 }
 0x3e1   :  { %v1066_v21 = vadd.f32 %v1065_v17, %v1064_v5 }
 0x3e3   :  { %1067 = vadd.xlane.f32.xlu0 %v1066_v21 }
 0x3e7   :  { %1330 = vadd.xlane.f32.xlu0 %v2543_v48  ;;  %v777_v48 = vrot.slane %v2525_v26, 4 }
 0x3e9   :  { %v778_v19 = vadd.f32 %v777_v48, %v2525_v26  ;;  %v1147_v26 = vrot.slane %v2563_v33, 4 }
 0x3eb   :  { %1515 = vadd.xlane.f32.xlu0 %v2549_v61  ;;  %v861_v61 = vrot.slane %v860_v34, 4  ;;  %v779_v7 = vrot.slane %v778_v19, 2  ;;  %v1148_v27 = vadd.f32 %v1147_v26, %v2563_v33  ;;  %v967_v33 = vadd.f32 %v966_v20, %v965_v52 }
 0x3ed   :  { %v862_v9 = vadd.f32 %v861_v61, %v860_v34  ;;  %v780_v40 = vadd.f32 %v779_v7, %v778_v19  ;;  %v1149_v58 = vrot.slane %v1148_v27, 2 }
 0x3ef   :  { %v863_v39 = vrot.slane %v862_v9, 2  ;;  %v781_v59 = vrot.slane %v780_v40, 1  ;;  %v1150_v1 = vadd.f32 %v1149_v58, %v1148_v27 }
 0x3f1   :  { %v864_v47 = vadd.f32 %v863_v39, %v862_v9  ;;  %v782_v43 = vadd.f32 %v781_v59, %v780_v40 }
 0x3f3   :  { %v865_v10 = vrot.slane %v864_v47, 1 }
 0x3f5   :  { %v866_v13 = vadd.f32 %v865_v10, %v864_v47 }
 0x3fd   :  { %v1244_v28 = vpop.permute.xlu1 %1243 }
 0x3fe   :  { %v1249_v29 = vsel %vm234_vm0, %v1244_v28, 0.0  ;;  %v1151_v28 = vrot.slane %v1150_v1, 1 }
 0x405   :  { %v1429_v45 = vpop.permute.xlu1 %1428 }
 0x406   :  { %v1434_v31 = vsel %vm234_vm0, %v1429_v45, 0.0 }
 0x409   :  { %v1431_v30 = vpop.permute.xlu1 %1430 }
 0x40a   :  { %v1435_v15 = vsel %vm478_vm12, %v1431_v30, 0.0  ;;  %v1152_v30 = vadd.f32 %v1151_v28, %v1150_v1 }
 0x40b   :  { %v1436_v32 = vadd.f32 %v1435_v15, %v1434_v31 }
 0x40c   :  { %s1703_s7 = spop %1702 }
 0x40d   :  { %s1705_s8 = spop %1704  ;;  %s513_s11 = sadd.f32 %s1703_s7, %s1701_s3 }
 0x410   :  { %s1707_s9 = spop %1706 }
 0x411   :  { %s683_s13 = sadd.f32 %s1707_s9, %s513_s11 }
 0x413   :  { %v1045_v2 = vpop.xlane.xlu0 %1044 }
 0x414   :  { %v1046_v42 = vrot.slane %v1045_v2, 4 }
 0x416   :  { %v1047_v41 = vadd.f32 %v1046_v42, %v1045_v2 }
 0x417   :  { %v1246_v60 = vpop.permute.xlu0 %1245 }
 0x418   :  { %v1250_v55 = vsel %vm478_vm12, %v1246_v60, 0.0  ;;  %v1048_v62 = vrot.slane %v1047_v41, 2 }
 0x419   :  { %v1251_v35 = vadd.f32 %v1250_v55, %v1249_v29 }
 0x41a   :  { %v1049_v50 = vadd.f32 %v1048_v62, %v1047_v41 }
 0x41b   :  { %1252 = vadd.xlane.f32.xlu1 %v1251_v35 }
 0x41c   :  { %v1050_v11 = vrot.slane %v1049_v50, 1 }
 0x41e   :  { %v1051_v17 = vadd.f32 %v1050_v11, %v1049_v50 }
 0x41f   :  { %1437 = vadd.xlane.f32.xlu1 %v1436_v32 }
 0x448   :  { %v1230_v49 = vpop.xlane.xlu0 %1229 }
 0x449   :  { %v1231_v63 = vrot.slane %v1230_v49, 4 }
 0x44b   :  { %v1232_v53 = vadd.f32 %v1231_v63, %v1230_v49 }
 0x44d   :  { %v1233_v57 = vrot.slane %v1232_v53, 2 }
 0x44f   :  { %v1234_v5 = vadd.f32 %v1233_v57, %v1232_v53 }
 0x451   :  { %v1235_v45 = vrot.slane %v1234_v5, 1 }
 0x453   :  { %v1236_v60 = vadd.f32 %v1235_v45, %v1234_v5 }
 0x460   :  { %v698_v56 = vpop.xlane.xlu1 %697 }
 0x461   :  { %v699_v46 = vrot.slane %v698_v56, 4 }
 0x463   :  { %v700_v44 = vadd.f32 %v699_v46, %v698_v56 }
 0x465   :  { %v701_v36 = vrot.slane %v700_v44, 2 }
 0x467   :  { %v702_v37 = vadd.f32 %v701_v36, %v700_v44 }
 0x468   :  { %v883_v54 = vpop.xlane.xlu1 %882 }
 0x469   :  { %v884_v23 = vrot.slane %v883_v54, 4  ;;  %v703_v0 = vrot.slane %v702_v37, 1 }
 0x46b   :  { %v885_v24 = vadd.f32 %v884_v23, %v883_v54  ;;  %v704_v6 = vadd.f32 %v703_v0, %v702_v37 }
 0x46c   :  { %v1415_v55 = vpop.xlane.xlu1 %1414 }
 0x46d   :  { %v886_v12 = vrot.slane %v885_v24, 2  ;;  %1708 = vpush %v704_v6  ;;  %v1416_v15 = vrot.slane %v1415_v55, 4 }
 0x46e   :  { %1710 = vpush %v782_v43 }
 0x46f   :  { %1712 = vpush %v866_v13  ;;  %v887_v8 = vadd.f32 %v886_v12, %v885_v24  ;;  %v1417_v61 = vadd.f32 %v1416_v15, %v1415_v55 }
 0x470   :  { %v1068_v25 = vpop.xlane.xlu0 %1067 }
 0x471   :  { %v1069_v3 = vrot.slane %v1068_v25, 4  ;;  %v888_v4 = vrot.slane %v887_v8, 1  ;;  %v1418_v38 = vrot.slane %v1417_v61, 2 }
 0x473   :  { %v1070_v14 = vadd.f32 %v1069_v3, %v1068_v25  ;;  %v889_v22 = vadd.f32 %v888_v4, %v887_v8  ;;  %v1419_v47 = vadd.f32 %v1418_v38, %v1417_v61 }
 0x474   :  { %v1331_v29 = vpop.xlane.xlu0 %1330 }
 0x475   :  { %v1071_v16 = vrot.slane %v1070_v14, 2  ;;  %1714 = vpush %v889_v22  ;;  %v1332_v35 = vrot.slane %v1331_v29, 4  ;;  %v1420_v54 = vrot.slane %v1419_v47, 1 }
 0x476   :  { %1716 = vpush %v967_v33 }
 0x477   :  { %1718 = vpush %v1051_v17  ;;  %v1072_v21 = vadd.f32 %v1071_v16, %v1070_v14  ;;  %v1333_v32 = vadd.f32 %v1332_v35, %v1331_v29  ;;  %v1421_v23 = vadd.f32 %v1420_v54, %v1419_v47 }
 0x478   :  { %v1516_v31 = vpop.xlane.xlu0 %1515 }
 0x479   :  { %v1073_v34 = vrot.slane %v1072_v21, 1  ;;  %v1517_v48 = vrot.slane %v1516_v31, 4  ;;  %v1334_v19 = vrot.slane %v1333_v32, 2 }
 0x47b   :  { %v1074_v2 = vadd.f32 %v1073_v34, %v1072_v21  ;;  %v1518_v9 = vadd.f32 %v1517_v48, %v1516_v31  ;;  %v1335_v44 = vadd.f32 %v1334_v19, %v1333_v32 }
 0x47d   :  { %1720 = vpush %v1074_v2  ;;  %v1519_v42 = vrot.slane %v1518_v9, 2  ;;  %v1336_v37 = vrot.slane %v1335_v44, 1 }
 0x47e   :  { %1722 = vpush %v1152_v30 }
 0x47f   :  { %1724 = vpush %v1236_v60  ;;  %v1520_v49 = vadd.f32 %v1519_v42, %v1518_v9  ;;  %v1337_v62 = vadd.f32 %v1336_v37, %v1335_v44 }
 0x481   :  { %v1521_v63 = vrot.slane %v1520_v49, 1 }
 0x483   :  { %v1522_v6 = vadd.f32 %v1521_v63, %v1520_v49 }
 0x49e   :  { %s1709_s12 = spop %1708 }
 0x49f   :  { %s706_s14 = sadd.f32 %s1709_s12, %s683_s13  ;;  %s1711_s15 = spop %1710 }
 0x4a0   :  { %s1713_s16 = spop %1712  ;;  %s784_s23 = sadd.f32 %s1711_s15, %s1705_s8 }
 0x4a1   :  { %s868_s1 = sadd.f32 %s1713_s16, %s706_s14  ;;  %s1913_s8 = scalar_lea.hbm %s2606_s5, 16 }
 0x4a2   :  { %p1914_p12 = scmp.ne.s32.totalorder %s2606_s5, %s1913_s8  ;;  %p1917_p13 = scmp.lt.u32.totalorder %s1913_s8, %s2606_s5 }
 0x4a4   :  { %p1919_p0 = pnand %p1917_p13, %p1914_p12 }
 0x4a6   :  { %s1715_s17 = spop %1714 }
 0x4a7   :  { %s891_s20 = sadd.f32 %s1715_s17, %s868_s1  ;;  %s1717_s0 = spop %1716 }
 0x4a8   :  { %v1253_v7 = vpop.xlane.xlu1 %1252  ;;  %s1719_s28 = spop %1718  ;;  %s969_s26 = sadd.f32 %s1717_s0, %s784_s23 }
 0x4a9   :  { %v1254_v39 = vrot.slane %v1253_v7, 4  ;;  %s1053_s10 = sadd.f32 %s1719_s28, %s891_s20 }
 0x4ab   :  { %v1255_v56 = vadd.f32 %v1254_v39, %v1253_v7 }
 0x4ac   :  { %v1438_v46 = vpop.xlane.xlu1 %1437 }
 0x4ad   :  { %v1256_v18 = vrot.slane %v1255_v56, 2  ;;  %v1439_v40 = vrot.slane %v1438_v46, 4 }
 0x4ae   :  { %s1721_s29 = spop %1720 }
 0x4af   :  { %v1440_v41 = vadd.f32 %v1439_v40, %v1438_v46  ;;  %v1257_v36 = vadd.f32 %v1256_v18, %v1255_v56  ;;  %s1076_s21 = sadd.f32 %s1721_s29, %s1053_s10  ;;  %s1723_s22 = spop %1722 }
 0x4b0   :  { %s1725_s24 = spop %1724  ;;  %s1154_s4 = sadd.f32 %s1723_s22, %s969_s26 }
 0x4b1   :  { %v1441_v51 = vrot.slane %v1440_v41, 2  ;;  %v1258_v26 = vrot.slane %v1257_v36, 1  ;;  %s1238_s25 = sadd.f32 %s1725_s24, %s1076_s21 }
 0x4b3   :  { %v1442_v59 = vadd.f32 %v1441_v51, %v1440_v41  ;;  %v1259_v10 = vadd.f32 %v1258_v26, %v1257_v36 }
 0x4b5   :  { %1726 = vpush %v1259_v10  ;;  %v1443_v0 = vrot.slane %v1442_v59, 1 }
 0x4b6   :  { %1728 = vpush %v1337_v62 }
 0x4b7   :  { %1730 = vpush %v1421_v23  ;;  %v1444_v24 = vadd.f32 %v1443_v0, %v1442_v59 }
 0x4b9   :  { %1732 = vpush %v1444_v24 }
 0x4ba   :  { %1734 = vpush %v1522_v6 }
 0x4e6   :  { %s1727_s27 = spop %1726 }
 0x4e7   :  { %s1261_s2 = sadd.f32 %s1727_s27, %s1238_s25  ;;  %s1729_s30 = spop %1728 }
 0x4e8   :  { %s1731_s18 = spop %1730  ;;  %s1339_s6 = sadd.f32 %s1729_s30, %s1154_s4 }
 0x4e9   :  { %s1423_s19 = sadd.f32 %s1731_s18, %s1261_s2 }
 0x4ea   :  { %s1733_s3 = spop %1732 }
 0x4eb   :  { %s1446_s7 = sadd.f32 %s1733_s3, %s1423_s19  ;;  %s1735_s9 = spop %1734 }
 0x4ec   :  { %s1524_s11 = sadd.f32 %s1735_s9, %s1339_s6 }
 0x4ed   :  { %1528 = sst [smem:[#allocation11 + $0x1]] %s1446_s7 }
 0x4ee   :  { %1530 = sst [smem:[#allocation11 + $0x2]] %s1524_s11 }
 0x4ef   :  { %1922 = shalt.err (!%p1919_p0)
}
 0x4f0   :  { %s1945_s1 = smov [#allocation11]  }
 0x4f1   :  { %1538 = dma.smem_to_hbm %s1945_s1, 16, %s2606_s5, [#allocation4]  }
 0x4f2   :  { %1929 = dma.done.wait [#allocation4], 16  }
 0x4f3   :  { %1930 = vsyncadd [#allocation4], 4294967280 }
 0x4f4   :  { %1542 = sfence }
 0x4f5   :  { %1543 = vsyncpa [#allocation3], 1 }
 0x4f6   :  { %1544 = vsyncpa [#allocation6], 1 }
 0x4f7   :  { %1545 = vsyncpa [#allocation9], 1 }
 0x4f8   :  { %1546 = vsyncpa [#allocation4], 1 }

</bundles_post_ra>
